<compile_context>
chip_gen: v7x
topology: tpu7x:2x2x1
jax: 0.10.0
libtpu: 0.0.40
codegen_flags: <defaults>
</compile_context>

<pallas_src>
import functools

import jax
import jax.numpy as jnp
from jax.experimental import pallas as pl
from jax.experimental.pallas import tpu as pltpu


def _round_up(x, m):
    return (x + m - 1) // m * m


# ----------------------------- Pallas kernel ------------------------------ #
def _fused_double_conv_kernel(x_ref, w1_ref, b1_ref, w2_ref, b2_ref, o_ref,
                              y1p_ref, *, tr, w, wc):
    """One TR-row output stripe of DoubleConv (conv3x3+BN+ReLU, twice).

    x_ref  : ((tr+2)*wc, 9*Cin)  bf16 pre-built conv1 im2col stripe
    w1_ref : (9*Cin, c1p)        bf16 folded conv1 weights (lanes padded to 128)
    b1_ref : (1, c1p)            f32  folded conv1 bias
    w2_ref : (9*c1p, c2p)        bf16 folded conv2 weights
    b2_ref : (1, c2p)            f32  folded conv2 bias
    o_ref  : (tr*w, c2p)         bf16 output stripe (rows flattened, lane padded)
    y1p_ref: (tr+2, wc, c1p)     bf16 scratch: conv1 result incl. conv2 zero ring
    """
    t = pl.program_id(1)
    c1p = w1_ref.shape[-1]
    c2p = o_ref.shape[-1]

    # ---- stage 1: conv1 + BN + ReLU (single GEMM on the hoisted im2col) ----
    y1 = jnp.dot(x_ref[...], w1_ref[...], preferred_element_type=jnp.float32)
    y1 = jnp.maximum(y1 + b1_ref[...], 0.0)
    # wc is a multiple of 8 -> this reshape + store is one aligned, lane-dense
    # contiguous store of the whole stripe.
    y1p_ref[...] = y1.reshape(tr + 2, wc, c1p).astype(y1p_ref.dtype)

    # Zero ring for conv2's SAME padding.  Left/right edge columns every step;
    # the out-of-image top/bottom halo rows only on the first/last stripe.
    zcol = jnp.zeros((tr + 2, 1, c1p), y1p_ref.dtype)
    y1p_ref[:, 0:1, :] = zcol
    y1p_ref[:, w + 1:w + 2, :] = zcol

    @pl.when(t == 0)
    def _():
        y1p_ref[0:1, :, :] = jnp.zeros((1, wc, c1p), y1p_ref.dtype)

    @pl.when(t == pl.num_programs(1) - 1)
    def _():
        y1p_ref[tr + 1:tr + 2, :, :] = jnp.zeros((1, wc, c1p), y1p_ref.dtype)

    # ---- stage 2: conv2 + BN + ReLU, GEMM split over kh (K = 3*c1p) --------
    acc = jnp.zeros((tr * w, c2p), jnp.float32)
    for kh in range(3):
        slab = jnp.concatenate(
            [y1p_ref[kh:kh + tr, kw:kw + w, :] for kw in range(3)], axis=-1)
        acc = acc + jnp.dot(slab.reshape(tr * w, 3 * c1p),
                            w2_ref[kh * 3 * c1p:(kh + 1) * 3 * c1p, :],
                            preferred_element_type=jnp.float32)
    y2 = jnp.maximum(acc + b2_ref[...], 0.0)
    o_ref[...] = y2.astype(o_ref.dtype)


# ------------------------------ JAX wrapper -------------------------------- #
def _fold_bn(w, b, gamma, beta, mean, var, eps=1e-5):
    scale = gamma / jnp.sqrt(var + eps)
    return w * scale[:, None, None, None], (b - mean) * scale + beta


def _pack_w(w_oihw, cin_used, cin_pad, cout_pad):
    """(Cout, Cin, 3, 3) -> (9*cin_pad, cout_pad); row order (kh, kw, cin)."""
    cout = w_oihw.shape[0]
    w = jnp.pad(w_oihw, ((0, 0), (0, cin_pad - cin_used), (0, 0), (0, 0)))
    w = jnp.transpose(w, (2, 3, 1, 0)).reshape(9 * cin_pad, cout)
    return jnp.pad(w, ((0, 0), (0, cout_pad - cout)))


def _pick_row_block(h, w, requested=None, target_gemm_rows=2048):
    """Largest divisor of h that keeps tr*W around target_gemm_rows.

    NOTE: a requested row_block that does not divide h is replaced by the
    largest divisor <= request (documented tradeoff, not an error).
    """
    if requested is not None:
        req = max(1, min(requested, h))
    else:
        req = max(1, target_gemm_rows // max(w, 1))
    best = 1
    for d in range(1, h + 1):
        if h % d == 0 and d <= req:
            best = d
    return best


def _vmem_limit_bytes(tr, w, wc, k1, c1p, c2p):
    """Derive a VMEM budget from the actual block / temp sizes (<= 48 MiB)."""
    blk_in = (tr + 2) * wc * k1 * 2                      # bf16 im2col stripe
    blk_out = tr * w * c2p * 2                           # bf16 output stripe
    weights = k1 * c1p * 2 + 9 * c1p * c2p * 2 + (c1p + c2p) * 4
    scratch = (tr + 2) * wc * c1p * 2                    # bf16 y1 scratch
    temps = ((tr + 2) * wc * c1p * 4                     # y1 f32
             + tr * w * 3 * c1p * 2                      # conv2 slab bf16
             + tr * w * c2p * 4)                         # acc f32
    need = 2 * (blk_in + blk_out + weights) + scratch + temps
    return int(min(max(2 * need, 16 * 2**20), 48 * 2**20))


def inconv_forward(x_nchw, p, *, row_block=None, eps=1e-5):
    """InConv forward: x (N, Cin, H, W) -> (N, Cout, H, W)."""
    N, Cin, H, W = x_nchw.shape
    Cout = p["w1"].shape[0]
    c1p = _round_up(Cout, 128)   # conv1 output channels, lane-padded
    c2p = _round_up(Cout, 128)   # conv2 output channels, lane-padded
    k1 = 9 * Cin                 # conv1 GEMM reduction dim

    # Fold BN (eval mode) into both convs; pad channel/lane dims to 128.
    w1f, b1f = _fold_bn(p["w1"], p["b1"], p["g1"], p["beta1"], p["m1"], p["v1"], eps)
    w2f, b2f = _fold_bn(p["w2"], p["b2"], p["g2"], p["beta2"], p["m2"], p["v2"], eps)
    w1m = _pack_w(w1f, Cin, Cin, c1p).astype(jnp.bfloat16)    # (9*Cin, c1p)
    w2m = _pack_w(w2f, Cout, c1p, c2p).astype(jnp.bfloat16)   # (9*c1p, c2p)
    b1v = jnp.pad(b1f, (0, c1p - Cout)).reshape(1, c1p).astype(jnp.float32)
    b2v = jnp.pad(b2f, (0, c2p - Cout)).reshape(1, c2p).astype(jnp.float32)

    tr = _pick_row_block(H, W, row_block)
    T = H // tr
    Wc = _round_up(W + 2, 8)     # conv1 output columns (incl. ring), sublane-padded

    # NCHW -> NHWC (bf16), pad spatially, build conv1's im2col stripes in the
    # wrapper (row order (kh, kw, cin)).  Cin is tiny, so the 9x duplication is
    # cheap; the kernel then does a plain GEMM with zero in-kernel relayout.
    x = jnp.transpose(x_nchw, (0, 2, 3, 1)).astype(jnp.bfloat16)
    x_pad = jnp.pad(x, ((0, 0), (2, 2), (2, Wc - W), (0, 0)))        # (N,H+4,Wc+2,Cin)
    rows = jnp.arange(T)[:, None] * tr + jnp.arange(tr + 4)[None, :]  # (T, tr+4)
    x_halo = x_pad[:, rows]                                           # (N,T,tr+4,Wc+2,Cin)
    cols = [x_halo[:, :, kh:kh + tr + 2, kw:kw + Wc, :]
            for kh in range(3) for kw in range(3)]
    x_cols = jnp.concatenate(cols, axis=-1).reshape(N, T, (tr + 2) * Wc, k1)

    kernel = functools.partial(_fused_double_conv_kernel, tr=tr, w=W, wc=Wc)
    out = pl.pallas_call(
        kernel,
        out_shape=jax.ShapeDtypeStruct((N, H * W, c2p), jnp.bfloat16),
        grid=(N, T),
        in_specs=[
            pl.BlockSpec((pl.Squeezed(), pl.Squeezed(), (tr + 2) * Wc, k1),
                         lambda n, t: (n, t, 0, 0)),
            pl.BlockSpec((k1, c1p), lambda n, t: (0, 0)),
            pl.BlockSpec((1, c1p), lambda n, t: (0, 0)),
            pl.BlockSpec((9 * c1p, c2p), lambda n, t: (0, 0)),
            pl.BlockSpec((1, c2p), lambda n, t: (0, 0)),
        ],
        out_specs=pl.BlockSpec((pl.Squeezed(), tr * W, c2p),
                               lambda n, t: (n, t, 0)),
        scratch_shapes=[pltpu.VMEM((tr + 2, Wc, c1p), jnp.bfloat16)],
        compiler_params=pltpu.CompilerParams(
            dimension_semantics=("parallel", "parallel"),
            vmem_limit_bytes=_vmem_limit_bytes(tr, W, Wc, k1, c1p, c2p)),
    )(x_cols, w1m, b1v, w2m, b2v)

    # Strip lane padding, restore the module's NCHW / f32 interface.
    # (If the downstream consumer accepts NHWC bf16, drop this pass.)
    out = out.reshape(N, H, W, c2p)[..., :Cout]
    return jnp.transpose(out, (0, 3, 1, 2)).astype(jnp.float32)


# ------------------------------- params ------------------------------------ #
def init_inconv_params(key, in_ch, out_ch):
    ks = jax.random.split(key, 10)
    p = {}
    # conv1: Conv2d(in_ch, out_ch, 3) + BN
    p["w1"] = 0.1 * jax.random.normal(ks[0], (out_ch, in_ch, 3, 3), jnp.float32)
    p["b1"] = 0.1 * jax.random.normal(ks[1], (out_ch,), jnp.float32)
    p["g1"] = 1.0 + 0.1 * jax.random.normal(ks[2], (out_ch,), jnp.float32)
    p["beta1"] = 0.1 * jax.random.normal(ks[3], (out_ch,), jnp.float32)
    p["m1"] = 0.05 * jax.random.normal(ks[4], (out_ch,), jnp.float32)
    p["v1"] = 1.0 + 0.1 * jax.random.uniform(ks[5], (out_ch,), jnp.float32)
    # conv2: Conv2d(out_ch, out_ch, 3) + BN
    p["w2"] = 0.1 * jax.random.normal(ks[6], (out_ch, out_ch, 3, 3), jnp.float32)
    p["b2"] = 0.1 * jax.random.normal(ks[7], (out_ch,), jnp.float32)
    p["g2"] = 1.0 + 0.1 * jax.random.normal(ks[8], (out_ch,), jnp.float32)
    p["beta2"] = 0.1 * jax.random.normal(ks[9], (out_ch,), jnp.float32)
    p["m2"] = jnp.zeros((out_ch,), jnp.float32)
    p["v2"] = jnp.ones((out_ch,), jnp.float32)
    return p


# --------------------------- pure-JAX reference ---------------------------- #
def _ref_conv_bn_relu(x_nchw, w, b, gamma, beta, mean, var, eps=1e-5):
    y = jax.lax.conv_general_dilated(
        x_nchw, w, window_strides=(1, 1), padding="SAME",
        dimension_numbers=("NCHW", "OIHW", "NCHW"))
    y = y + b[None, :, None, None]
    y = (gamma[None, :, None, None] * (y - mean[None, :, None, None])
         / jnp.sqrt(var + eps)[None, :, None, None] + beta[None, :, None, None])
    return jnp.maximum(y, 0.0)


def inconv_reference(x_nchw, p):
    y = _ref_conv_bn_relu(x_nchw, p["w1"], p["b1"], p["g1"], p["beta1"], p["m1"], p["v1"])
    y = _ref_conv_bn_relu(y, p["w2"], p["b2"], p["g2"], p["beta2"], p["m2"], p["v2"])
    return y


# --------------------------------- main ------------------------------------ #
if __name__ == "__main__":
    key = jax.random.PRNGKey(0)
    k_x, k_p = jax.random.split(key)

    N, in_ch, out_ch, H, W = 2, 4, 8, 16, 16
    x = jax.random.normal(k_x, (N, in_ch, H, W), jnp.float32)
    params = init_inconv_params(k_p, in_ch, out_ch)

    fwd = jax.jit(inconv_forward)
    out = jax.block_until_ready(fwd(x, params))

    ref = jax.block_until_ready(inconv_reference(x, params))
    assert out.shape == (N, out_ch, H, W), out.shape
    max_err = float(jnp.max(jnp.abs(out - ref)))
    # bf16 activations/weights/output with f32 accumulation -> bf16-level
    # tolerance vs. the f32 reference (documented precision tradeoff).
    assert jnp.allclose(out, ref, atol=3e-2, rtol=3e-2), max_err

    print("KERNEL_OK")
</pallas_src>

<mosaic_0001>
module attributes {stable_mosaic.version = 11 : i64} {
  func.func @_fused_double_conv_kernel(%arg0: i32, %arg1: i32, %arg2: memref<1x1x432x36xbf16, #tpu.memory_space<vmem>>, %arg3: memref<36x128xbf16, #tpu.memory_space<vmem>>, %arg4: memref<1x128xf32, #tpu.memory_space<vmem>>, %arg5: memref<1152x128xbf16, #tpu.memory_space<vmem>>, %arg6: memref<1x128xf32, #tpu.memory_space<vmem>>, %arg7: memref<1x256x128xbf16, #tpu.memory_space<vmem>>, %arg8: memref<18x24x128xbf16, #tpu.memory_space<vmem>>) attributes {dimension_semantics = [#tpu.dimension_semantics<parallel>, #tpu.dimension_semantics<parallel>], iteration_bounds = array<i64: 2, 1>, scalar_prefetch = 0 : i64, scratch_operands = 1 : i64, tpu.core_type = #tpu.core_type<tc>, window_params = [{transform_indices = @transform_0, window_bounds = array<i64: 1, 1, 432, 36>}, {pipeline_mode = #tpu.pipeline_mode<synchronous>, transform_indices = @transform_1, window_bounds = array<i64: 36, 128>}, {pipeline_mode = #tpu.pipeline_mode<synchronous>, transform_indices = @transform_2, window_bounds = array<i64: 1, 128>}, {pipeline_mode = #tpu.pipeline_mode<synchronous>, transform_indices = @transform_3, window_bounds = array<i64: 1152, 128>}, {pipeline_mode = #tpu.pipeline_mode<synchronous>, transform_indices = @transform_4, window_bounds = array<i64: 1, 128>}, {transform_indices = @transform_5, window_bounds = array<i64: 1, 256, 128>}]} {
    %c0 = arith.constant 0 : index
    %c0_0 = arith.constant 0 : index
    %c0_1 = arith.constant 0 : index
    %c0_2 = arith.constant 0 : index
    %0 = vector.load %arg2[%c0, %c0_0, %c0_1, %c0_2] : memref<1x1x432x36xbf16, #tpu.memory_space<vmem>>, vector<1x1x432x36xbf16>
    %1 = vector.shape_cast %0 : vector<1x1x432x36xbf16> to vector<432x36xbf16>
    %c0_3 = arith.constant 0 : index
    %c0_4 = arith.constant 0 : index
    %2 = vector.load %arg3[%c0_3, %c0_4] : memref<36x128xbf16, #tpu.memory_space<vmem>>, vector<36x128xbf16>
    %cst = arith.constant dense<0.000000e+00> : vector<432x128xf32>
    %3 = tpu.matmul %1, %2, %cst {dimension_numbers = #tpu.dot_dimension_numbers<[1], [0], [0], [1], [0, 0, 1, 1], [], []>} : vector<432x36xbf16>, vector<36x128xbf16>, vector<432x128xf32> -> vector<432x128xf32>
    %c0_5 = arith.constant 0 : index
    %c0_6 = arith.constant 0 : index
    %4 = vector.load %arg4[%c0_5, %c0_6] : memref<1x128xf32, #tpu.memory_space<vmem>>, vector<1x128xf32>
    %5 = vector.broadcast %4 : vector<1x128xf32> to vector<432x128xf32>
    %6 = arith.addf %3, %5 : vector<432x128xf32>
    %cst_7 = arith.constant 0.000000e+00 : f32
    %7 = vector.broadcast %cst_7 : f32 to vector<432x128xf32>
    %8 = arith.maximumf %6, %7 : vector<432x128xf32>
    %9 = vector.shape_cast %8 : vector<432x128xf32> to vector<18x24x128xf32>
    %10 = arith.truncf %9 : vector<18x24x128xf32> to vector<18x24x128xbf16>
    %c0_8 = arith.constant 0 : index
    %c0_9 = arith.constant 0 : index
    %c0_10 = arith.constant 0 : index
    %11 = vector.load %arg8[%c0_8, %c0_9, %c0_10] : memref<18x24x128xbf16, #tpu.memory_space<vmem>>, vector<18x24x128xbf16>
    tpu.vector_store %arg8[%c0_8, %c0_9, %c0_10], %10 {strides = array<i32>} : memref<18x24x128xbf16, #tpu.memory_space<vmem>>, vector<18x24x128xbf16>,
    %cst_11 = arith.constant 0.000000e+00 : bf16
    %12 = vector.broadcast %cst_11 : bf16 to vector<18x1x128xbf16>
    %c0_12 = arith.constant 0 : index
    %c0_13 = arith.constant 0 : index
    %c0_14 = arith.constant 0 : index
    %13 = vector.load %arg8[%c0_12, %c0_13, %c0_14] : memref<18x24x128xbf16, #tpu.memory_space<vmem>>, vector<18x1x128xbf16>
    tpu.vector_store %arg8[%c0_12, %c0_13, %c0_14], %12 {strides = array<i32>} : memref<18x24x128xbf16, #tpu.memory_space<vmem>>, vector<18x1x128xbf16>,
    %c0_15 = arith.constant 0 : index
    %c17 = arith.constant 17 : index
    %c0_16 = arith.constant 0 : index
    %14 = vector.load %arg8[%c0_15, %c17, %c0_16] : memref<18x24x128xbf16, #tpu.memory_space<vmem>>, vector<18x1x128xbf16>
    tpu.vector_store %arg8[%c0_15, %c17, %c0_16], %12 {strides = array<i32>} : memref<18x24x128xbf16, #tpu.memory_space<vmem>>, vector<18x1x128xbf16>,
    %c0_i32 = arith.constant 0 : i32
    %15 = arith.cmpi eq, %arg1, %c0_i32 : i32
    %16 = arith.extui %15 : i1 to i32
    %c0_i32_17 = arith.constant 0 : i32
    %17 = arith.cmpi ne, %16, %c0_i32_17 : i32
    scf.if %17 {
      %cst_59 = arith.constant 0.000000e+00 : bf16
      %55 = vector.broadcast %cst_59 : bf16 to vector<1x24x128xbf16>
      %c0_60 = arith.constant 0 : index
      %c0_61 = arith.constant 0 : index
      %c0_62 = arith.constant 0 : index
      %56 = vector.load %arg8[%c0_60, %c0_61, %c0_62] : memref<18x24x128xbf16, #tpu.memory_space<vmem>>, vector<1x24x128xbf16>
      tpu.vector_store %arg8[%c0_60, %c0_61, %c0_62], %55 {strides = array<i32>} : memref<18x24x128xbf16, #tpu.memory_space<vmem>>, vector<1x24x128xbf16>,
    } else {
    }
    %c0_i32_18 = arith.constant 0 : i32
    %18 = arith.cmpi eq, %arg1, %c0_i32_18 : i32
    %19 = arith.extui %18 : i1 to i32
    %c0_i32_19 = arith.constant 0 : i32
    %20 = arith.cmpi ne, %19, %c0_i32_19 : i32
    scf.if %20 {
      %cst_59 = arith.constant 0.000000e+00 : bf16
      %55 = vector.broadcast %cst_59 : bf16 to vector<1x24x128xbf16>
      %c17_60 = arith.constant 17 : index
      %c0_61 = arith.constant 0 : index
      %c0_62 = arith.constant 0 : index
      %56 = vector.load %arg8[%c17_60, %c0_61, %c0_62] : memref<18x24x128xbf16, #tpu.memory_space<vmem>>, vector<1x24x128xbf16>
      tpu.vector_store %arg8[%c17_60, %c0_61, %c0_62], %55 {strides = array<i32>} : memref<18x24x128xbf16, #tpu.memory_space<vmem>>, vector<1x24x128xbf16>,
    } else {
    }
    %cst_20 = arith.constant 0.000000e+00 : f32
    %21 = vector.broadcast %cst_20 : f32 to vector<256x128xf32>
    %c0_21 = arith.constant 0 : index
    %c0_22 = arith.constant 0 : index
    %c0_23 = arith.constant 0 : index
    %22 = vector.load %arg8[%c0_21, %c0_22, %c0_23] : memref<18x24x128xbf16, #tpu.memory_space<vmem>>, vector<16x16x128xbf16>
    %c0_24 = arith.constant 0 : index
    %c1 = arith.constant 1 : index
    %c0_25 = arith.constant 0 : index
    %23 = vector.load %arg8[%c0_24, %c1, %c0_25] : memref<18x24x128xbf16, #tpu.memory_space<vmem>>, vector<16x16x128xbf16>
    %c0_26 = arith.constant 0 : index
    %c2 = arith.constant 2 : index
    %c0_27 = arith.constant 0 : index
    %24 = vector.load %arg8[%c0_26, %c2, %c0_27] : memref<18x24x128xbf16, #tpu.memory_space<vmem>>, vector<16x16x128xbf16>
    %25 = tpu.concatenate %22, %23, %24 in 2 : vector<16x16x128xbf16>, vector<16x16x128xbf16>, vector<16x16x128xbf16> -> vector<16x16x384xbf16>
    %26 = vector.shape_cast %25 : vector<16x16x384xbf16> to vector<256x384xbf16>
    %c0_28 = arith.constant 0 : index
    %c0_29 = arith.constant 0 : index
    %27 = vector.load %arg5[%c0_28, %c0_29] : memref<1152x128xbf16, #tpu.memory_space<vmem>>, vector<384x128xbf16>
    %cst_30 = arith.constant dense<0.000000e+00> : vector<256x128xf32>
    %28 = tpu.matmul %26, %27, %cst_30 {dimension_numbers = #tpu.dot_dimension_numbers<[1], [0], [0], [1], [0, 0, 1, 1], [], []>} : vector<256x384xbf16>, vector<384x128xbf16>, vector<256x128xf32> -> vector<256x128xf32>
    %29 = arith.addf %21, %28 : vector<256x128xf32>
    %c1_31 = arith.constant 1 : index
    %c0_32 = arith.constant 0 : index
    %c0_33 = arith.constant 0 : index
    %30 = vector.load %arg8[%c1_31, %c0_32, %c0_33] : memref<18x24x128xbf16, #tpu.memory_space<vmem>>, vector<16x16x128xbf16>
    %c1_34 = arith.constant 1 : index
    %c1_35 = arith.constant 1 : index
    %c0_36 = arith.constant 0 : index
    %31 = vector.load %arg8[%c1_34, %c1_35, %c0_36] : memref<18x24x128xbf16, #tpu.memory_space<vmem>>, vector<16x16x128xbf16>
    %c1_37 = arith.constant 1 : index
    %c2_38 = arith.constant 2 : index
    %c0_39 = arith.constant 0 : index
    %32 = vector.load %arg8[%c1_37, %c2_38, %c0_39] : memref<18x24x128xbf16, #tpu.memory_space<vmem>>, vector<16x16x128xbf16>
    %33 = tpu.concatenate %30, %31, %32 in 2 : vector<16x16x128xbf16>, vector<16x16x128xbf16>, vector<16x16x128xbf16> -> vector<16x16x384xbf16>
    %34 = vector.shape_cast %33 : vector<16x16x384xbf16> to vector<256x384xbf16>
    %c384 = arith.constant 384 : index
    %c0_40 = arith.constant 0 : index
    %35 = vector.load %arg5[%c384, %c0_40] : memref<1152x128xbf16, #tpu.memory_space<vmem>>, vector<384x128xbf16>
    %cst_41 = arith.constant dense<0.000000e+00> : vector<256x128xf32>
    %36 = tpu.matmul %34, %35, %cst_41 {dimension_numbers = #tpu.dot_dimension_numbers<[1], [0], [0], [1], [0, 0, 1, 1], [], []>} : vector<256x384xbf16>, vector<384x128xbf16>, vector<256x128xf32> -> vector<256x128xf32>
    %37 = arith.addf %29, %36 : vector<256x128xf32>
    %c2_42 = arith.constant 2 : index
    %c0_43 = arith.constant 0 : index
    %c0_44 = arith.constant 0 : index
    %38 = vector.load %arg8[%c2_42, %c0_43, %c0_44] : memref<18x24x128xbf16, #tpu.memory_space<vmem>>, vector<16x16x128xbf16>
    %c2_45 = arith.constant 2 : index
    %c1_46 = arith.constant 1 : index
    %c0_47 = arith.constant 0 : index
    %39 = vector.load %arg8[%c2_45, %c1_46, %c0_47] : memref<18x24x128xbf16, #tpu.memory_space<vmem>>, vector<16x16x128xbf16>
    %c2_48 = arith.constant 2 : index
    %c2_49 = arith.constant 2 : index
    %c0_50 = arith.constant 0 : index
    %40 = vector.load %arg8[%c2_48, %c2_49, %c0_50] : memref<18x24x128xbf16, #tpu.memory_space<vmem>>, vector<16x16x128xbf16>
    %41 = tpu.concatenate %38, %39, %40 in 2 : vector<16x16x128xbf16>, vector<16x16x128xbf16>, vector<16x16x128xbf16> -> vector<16x16x384xbf16>
    %42 = vector.shape_cast %41 : vector<16x16x384xbf16> to vector<256x384xbf16>
    %c768 = arith.constant 768 : index
    %c0_51 = arith.constant 0 : index
    %43 = vector.load %arg5[%c768, %c0_51] : memref<1152x128xbf16, #tpu.memory_space<vmem>>, vector<384x128xbf16>
    %cst_52 = arith.constant dense<0.000000e+00> : vector<256x128xf32>
    %44 = tpu.matmul %42, %43, %cst_52 {dimension_numbers = #tpu.dot_dimension_numbers<[1], [0], [0], [1], [0, 0, 1, 1], [], []>} : vector<256x384xbf16>, vector<384x128xbf16>, vector<256x128xf32> -> vector<256x128xf32>
    %45 = arith.addf %37, %44 : vector<256x128xf32>
    %c0_53 = arith.constant 0 : index
    %c0_54 = arith.constant 0 : index
    %46 = vector.load %arg6[%c0_53, %c0_54] : memref<1x128xf32, #tpu.memory_space<vmem>>, vector<1x128xf32>
    %47 = vector.broadcast %46 : vector<1x128xf32> to vector<256x128xf32>
    %48 = arith.addf %45, %47 : vector<256x128xf32>
    %cst_55 = arith.constant 0.000000e+00 : f32
    %49 = vector.broadcast %cst_55 : f32 to vector<256x128xf32>
    %50 = arith.maximumf %48, %49 : vector<256x128xf32>
    %51 = arith.truncf %50 : vector<256x128xf32> to vector<256x128xbf16>
    %c0_56 = arith.constant 0 : index
    %c0_57 = arith.constant 0 : index
    %c0_58 = arith.constant 0 : index
    %52 = vector.load %arg7[%c0_56, %c0_57, %c0_58] : memref<1x256x128xbf16, #tpu.memory_space<vmem>>, vector<1x256x128xbf16>
    %53 = vector.shape_cast %52 : vector<1x256x128xbf16> to vector<256x128xbf16>
    %54 = vector.shape_cast %51 : vector<256x128xbf16> to vector<1x256x128xbf16>
    tpu.vector_store %arg7[%c0_56, %c0_57, %c0_58], %54 {strides = array<i32>} : memref<1x256x128xbf16, #tpu.memory_space<vmem>>, vector<1x256x128xbf16>,
    return
  }
  func.func @transform_0(%arg0: i32, %arg1: i32) -> (i32, i32, i32, i32) {
    %c0_i32 = arith.constant 0 : i32
    %c0_i32_0 = arith.constant 0 : i32
    %c0_i32_1 = arith.constant 0 : i32
    return %arg0, %arg1, %c0_i32, %c0_i32_0 : i32, i32, i32, i32
  }
  func.func @transform_1(%arg0: i32, %arg1: i32) -> (i32, i32) {
    %c0_i32 = arith.constant 0 : i32
    %c0_i32_0 = arith.constant 0 : i32
    %c0_i32_1 = arith.constant 0 : i32
    return %c0_i32, %c0_i32_0 : i32, i32
  }
  func.func @transform_2(%arg0: i32, %arg1: i32) -> (i32, i32) {
    %c0_i32 = arith.constant 0 : i32
    %c0_i32_0 = arith.constant 0 : i32
    %c0_i32_1 = arith.constant 0 : i32
    return %c0_i32, %c0_i32_0 : i32, i32
  }
  func.func @transform_3(%arg0: i32, %arg1: i32) -> (i32, i32) {
    %c0_i32 = arith.constant 0 : i32
    %c0_i32_0 = arith.constant 0 : i32
    %c0_i32_1 = arith.constant 0 : i32
    return %c0_i32, %c0_i32_0 : i32, i32
  }
  func.func @transform_4(%arg0: i32, %arg1: i32) -> (i32, i32) {
    %c0_i32 = arith.constant 0 : i32
    %c0_i32_0 = arith.constant 0 : i32
    %c0_i32_1 = arith.constant 0 : i32
    return %c0_i32, %c0_i32_0 : i32, i32
  }
  func.func @transform_5(%arg0: i32, %arg1: i32) -> (i32, i32, i32) {
    %c0_i32 = arith.constant 0 : i32
    %c0_i32_0 = arith.constant 0 : i32
    return %arg0, %arg1, %c0_i32 : i32, i32, i32
  }
}

</mosaic_0001>

<bundles_post_ra>
// kernel: inconv_forward.1
= control target key start
LH: loop header
LB: loop body
LE: loop exit
PB: predicated region body
PF: predicated region fallthrough
CT: control target
= control target key end

     0   :  { %s6693_s18 = smov 0   ;;  %s6695_s19 = smov 0   ;;  %s8114_s0 = inlined_call_operand.vmem [shape: bf16[2,1,432,36], index: 0, kind: input, shape index: {}]   ;;  %s8115_s1 = inlined_call_operand.vmem [shape: bf16[36,128], index: 1, kind: input, shape index: {}]   ;;  %s8116_s2 = inlined_call_operand.vmem [shape: f32[1,128], index: 2, kind: input, shape index: {}]   ;;  %s8117_s3 = inlined_call_operand.vmem [shape: bf16[1152,128], index: 3, kind: input, shape index: {}]   ;;  %s8118_s4 = inlined_call_operand.vmem [shape: f32[1,128], index: 4, kind: input, shape index: {}]   ;;  %s8119_s5 = inlined_call_operand.vmem [shape: bf16[2,256,128], index: 5, kind: output, shape index: {}]  }
   0x1   :  { %s6697_s20 = smov 0  }
   0x2 LB: > { %s27_s21 = sadd.s32 1, %s6654_s19  ;;  %p4767_p0 = scmp.ge.s32.totalorder %s6658_s20, 1  ;;  %s6658_s20 = sphi %s6697_s20, %s15_s20   ;;  %s6654_s19 = sphi %s6695_s19, %s8169_s19   ;;  %s6650_s18 = sphi %s6693_s18, %s8168_s18  }
   0x3   : > { %p29_p1 = scmp.ge.s32.totalorder %s27_s21, 2  ;;  %p207_p2 = scmp.lt.s32.totalorder %s6658_s20, 3 }
   0x5   : > { %s8171_s21 = smov (%p29_p1, %s27_s21), 0  ;;  %p208_p3 = pnand %p4767_p0, %p207_p2 }
   0x7   : > { %211 = sbr.rel (%p208_p3) target bundleno = 950 (0x3b6), region = 40 }
   0xe   : > { %v6361_v0 = vld [vmem:[%s8115_s1] sm:$0xff]   ;;  %v6660_v1 = vmov 0.0   ;;  %v6362_v2 = vld [vmem:[%s8115_s1 + $0x8] sm:$0xff]   ;;  %v6363_v3 = vld [vmem:[%s8115_s1 + $0x10] ss:$0 sps:$4 sm:$0x33]  }
   0xf   : > { %5915 = vmatprep.subr.bf16.mxu0 %v6660_v1  ;;  %vm6661_vm0 = vmmov 0   ;;  %p243_p4 = scmp.lt.s32.totalorder %s6650_s18, 1  ;;  %vm561_vm1 = vcmask 1041408   ;;  %vm479_vm2 = vcmask 293888   ;;  %v6390_v18 = vld [vmem:[%s8117_s3 + $0x100] sm:$0xff]   ;;  %v6392_v21 = vld [vmem:[%s8117_s3 + $0x108] sm:$0xff]  }
  0x10   : > { %5916 = vmatpush3.bf16.msra.mxu0 %v6361_v0  ;;  %5921 = vmatprep.mubr.msk.bf16.mxu0 %vm6661_vm0, %v6660_v1  ;;  %v563_v4 = vsel %vm561_vm1, %v6363_v3, 0  ;;  %v6391_v19 = vld [vmem:[%s8117_s3 + $0xc0] sm:$0xff]   ;;  %v6393_v22 = vld [vmem:[%s8117_s3 + $0xc8] sm:$0xff]   ;;  %v6394_v23 = vld [vmem:[%s8117_s3 + $0x110] sm:$0xff]   ;;  %vm1156_vm3 = vcmask 1040384   ;;  %vm1745_vm8 = vcmask 1046528  }
  0x11   : > { %5917 = vmatprep.subr.bf16.mxu0 %v6660_v1  ;;  %s8173_s18 = smov (!%p243_p4, %s6650_s18), 1  ;;  %5507 = vmatprep.subr.bf16.mxu1 %v6390_v18  ;;  %v6395_v24 = vld [vmem:[%s8117_s3 + $0xd0] sm:$0xff]   ;;  %v6396_v26 = vld [vmem:[%s8117_s3 + $0x118] sm:$0xff]   ;;  %v6398_v28 = vld [vmem:[%s8117_s3 + $0x140] sm:$0xff]   ;;  %vm1157_vm4 = vsmask.f32 256 }
  0x12   : > { %s6333_s28 = smul.u32 216, %s8173_s18  ;;  %5508 = vmatpush3.bf16.msra.mxu1 %v6391_v19  ;;  %v6397_v27 = vld [vmem:[%s8117_s3 + $0xd8] sm:$0xff]   ;;  %v6399_v29 = vld [vmem:[%s8117_s3 + $0x120] sm:$0xff]   ;;  %v6401_v31 = vld [vmem:[%s8117_s3 + $0x148] sm:$0xff]   ;;  %vm1213_vm6 = vsmask.f32 7938 }
  0x13   : > { %5509 = vmatprep.subr.bf16.mxu1 %v6392_v21  ;;  %v6400_v30 = vld [vmem:[%s8117_s3 + $0xe0] sm:$0xff]   ;;  %v6402_v33 = vld [vmem:[%s8117_s3 + $0x128] sm:$0xff]   ;;  %v6404_v35 = vld [vmem:[%s8117_s3 + $0x150] sm:$0xff]   ;;  %vm1488_vm9 = vsmask.f32 7424  ;;  %s5134_s14 = sshll.u32 %s8173_s18, 7 }
  0x14   : > { %5918 = vmatpush3.bf16.msra.mxu0 %v6362_v2  ;;  %s6731_s6 = scalar_lea.vmem %s8114_s0, %s6333_s28  ;;  %v6403_v34 = vld [vmem:[%s8117_s3 + $0xe8] sm:$0xff]   ;;  %v6405_v36 = vld [vmem:[%s8117_s3 + $0x130] sm:$0xff]   ;;  %v6407_v38 = vld [vmem:[%s8117_s3 + $0x158] sm:$0xff]   ;;  %s8031_s17 = scalar_lea.vmem %s8119_s5, %s5134_s14 }
  0x15   : > { %5919 = vmatprep.subr.bf16.mxu0 %v6660_v1  ;;  %v6364_v5 = vld [vmem:[%s6731_s6] sm:$0xff]   ;;  %v6365_v6 = vld [vmem:[%s6731_s6 + $0x8] sm:$0xff]   ;;  %v6366_v7 = vld [vmem:[%s6731_s6 + $0x10] sm:$0xff]  }
  0x16   : > { %v6367_v8 = vld [vmem:[%s6731_s6 + $0x18] sm:$0xff]   ;;  %v6368_v9 = vld [vmem:[%s6731_s6 + $0x20] sm:$0xff]   ;;  %v6369_v10 = vld [vmem:[%s6731_s6 + $0x28] sm:$0xff]   ;;  %5510 = vmatpush3.bf16.msra.mxu1 %v6393_v22 }
  0x17   : > { %v6370_v11 = vld [vmem:[%s6731_s6 + $0x30] sm:$0xff]   ;;  %v6371_v12 = vld [vmem:[%s6731_s6 + $0x38] sm:$0xff]   ;;  %v6372_v13 = vld [vmem:[%s6731_s6 + $0x40] sm:$0xff]   ;;  %5511 = vmatprep.subr.bf16.mxu1 %v6394_v23 }
  0x18   : > { %5920 = vmatpush3.bf16.msra.mxu0 %v563_v4  ;;  %v6373_v14 = vld [vmem:[%s6731_s6 + $0x48] sm:$0xff]   ;;  %v6374_v15 = vld [vmem:[%s6731_s6 + $0x50] sm:$0xff]   ;;  %v6375_v16 = vld [vmem:[%s6731_s6 + $0x58] sm:$0xff]  }
  0x19   : > { %v6376_v17 = vld [vmem:[%s6731_s6 + $0x60] sm:$0xff]   ;;  %v6377_v20 = vld [vmem:[%s6731_s6 + $0x68] sm:$0xff]   ;;  %v6378_v25 = vld [vmem:[%s6731_s6 + $0x70] sm:$0xff]   ;;  %6029 = vmatprep.subr.bf16.mxu0 %v6398_v28 }
  0x1a   : > { %5512 = vmatpush3.bf16.msra.mxu1 %v6395_v24  ;;  %v6379_v32 = vld [vmem:[%s6731_s6 + $0x78] sm:$0xff]   ;;  %v6406_v37 = vld [vmem:[%s8117_s3 + $0xf0] sm:$0xff]   ;;  %v6380_v39 = vld [vmem:[%s6731_s6 + $0x80] sm:$0xff]  }
  0x1b   : > { %5922 = vmatmul.mubr.msk.bf16.vlgmr.msra.gmra.mrb[0].mxu0 %vm479_vm2, %v6364_v5  ;;  %5513 = vmatprep.subr.bf16.mxu1 %v6396_v26  ;;  %v6409_v40 = vld [vmem:[%s8117_s3 + $0x138] sm:$0xff]   ;;  %v6411_v42 = vld [vmem:[%s8117_s3 + $0x160] sm:$0xff]   ;;  %v6381_v43 = vld [vmem:[%s6731_s6 + $0x88] sm:$0xff]  }
  0x1c   : > { %5925 = vmatprep.mubr.msk.bf16.mxu0 %vm6661_vm0, %v6660_v1  ;;  %6030 = vmatpush3.bf16.msra.mxu0 %v6398_v28  ;;  %v6410_v41 = vld [vmem:[%s8117_s3 + $0xf8] sm:$0xff]   ;;  %v6415_v44 = vld [vmem:[%s8117_s3 + $0x168] sm:$0xff]   ;;  %v6416_v45 = vld [vmem:[%s8117_s3 + $0x170] sm:$0xff]  }
  0x1d   : > { %6031 = vmatprep.subr.bf16.mxu0 %v6401_v31  ;;  %v6382_v46 = vld [vmem:[%s6731_s6 + $0x90] sm:$0xff]   ;;  %v6417_v47 = vld [vmem:[%s8117_s3 + $0x178] sm:$0xff]   ;;  %v6384_v49 = vld [vmem:[%s6731_s6 + $0xa0] sm:$0xff]  }
  0x1e   : > { %5514 = vmatpush3.bf16.msra.mxu1 %v6397_v27  ;;  %v6383_v48 = vld [vmem:[%s6731_s6 + $0x98] sm:$0xff]   ;;  %v6385_v50 = vld [vmem:[%s6731_s6 + $0xa8] sm:$0xff]   ;;  %v6386_v51 = vld [vmem:[%s6731_s6 + $0xb0] sm:$0xff]  }
  0x1f   : > { %5515 = vmatprep.subr.bf16.mxu1 %v6399_v29  ;;  %v6387_v52 = vld [vmem:[%s6731_s6 + $0xb8] sm:$0xff]   ;;  %v6388_v53 = vld [vmem:[%s6731_s6 + $0xc0] sm:$0xff]   ;;  %v6389_v54 = vld [vmem:[%s6731_s6 + $0xc8] sm:$0xff]  }
  0x20   : > { %6032 = vmatpush3.bf16.msra.mxu0 %v6401_v31  ;;  %v6408_v55 = vld [vmem:[%s6731_s6 + $0xd0] sm:$0xff]   ;;  %v6433_v56 = vld [vmem:[%s8117_s3 + $0x40] sm:$0xff]   ;;  %vm6925_vm5 = vmand %vm1156_vm3, %vm1157_vm4 }
  0x21   : > { %6033 = vmatprep.subr.bf16.mxu0 %v6404_v35  ;;  %v6917_v57 = vld [vmem:[%s8116_s2] ss:$0 sm:$0xff]  ;;  %vm6935_vm7 = vmand %vm1156_vm3, %vm1213_vm6 }
  0x22   : > { %5516 = vmatpush3.bf16.msra.mxu1 %v6400_v30 }
  0x23   : > { %5926 = vmatmul.mubr.msk.bf16.gmra.mrb[4].mxu0 %vm479_vm2, %v6365_v6  ;;  %5517 = vmatprep.subr.bf16.mxu1 %v6402_v33  ;;  %v6662_v6 = vmov 0  }
  0x24   : > { %5929 = vmatprep.mubr.msk.bf16.mxu0 %vm6661_vm0, %v6660_v1  ;;  %6034 = vmatpush3.bf16.msra.mxu0 %v6404_v35 }
  0x25   : > { %6035 = vmatprep.subr.bf16.mxu0 %v6407_v38 }
  0x26   : > { %5518 = vmatpush3.bf16.msra.mxu1 %v6403_v34 }
  0x27   : > { %5519 = vmatprep.subr.bf16.mxu1 %v6405_v36 }
  0x28   : > { %6036 = vmatpush3.bf16.msra.mxu0 %v6407_v38 }
  0x29   : > { %6037 = vmatprep.subr.bf16.mxu0 %v6411_v42 }
  0x2a   : > { %5520 = vmatpush3.bf16.msra.mxu1 %v6406_v37 }
  0x2b   : > { %5930 = vmatmul.mubr.msk.bf16.gmra.mrb[8].mxu0 %vm479_vm2, %v6366_v7  ;;  %5521 = vmatprep.subr.bf16.mxu1 %v6409_v40 }
  0x2c   : > { %5933 = vmatprep.mubr.msk.bf16.mxu0 %vm6661_vm0, %v6660_v1  ;;  %6038 = vmatpush3.bf16.msra.mxu0 %v6411_v42 }
  0x2d   : > { %6039 = vmatprep.subr.bf16.mxu0 %v6415_v44 }
  0x2e   : > { %5522 = vmatpush3.bf16.msra.mxu1 %v6410_v41 }
  0x2f   : > { %5643 = vmatprep.subr.bf16.mxu1 %v6433_v56 }
  0x30   : > { %6040 = vmatpush3.bf16.msra.mxu0 %v6415_v44 }
  0x31   : > { %6041 = vmatprep.subr.bf16.mxu0 %v6416_v45 }
  0x33   : > { %5934 = vmatmul.mubr.msk.bf16.gmra.mrb[12].mxu0 %vm479_vm2, %v6367_v8 }
  0x34   : > { %5937 = vmatprep.mubr.msk.bf16.mxu0 %vm6661_vm0, %v6660_v1  ;;  %6042 = vmatpush3.bf16.msra.mxu0 %v6416_v45 }
  0x35   : > { %6043 = vmatprep.subr.bf16.mxu0 %v6417_v47 }
  0x38   : > { %6044 = vmatpush3.bf16.msra.mxu0 %v6417_v47 }
  0x3b   : > { %5938 = vmatmul.mubr.msk.bf16.gmra.mrb[16].mxu0 %vm479_vm2, %v6368_v9 }
  0x3c   : > { %5941 = vmatprep.mubr.msk.bf16.mxu0 %vm6661_vm0, %v6660_v1 }
  0x43   : > { %5942 = vmatmul.mubr.msk.bf16.gmra.mrb[20].mxu0 %vm479_vm2, %v6369_v10 }
  0x44   : > { %5945 = vmatprep.mubr.msk.bf16.mxu0 %vm6661_vm0, %v6660_v1 }
  0x4b   : > { %5946 = vmatmul.mubr.msk.bf16.gmra.mrb[24].mxu0 %vm479_vm2, %v6370_v11 }
  0x4c   : > { %5949 = vmatprep.mubr.msk.bf16.mxu0 %vm6661_vm0, %v6660_v1 }
  0x53   : > { %5950 = vmatmul.mubr.msk.bf16.gmra.mrb[28].mxu0 %vm479_vm2, %v6371_v12 }
  0x54   : > { %5953 = vmatprep.mubr.msk.bf16.mxu0 %vm6661_vm0, %v6660_v1 }
  0x5b   : > { %5954 = vmatmul.mubr.msk.bf16.gmra.mrb[32].mxu0 %vm479_vm2, %v6372_v13 }
  0x5c   : > { %5957 = vmatprep.mubr.msk.bf16.mxu0 %vm6661_vm0, %v6660_v1 }
  0x63   : > { %5958 = vmatmul.mubr.msk.bf16.gmra.mrb[36].mxu0 %vm479_vm2, %v6373_v14 }
  0x64   : > { %5961 = vmatprep.mubr.msk.bf16.mxu0 %vm6661_vm0, %v6660_v1 }
  0x6b   : > { %5962 = vmatmul.mubr.msk.bf16.gmra.mrb[40].mxu0 %vm479_vm2, %v6374_v15 }
  0x6c   : > { %5965 = vmatprep.mubr.msk.bf16.mxu0 %vm6661_vm0, %v6660_v1 }
  0x73   : > { %5966 = vmatmul.mubr.msk.bf16.gmra.mrb[44].mxu0 %vm479_vm2, %v6375_v16 }
  0x74   : > { %5969 = vmatprep.mubr.msk.bf16.mxu0 %vm6661_vm0, %v6660_v1 }
  0x7b   : > { %5970 = vmatmul.mubr.msk.bf16.gmra.mrb[48].mxu0 %vm479_vm2, %v6376_v17 }
  0x7c   : > { %5973 = vmatprep.mubr.msk.bf16.mxu0 %vm6661_vm0, %v6660_v1 }
  0x83   : > { %5974 = vmatmul.mubr.msk.bf16.gmra.mrb[52].mxu0 %vm479_vm2, %v6377_v20 }
  0x84   : > { %5977 = vmatprep.mubr.msk.bf16.mxu0 %vm6661_vm0, %v6660_v1 }
  0x8b   : > { %5978 = vmatmul.mubr.msk.bf16.gmra.mrb[56].mxu0 %vm479_vm2, %v6378_v25 }
  0x8c   : > { %5981 = vmatprep.mubr.msk.bf16.mxu0 %vm6661_vm0, %v6660_v1 }
  0x93   : > { %5982 = vmatmul.mubr.msk.bf16.gmra.mrb[60].mxu0 %vm479_vm2, %v6379_v32 }
  0x94   : > { %5985 = vmatprep.mubr.msk.bf16.mxu0 %vm6661_vm0, %v6660_v1 }
  0x9b   : > { %5986 = vmatmul.mubr.msk.bf16.gmra.mrb[64].mxu0 %vm479_vm2, %v6380_v39 }
  0x9c   : > { %5989 = vmatprep.mubr.msk.bf16.mxu0 %vm6661_vm0, %v6660_v1 }
  0xa3   : > { %5990 = vmatmul.mubr.msk.bf16.gmra.mrb[68].mxu0 %vm479_vm2, %v6381_v43 }
  0xa4   : > { %5993 = vmatprep.mubr.msk.bf16.mxu0 %vm6661_vm0, %v6660_v1 }
  0xab   : > { %5994 = vmatmul.mubr.msk.bf16.gmra.mrb[72].mxu0 %vm479_vm2, %v6382_v46 }
  0xac   : > { %5997 = vmatprep.mubr.msk.bf16.mxu0 %vm6661_vm0, %v6660_v1 }
  0xb3   : > { %5998 = vmatmul.mubr.msk.bf16.gmra.mrb[76].mxu0 %vm479_vm2, %v6383_v48 }
  0xb4   : > { %6001 = vmatprep.mubr.msk.bf16.mxu0 %vm6661_vm0, %v6660_v1 }
  0xbb   : > { %6002 = vmatmul.mubr.msk.bf16.gmra.mrb[80].mxu0 %vm479_vm2, %v6384_v49 }
  0xbc   : > { %6005 = vmatprep.mubr.msk.bf16.mxu0 %vm6661_vm0, %v6660_v1 }
  0xc3   : > { %6006 = vmatmul.mubr.msk.bf16.gmra.mrb[84].mxu0 %vm479_vm2, %v6385_v50 }
  0xc4   : > { %6009 = vmatprep.mubr.msk.bf16.mxu0 %vm6661_vm0, %v6660_v1 }
  0xcb   : > { %6010 = vmatmul.mubr.msk.bf16.gmra.mrb[88].mxu0 %vm479_vm2, %v6386_v51 }
  0xcc   : > { %6013 = vmatprep.mubr.msk.bf16.mxu0 %vm6661_vm0, %v6660_v1 }
  0xd3   : > { %6014 = vmatmul.mubr.msk.bf16.gmra.mrb[92].mxu0 %vm479_vm2, %v6387_v52 }
  0xd4   : > { %6017 = vmatprep.mubr.msk.bf16.mxu0 %vm6661_vm0, %v6660_v1 }
  0xdb   : > { %6018 = vmatmul.mubr.msk.bf16.gmra.mrb[96].mxu0 %vm479_vm2, %v6388_v53 }
  0xdc   : > { %6021 = vmatprep.mubr.msk.bf16.mxu0 %vm6661_vm0, %v6660_v1 }
  0xe3   : > { %6022 = vmatmul.mubr.msk.bf16.gmra.mrb[100].mxu0 %vm479_vm2, %v6389_v54 }
  0xe4   : > { %6025 = vmatprep.mubr.msk.bf16.mxu0 %vm6661_vm0, %v6660_v1 }
  0xeb   : > { %6026 = vmatmul.mubr.msk.bf16.gmra.mrb[104].mxu0 %vm479_vm2, %v6408_v55 }
  0xee   : > { %v599_v58 = vpop.f32.mrb[0].mxu0 }
  0xef   : > { %v600_v59 = vadd.f32 %v6917_v57, %v599_v58  ;;  %v5923_v60 = vpop.f32.mrb[1].mxu0 }
  0xf0   : > { %v602_v61 = vpop.f32.mrb[2].mxu0 }
  0xf1   : > { %v603_v62 = vadd.f32 %v6917_v57, %v602_v61  ;;  %v5924_v63 = vpop.f32.mrb[3].mxu0  ;;  %v814_v0 = vmax.f32 %v600_v59, 0.0 }
  0xf3   : > { %v815_v1 = vmax.f32 %v603_v62, 0.0 }
  0xf5   : > { %v5224_v2 = vpack.c.bf16 %v815_v1, %v814_v0 }
  0xf6   : > { %v607_v3 = vpop.f32.mrb[4].mxu0 }
  0xf7   : > { %5225 = vst [vmem:[#allocation2] sm:$0xff] %v5224_v2   ;;  %v608_v4 = vadd.f32 %v6917_v57, %v607_v3  ;;  %v5927_v5 = vpop.f32.mrb[5].mxu0 }
  0xf8   : > { %1274 = vst [vmem:[#allocation2 + $0x4] sm:$0xf] %v6662_v6  ;;  %v610_v7 = vpop.f32.mrb[6].mxu0 }
  0xf9   : > { %v611_v8 = vadd.f32 %v6917_v57, %v610_v7  ;;  %v5928_v9 = vpop.f32.mrb[7].mxu0  ;;  %v816_v10 = vmax.f32 %v608_v4, 0.0 }
  0xfb   : > { %v817_v11 = vmax.f32 %v611_v8, 0.0 }
  0xfd   : > { %v5229_v13 = vpack.c.bf16 %v817_v11, %v816_v10 }
  0xfe   : > { %v1159_v14 = vld [vmem:[#allocation2] sm:$0x1]  ;;  %v615_v15 = vpop.f32.mrb[8].mxu0 }
  0xff   : > { %v1160_v16 = vsel %vm6925_vm5, 0, %v1159_v14  ;;  %5436 = vst [vmem:[#allocation2 + $0x8] sm:$0xff] %v5229_v13   ;;  %v616_v17 = vadd.f32 %v6917_v57, %v615_v15  ;;  %v5931_v18 = vpop.f32.mrb[9].mxu0 }
 0x100   : > { %1161 = vst [vmem:[#allocation2] sm:$0x1] %v1160_v16  ;;  %v618_v19 = vpop.f32.mrb[10].mxu0 }
 0x101   : > { %1273 = vst [vmem:[#allocation2] sm:$0xf] %v6662_v6  ;;  %v619_v20 = vadd.f32 %v6917_v57, %v618_v19  ;;  %v5932_v21 = vpop.f32.mrb[11].mxu0  ;;  %v818_v22 = vmax.f32 %v616_v17, 0.0 }
 0x103   : > { %v819_v23 = vmax.f32 %v619_v20, 0.0 }
 0x105   : > { %v5234_v25 = vpack.c.bf16 %v819_v23, %v818_v22  ;;  %v6434_v22 = vld [vmem:[%s8117_s3] sm:$0xff]  }
 0x106   : > { %v1162_v26 = vld [vmem:[#allocation2 + $0xc] sm:$0x1]  ;;  %v1215_v27 = vld [vmem:[#allocation2 + $0x8] sm:$0x1]  ;;  %v623_v28 = vpop.f32.mrb[12].mxu0 }
 0x107   : > { %v1163_v29 = vsel %vm6925_vm5, 0, %v1162_v26  ;;  %v1216_v30 = vsel %vm6935_vm7, 0, %v1215_v27  ;;  %5437 = vst [vmem:[#allocation2 + $0x10] sm:$0xff] %v5234_v25   ;;  %v624_v31 = vadd.f32 %v6917_v57, %v623_v28  ;;  %v5935_v32 = vpop.f32.mrb[13].mxu0  ;;  %v1907_v52 = vld [vmem:[#allocation2 + $0xc] sm:$0xe] }
 0x108   : > { %1164 = vst [vmem:[#allocation2 + $0xc] sm:$0x1] %v1163_v29  ;;  %1217 = vst [vmem:[#allocation2 + $0x8] sm:$0x1] %v1216_v30  ;;  %v626_v33 = vpop.f32.mrb[14].mxu0  ;;  %v6438_v28 = vld [vmem:[%s8117_s3 + $0x48] sm:$0xff]  }
 0x109   : > { %1275 = vst [vmem:[#allocation2 + $0x8] sm:$0xf] %v6662_v6  ;;  %v627_v34 = vadd.f32 %v6917_v57, %v626_v33  ;;  %v5936_v35 = vpop.f32.mrb[15].mxu0  ;;  %v820_v36 = vmax.f32 %v624_v31, 0.0  ;;  %v1329_v60 = vld [vmem:[#allocation2 + $0xc] sm:$0xe] }
 0x10b   : > { %v821_v37 = vmax.f32 %v627_v34, 0.0 }
 0x10d   : > { %v5239_v38 = vpack.c.bf16 %v821_v37, %v820_v36 }
 0x10e   : > { %v1218_v39 = vld [vmem:[#allocation2 + $0x14] sm:$0x1]  ;;  %v631_v40 = vpop.f32.mrb[16].mxu0  ;;  %v1860_v41 = vld [vmem:[#allocation2 + $0x10] sm:$0xf] }
 0x10f   : > { %v1219_v42 = vsel %vm6935_vm7, 0, %v1218_v39  ;;  %5438 = vst [vmem:[#allocation2 + $0x18] sm:$0xff] %v5239_v38   ;;  %v632_v43 = vadd.f32 %v6917_v57, %v631_v40  ;;  %v5939_v44 = vpop.f32.mrb[17].mxu0  ;;  %v1859_v45 = vld [vmem:[#allocation2 + $0xc] sm:$0xf]  ;;  %v4963_v56 = vcombine.low %v1907_v52, %v1860_v41  ;;  %v6446_v40 = vld [vmem:[%s8117_s3 + $0x50] sm:$0xff]  }
 0x110   : > { %1220 = vst [vmem:[#allocation2 + $0x14] sm:$0x1] %v1219_v42  ;;  %v634_v46 = vpop.f32.mrb[18].mxu0  ;;  %v4931_v47 = vcombine.low %v1859_v45, %v1860_v41  ;;  %v1283_v54 = vld [vmem:[#allocation2 + $0x10] sm:$0xf]  ;;  %v6439_v39 = vld [vmem:[%s8117_s3 + $0x8] sm:$0xff]  }
 0x111   : > { %v635_v48 = vadd.f32 %v6917_v57, %v634_v46  ;;  %v5940_v49 = vpop.f32.mrb[19].mxu0  ;;  %v822_v50 = vmax.f32 %v632_v43, 0.0  ;;  %v4916_v0 = vcombine.low %v1329_v60, %v1283_v54  ;;  %v2323_v7 = vrot.slane %v4963_v56, 1  ;;  %v6447_v46 = vld [vmem:[%s8117_s3 + $0x10] sm:$0xff]  }
 0x112   : > { %v2070_v53 = vshll.u32 %v4931_v47, 16  ;;  %v2068_v9 = vshrl.u32 %v4931_v47, 16 }
 0x113   : > { %v823_v51 = vmax.f32 %v635_v48, 0.0  ;;  %v1749_v15 = vrot.slane %v4916_v0, 1 }
 0x114   : > { %v2072_v3 = vrot.slane %v2070_v53, 1 }
 0x115   : > { %v5244_v55 = vpack.c.bf16 %v823_v51, %v822_v50  ;;  %v6451_v51 = vld [vmem:[%s8117_s3 + $0x58] sm:$0xff]  }
 0x116   : > { %v1165_v58 = vld [vmem:[#allocation2 + $0x18] sm:$0x1]  ;;  %v639_v59 = vpop.f32.mrb[20].mxu0  ;;  %v2073_v17 = vor.u32 %v2072_v3, %v2068_v9  ;;  %v1862_v21 = vld [vmem:[#allocation2 + $0x1c] sm:$0xf] }
 0x117   : > { %v1166_v61 = vsel %vm6925_vm5, 0, %v1165_v58  ;;  %5439 = vst [vmem:[#allocation2 + $0x20] sm:$0xff] %v5244_v55   ;;  %v640_v62 = vadd.f32 %v6917_v57, %v639_v59  ;;  %v5943_v63 = vpop.f32.mrb[21].mxu0  ;;  %v6413_v2 = vld [vmem:[#allocation2 + $0x14] ss:$0 sps:$4 sm:$0x11]  }
 0x118   : > { %1167 = vst [vmem:[#allocation2 + $0x18] sm:$0x1] %v1166_v61  ;;  %v642_v1 = vpop.f32.mrb[22].mxu0  ;;  %v2324_v8 = vrot.slane %v6413_v2, 1  ;;  %v2075_v10 = vshll.u32 %v6413_v2, 16  ;;  %v6452_v63 = vld [vmem:[%s8117_s3 + $0x18] sm:$0xff]  }
 0x119   : > { %v643_v4 = vadd.f32 %v6917_v57, %v642_v1  ;;  %v5944_v5 = vpop.f32.mrb[23].mxu0  ;;  %v6503_v11 = vld [vmem:[#allocation2 + $0x14] ss:$0 sps:$4 sm:$0x11]   ;;  %v824_v13 = vmax.f32 %v640_v62, 0.0 }
 0x11a   : > { %v2325_v16 = vsel %vm1745_vm8, %v2323_v7, %v2324_v8  ;;  %v2077_v18 = vrot.slane %v2075_v10, 1  ;;  %v1750_v19 = vrot.slane %v6503_v11, 1  ;;  %v1908_v43 = vld [vmem:[#allocation2 + $0x18] sm:$0xe] }
 0x11b   : > { %v825_v14 = vmax.f32 %v643_v4, 0.0  ;;  %6045 = vmatprep.mubr.bf16.mxu0 %v2325_v16  ;;  %v4964_v49 = vcombine.low %v1908_v43, %v1862_v21  ;;  %v6456_v4 = vld [vmem:[%s8117_s3 + $0x60] sm:$0xff]  }
 0x11c   : > { %v2078_v27 = vsel %vm1488_vm9, %v2073_v17, %v2077_v18  ;;  %v6963_v29 = vsel %vm1745_vm8, %v1749_v15, %v1750_v19  ;;  %v1285_v15 = vld [vmem:[#allocation2 + $0x1c] sm:$0xf] }
 0x11d   : > { %v5249_v20 = vpack.c.bf16 %v825_v14, %v824_v13  ;;  %2611 = vmatprep.mubr.bf16.mxu1 %v2078_v27  ;;  %v2326_v0 = vrot.slane %v4964_v49, 1 }
 0x11e   : > { %v1168_v23 = vld [vmem:[#allocation2 + $0x24] sm:$0x1]  ;;  %v1221_v25 = vld [vmem:[#allocation2 + $0x20] sm:$0x1]  ;;  %v647_v26 = vpop.f32.mrb[24].mxu0  ;;  %2612 = vmatmul.mubr.bf16.vlgmr.msra.gmra.mrb[0].mxu1 %v4931_v47 }
 0x11f   : > { %v1169_v30 = vsel %vm6925_vm5, 0, %v1168_v23  ;;  %v1222_v31 = vsel %vm6935_vm7, 0, %v1221_v25  ;;  %5440 = vst [vmem:[#allocation2 + $0x28] sm:$0xff] %v5249_v20   ;;  %v648_v32 = vadd.f32 %v6917_v57, %v647_v26  ;;  %v5947_v33 = vpop.f32.mrb[25].mxu0  ;;  %v1861_v34 = vld [vmem:[#allocation2 + $0x18] sm:$0xf]  ;;  %5644 = vmatpush3.bf16.msra.mxu1 %v6434_v22 }
 0x120   : > { %1170 = vst [vmem:[#allocation2 + $0x24] sm:$0x1] %v1169_v30  ;;  %1223 = vst [vmem:[#allocation2 + $0x20] sm:$0x1] %v1222_v31  ;;  %v650_v35 = vpop.f32.mrb[26].mxu0  ;;  %v6970_v36 = vcombine.low %v1861_v34, %v1862_v21  ;;  %5645 = vmatprep.subr.bf16.mxu1 %v6438_v28  ;;  %v6457_v28 = vld [vmem:[%s8117_s3 + $0x20] sm:$0xff]  }
 0x121   : > { %v651_v37 = vadd.f32 %v6917_v57, %v650_v35  ;;  %v5948_v38 = vpop.f32.mrb[27].mxu0  ;;  %v826_v41 = vmax.f32 %v648_v32, 0.0  ;;  %v1909_v14 = vld [vmem:[#allocation2 + $0x24] sm:$0xe]  ;;  %v1330_v20 = vld [vmem:[#allocation2 + $0x18] sm:$0xe] }
 0x122   : > { %v2082_v44 = vshll.u32 %v6970_v36, 16  ;;  %v2080_v2 = vshrl.u32 %v6970_v36, 16  ;;  %v4917_v33 = vcombine.low %v1330_v20, %v1285_v15 }
 0x123   : > { %v827_v42 = vmax.f32 %v651_v37, 0.0  ;;  %5646 = vmatpush3.bf16.msra.mxu1 %v6439_v39 }
 0x124   : > { %5647 = vmatprep.subr.bf16.mxu1 %v6446_v40  ;;  %v2084_v59 = vrot.slane %v2082_v44, 1 }
 0x125   : > { %v5254_v45 = vpack.c.bf16 %v827_v42, %v826_v41 }
 0x126   : > { %v1224_v47 = vld [vmem:[#allocation2 + $0x2c] sm:$0x1]  ;;  %v655_v48 = vpop.f32.mrb[28].mxu0  ;;  %v1864_v50 = vld [vmem:[#allocation2 + $0x28] sm:$0xf]  ;;  %v2085_v9 = vor.u32 %v2084_v59, %v2080_v2 }
 0x127   : > { %v1225_v52 = vsel %vm6935_vm7, 0, %v1224_v47  ;;  %5441 = vst [vmem:[#allocation2 + $0x30] sm:$0xff] %v5254_v45   ;;  %v656_v53 = vadd.f32 %v6917_v57, %v655_v48  ;;  %v5951_v54 = vpop.f32.mrb[29].mxu0  ;;  %v1863_v55 = vld [vmem:[#allocation2 + $0x24] sm:$0xf]  ;;  %5648 = vmatpush3.bf16.msra.mxu1 %v6447_v46  ;;  %v4965_v19 = vcombine.low %v1909_v14, %v1864_v50 }
 0x128   : > { %1226 = vst [vmem:[#allocation2 + $0x2c] sm:$0x1] %v1225_v52  ;;  %v658_v56 = vpop.f32.mrb[30].mxu0  ;;  %v6418_v58 = vld [vmem:[#allocation2 + $0x20] ss:$0 sps:$4 sm:$0x11]   ;;  %v6989_v60 = vcombine.low %v1863_v55, %v1864_v50  ;;  %5649 = vmatprep.subr.bf16.mxu1 %v6451_v51 }
 0x129   : > { %v659_v61 = vadd.f32 %v6917_v57, %v658_v56  ;;  %v5952_v62 = vpop.f32.mrb[31].mxu0  ;;  %v2327_v1 = vrot.slane %v6418_v58, 1  ;;  %v2087_v3 = vshll.u32 %v6418_v58, 16  ;;  %v828_v5 = vmax.f32 %v656_v53, 0.0  ;;  %v1287_v45 = vld [vmem:[#allocation2 + $0x28] sm:$0xf] }
 0x12a   : > { %v2094_v11 = vshll.u32 %v6989_v60, 16  ;;  %v6507_v32 = vld [vmem:[#allocation2 + $0x20] ss:$0 sps:$4 sm:$0x11]   ;;  %v2329_v34 = vrot.slane %v4965_v19, 1  ;;  %v2092_v37 = vshrl.u32 %v6989_v60, 16 }
 0x12b   : > { %v829_v7 = vmax.f32 %v659_v61, 0.0  ;;  %v2328_v8 = vsel %vm1745_vm8, %v2326_v0, %v2327_v1  ;;  %v2089_v10 = vrot.slane %v2087_v3, 1  ;;  %5650 = vmatpush3.bf16.msra.mxu1 %v6452_v63  ;;  %v1753_v46 = vrot.slane %v6507_v32, 1  ;;  %v6464_v61 = vld [vmem:[%s8117_s3 + $0x68] sm:$0xff]   ;;  %v1331_v63 = vld [vmem:[#allocation2 + $0x24] sm:$0xe] }
 0x12c   : > { %6046 = vmatmul.mubr.bf16.vlgmr.msra.gmra.mrb[108].mxu0 %v2328_v8  ;;  %5651 = vmatprep.subr.bf16.mxu1 %v6456_v4  ;;  %v2096_v27 = vrot.slane %v2094_v11, 1  ;;  %v1752_v51 = vrot.slane %v4917_v33, 1  ;;  %v4918_v3 = vcombine.low %v1331_v63, %v1287_v45  ;;  %v6469_v8 = vld [vmem:[%s8117_s3 + $0x1c0] sm:$0xff]   ;;  %v6474_v33 = vld [vmem:[%s8117_s3 + $0x188] sm:$0xff]  }
 0x12d   : > { %v5259_v13 = vpack.c.bf16 %v829_v7, %v828_v5  ;;  %v2090_v18 = vsel %vm1488_vm9, %v2085_v9, %v2089_v10  ;;  %v6470_v10 = vld [vmem:[%s8117_s3 + $0x180] sm:$0xff]   ;;  %5779 = vmatprep.subr.bf16.mxu0 %v6469_v8 }
 0x12e   : > { %v1171_v16 = vld [vmem:[#allocation2 + $0x30] sm:$0x1]  ;;  %v663_v17 = vpop.f32.mrb[32].mxu0  ;;  %2619 = vmatprep.mubr.bf16.mxu1 %v2090_v18  ;;  %v2097_v41 = vor.u32 %v2096_v27, %v2092_v37  ;;  %v1866_v44 = vld [vmem:[#allocation2 + $0x34] sm:$0xf]  ;;  %v7025_v62 = vsel %vm1745_vm8, %v1752_v51, %v1753_v46  ;;  %v1755_v11 = vrot.slane %v4918_v3, 1  ;;  %5780 = vmatpush3.bf16.msra.mxu0 %v6470_v10 }
 0x12f   : > { %v1172_v21 = vsel %vm6925_vm5, 0, %v1171_v16  ;;  %5442 = vst [vmem:[#allocation2 + $0x38] sm:$0xff] %v5259_v13   ;;  %v664_v22 = vadd.f32 %v6917_v57, %v663_v17  ;;  %v5955_v23 = vpop.f32.mrb[33].mxu0  ;;  %2620 = vmatmul.mubr.bf16.gmra.mrb[4].mxu1 %v6970_v36  ;;  %v6422_v26 = vld [vmem:[#allocation2 + $0x2c] ss:$0 sps:$4 sm:$0x11]  }
 0x130   : > { %1173 = vst [vmem:[#allocation2 + $0x30] sm:$0x1] %v1172_v21  ;;  %v666_v25 = vpop.f32.mrb[34].mxu0  ;;  %v2330_v35 = vrot.slane %v6422_v26, 1  ;;  %v2099_v38 = vshll.u32 %v6422_v26, 16  ;;  %5652 = vmatpush3.bf16.msra.mxu1 %v6457_v28  ;;  %v6465_v27 = vld [vmem:[%s8117_s3 + $0x28] sm:$0xff]  }
 0x131   : > { %v667_v30 = vadd.f32 %v6917_v57, %v666_v25  ;;  %v5956_v31 = vpop.f32.mrb[35].mxu0  ;;  %v830_v39 = vmax.f32 %v664_v22, 0.0  ;;  %v6512_v2 = vld [vmem:[#allocation2 + $0x2c] ss:$0 sps:$4 sm:$0x11]   ;;  %5653 = vmatprep.subr.bf16.mxu1 %v6464_v61 }
 0x132   : > { %v2331_v36 = vsel %vm1745_vm8, %v2329_v34, %v2330_v35  ;;  %v2101_v42 = vrot.slane %v2099_v38, 1  ;;  %v1910_v7 = vld [vmem:[#allocation2 + $0x30] sm:$0xe]  ;;  %v1756_v13 = vrot.slane %v6512_v2, 1  ;;  %v6473_v28 = vld [vmem:[%s8117_s3 + $0x1c8] sm:$0xff]  }
 0x133   : > { %v831_v40 = vmax.f32 %v667_v30, 0.0  ;;  %6049 = vmatprep.mubr.bf16.mxu0 %v2331_v36  ;;  %v4966_v16 = vcombine.low %v1910_v7, %v1866_v44  ;;  %5781 = vmatprep.subr.bf16.mxu0 %v6473_v28 }
 0x134   : > { %v2102_v50 = vsel %vm1488_vm9, %v2097_v41, %v2101_v42  ;;  %v7047_v30 = vsel %vm1745_vm8, %v1755_v11, %v1756_v13  ;;  %5654 = vmatpush3.bf16.msra.mxu1 %v6465_v27  ;;  %5782 = vmatpush3.bf16.msra.mxu0 %v6474_v33  ;;  %v6482_v11 = vld [vmem:[%s8117_s3 + $0x1e0] sm:$0xff]   ;;  %v6484_v13 = vld [vmem:[%s8117_s3 + $0x78] sm:$0xff]  }
 0x135   : > { %v5264_v43 = vpack.c.bf16 %v831_v40, %v830_v39  ;;  %2627 = vmatprep.mubr.bf16.mxu1 %v2102_v50  ;;  %v2332_v34 = vrot.slane %v4966_v16, 1  ;;  %v6483_v16 = vld [vmem:[%s8117_s3 + $0x1a0] sm:$0xff]  }
 0x136   : > { %v1174_v47 = vld [vmem:[#allocation2 + $0x3c] sm:$0x1]  ;;  %v1227_v48 = vld [vmem:[#allocation2 + $0x38] sm:$0x1]  ;;  %v671_v49 = vpop.f32.mrb[36].mxu0 }
 0x137   : > { %v1175_v52 = vsel %vm6925_vm5, 0, %v1174_v47  ;;  %v1228_v53 = vsel %vm6935_vm7, 0, %v1227_v48  ;;  %5443 = vst [vmem:[#allocation2 + $0x40] sm:$0xff] %v5264_v43   ;;  %v672_v54 = vadd.f32 %v6917_v57, %v671_v49  ;;  %v5959_v55 = vpop.f32.mrb[37].mxu0  ;;  %v1865_v56 = vld [vmem:[#allocation2 + $0x30] sm:$0xf]  ;;  %2628 = vmatmul.mubr.bf16.gmra.mrb[8].mxu1 %v6989_v60 }
 0x138   : > { %1176 = vst [vmem:[#allocation2 + $0x3c] sm:$0x1] %v1175_v52  ;;  %1229 = vst [vmem:[#allocation2 + $0x38] sm:$0x1] %v1228_v53  ;;  %v674_v58 = vpop.f32.mrb[38].mxu0  ;;  %v7019_v59 = vcombine.low %v1865_v56, %v1866_v44  ;;  %v6478_v44 = vld [vmem:[%s8117_s3 + $0x1d0] sm:$0xff]  }
 0x139   : > { %v675_v0 = vadd.f32 %v6917_v57, %v674_v58  ;;  %v5960_v1 = vpop.f32.mrb[39].mxu0  ;;  %v832_v5 = vmax.f32 %v672_v54, 0.0  ;;  %v1911_v46 = vld [vmem:[#allocation2 + $0x3c] sm:$0xe]  ;;  %v6479_v47 = vld [vmem:[%s8117_s3 + $0x190] sm:$0xff]   ;;  %5783 = vmatprep.subr.bf16.mxu0 %v6478_v44 }
 0x13a   : > { %v2106_v4 = vshll.u32 %v7019_v59, 16  ;;  %v2104_v37 = vshrl.u32 %v7019_v59, 16  ;;  %v1289_v48 = vld [vmem:[#allocation2 + $0x34] sm:$0xf]  ;;  %v1332_v53 = vld [vmem:[#allocation2 + $0x30] sm:$0xe]  ;;  %5784 = vmatpush3.bf16.msra.mxu0 %v6479_v47 }
 0x13b   : > { %v833_v60 = vmax.f32 %v675_v0, 0.0  ;;  %v6480_v1 = vld [vmem:[%s8117_s3 + $0x1d8] sm:$0xff]  }
 0x13c   : > { %v2108_v17 = vrot.slane %v2106_v4, 1  ;;  %v6471_v4 = vld [vmem:[%s8117_s3 + $0x70] sm:$0xff]   ;;  %5785 = vmatprep.subr.bf16.mxu0 %v6480_v1 }
 0x13d   : > { %v5269_v9 = vpack.c.bf16 %v833_v60, %v832_v5  ;;  %v6472_v5 = vld [vmem:[%s8117_s3 + $0x30] sm:$0xff]   ;;  %v4919_v60 = vcombine.low %v1332_v53, %v1289_v48  ;;  %5655 = vmatprep.subr.bf16.mxu1 %v6471_v4  ;;  %v1333_v48 = vld [vmem:[#allocation2 + $0x3c] sm:$0xe] }
 0x13e   : > { %v1230_v14 = vld [vmem:[#allocation2 + $0x44] sm:$0x1]  ;;  %v679_v15 = vpop.f32.mrb[40].mxu0  ;;  %v1868_v18 = vld [vmem:[#allocation2 + $0x40] sm:$0xf]  ;;  %v2109_v41 = vor.u32 %v2108_v17, %v2104_v37  ;;  %5656 = vmatpush3.bf16.msra.mxu1 %v6472_v5  ;;  %v6492_v53 = vld [vmem:[%s8117_s3 + $0x1b0] sm:$0xff]  }
 0x13f   : > { %v1231_v19 = vsel %vm6935_vm7, 0, %v1230_v14  ;;  %5444 = vst [vmem:[#allocation2 + $0x48] sm:$0xff] %v5269_v9   ;;  %v680_v20 = vadd.f32 %v6917_v57, %v679_v15  ;;  %v5963_v21 = vpop.f32.mrb[41].mxu0  ;;  %v1867_v22 = vld [vmem:[#allocation2 + $0x3c] sm:$0xf]  ;;  %v4967_v52 = vcombine.low %v1911_v46, %v1868_v18  ;;  %5657 = vmatprep.subr.bf16.mxu1 %v6484_v13  ;;  %v1758_v33 = vrot.slane %v4919_v60, 1 }
 0x140   : > { %1232 = vst [vmem:[#allocation2 + $0x44] sm:$0x1] %v1231_v19  ;;  %v682_v23 = vpop.f32.mrb[42].mxu0  ;;  %v6425_v25 = vld [vmem:[#allocation2 + $0x38] ss:$0 sps:$4 sm:$0x11]   ;;  %v7038_v26 = vcombine.low %v1867_v22, %v1868_v18 }
 0x141   : > { %v683_v31 = vadd.f32 %v6917_v57, %v682_v23  ;;  %v5964_v32 = vpop.f32.mrb[43].mxu0  ;;  %v2333_v35 = vrot.slane %v6425_v25, 1  ;;  %v2111_v38 = vshll.u32 %v6425_v25, 16  ;;  %v834_v39 = vmax.f32 %v680_v20, 0.0  ;;  %v6486_v20 = vld [vmem:[%s8117_s3 + $0x1e8] sm:$0xff]   ;;  %v6485_v23 = vld [vmem:[%s8117_s3 + $0x38] sm:$0xff]  }
 0x142   : > { %v2118_v43 = vshll.u32 %v7038_v26, 16  ;;  %v6516_v58 = vld [vmem:[#allocation2 + $0x38] ss:$0 sps:$4 sm:$0x11]   ;;  %v2335_v7 = vrot.slane %v4967_v52, 1  ;;  %v2116_v9 = vshrl.u32 %v7038_v26, 16  ;;  %5658 = vmatpush3.bf16.msra.mxu1 %v6485_v23 }
 0x143   : > { %v835_v40 = vmax.f32 %v683_v31, 0.0  ;;  %v2334_v36 = vsel %vm1745_vm8, %v2332_v34, %v2333_v35  ;;  %v2113_v42 = vrot.slane %v2111_v38, 1  ;;  %v1759_v25 = vrot.slane %v6516_v58, 1  ;;  %v6491_v52 = vld [vmem:[%s8117_s3 + $0x1f0] sm:$0xff]  }
 0x144   : > { %6050 = vmatmul.mubr.bf16.gmra.mrb[112].mxu0 %v2334_v36  ;;  %v2120_v0 = vrot.slane %v2118_v43, 1 }
 0x145   : > { %v5274_v45 = vpack.c.bf16 %v835_v40, %v834_v39  ;;  %v2114_v51 = vsel %vm1488_vm9, %v2109_v41, %v2113_v42  ;;  %v6487_v40 = vld [vmem:[%s8117_s3 + $0x1a8] sm:$0xff]   ;;  %v7113_v42 = vsel %vm1745_vm8, %v1758_v33, %v1759_v25 }
 0x146   : > { %v1177_v49 = vld [vmem:[#allocation2 + $0x48] sm:$0x1]  ;;  %v687_v50 = vpop.f32.mrb[44].mxu0  ;;  %2635 = vmatprep.mubr.bf16.mxu1 %v2114_v51  ;;  %v2121_v18 = vor.u32 %v2120_v0, %v2116_v9  ;;  %v7094_v22 = vld [vmem:[#allocation2 + $0x4c] sm:$0xf]  ;;  %v6496_v9 = vld [vmem:[%s8117_s3 + $0x1b8] sm:$0xff]  }
 0x147   : > { %v1178_v54 = vsel %vm6925_vm5, 0, %v1177_v49  ;;  %5445 = vst [vmem:[#allocation2 + $0x50] sm:$0xff] %v5274_v45   ;;  %v688_v55 = vadd.f32 %v6917_v57, %v687_v50  ;;  %v5967_v56 = vpop.f32.mrb[45].mxu0  ;;  %2636 = vmatmul.mubr.bf16.gmra.mrb[12].mxu1 %v7019_v59  ;;  %v6428_v63 = vld [vmem:[#allocation2 + $0x44] ss:$0 sps:$4 sm:$0x11]  }
 0x148   : > { %1179 = vst [vmem:[#allocation2 + $0x48] sm:$0x1] %v1178_v54  ;;  %v690_v61 = vpop.f32.mrb[46].mxu0  ;;  %v6481_v59 = vld [vmem:[%s8117_s3 + $0x198] sm:$0xff]   ;;  %v2336_v8 = vrot.slane %v6428_v63, 1  ;;  %v2123_v10 = vshll.u32 %v6428_v63, 16 }
 0x149   : > { %v691_v2 = vadd.f32 %v6917_v57, %v690_v61  ;;  %v5968_v3 = vpop.f32.mrb[47].mxu0  ;;  %v836_v14 = vmax.f32 %v688_v55, 0.0  ;;  %5786 = vmatpush3.bf16.msra.mxu0 %v6481_v59  ;;  %v1291_v45 = vld [vmem:[#allocation2 + $0x40] sm:$0xf]  ;;  %v1912_v51 = vld [vmem:[#allocation2 + $0x48] sm:$0xe] }
 0x14a   : > { %v2337_v17 = vsel %vm1745_vm8, %v2335_v7, %v2336_v8  ;;  %v2125_v19 = vrot.slane %v2123_v10, 1  ;;  %5787 = vmatprep.subr.bf16.mxu0 %v6482_v11  ;;  %v6521_v47 = vld [vmem:[#allocation2 + $0x44] ss:$0 sps:$4 sm:$0x11]   ;;  %v4968_v63 = vcombine.low %v1912_v51, %v7094_v22  ;;  %v6495_v8 = vld [vmem:[%s8117_s3 + $0x1f8] sm:$0xff]  }
 0x14b   : > { %v837_v15 = vmax.f32 %v691_v2, 0.0  ;;  %6053 = vmatprep.mubr.bf16.mxu0 %v2337_v17  ;;  %v1762_v56 = vrot.slane %v6521_v47, 1 }
 0x14c   : > { %v2126_v32 = vsel %vm1488_vm9, %v2121_v18, %v2125_v19 }
 0x14d   : > { %v5279_v21 = vpack.c.bf16 %v837_v15, %v836_v14  ;;  %2643 = vmatprep.mubr.bf16.mxu1 %v2126_v32  ;;  %5788 = vmatpush3.bf16.msra.mxu0 %v6483_v16  ;;  %v2338_v14 = vrot.slane %v4968_v63, 1 }
 0x14e   : > { %v1180_v27 = vld [vmem:[#allocation2 + $0x54] sm:$0x1]  ;;  %v1233_v28 = vld [vmem:[#allocation2 + $0x50] sm:$0x1]  ;;  %v695_v31 = vpop.f32.mrb[48].mxu0  ;;  %5789 = vmatprep.subr.bf16.mxu0 %v6486_v20 }
 0x14f   : > { %v1181_v34 = vsel %vm6925_vm5, 0, %v1180_v27  ;;  %v1234_v35 = vsel %vm6935_vm7, 0, %v1233_v28  ;;  %5446 = vst [vmem:[#allocation2 + $0x58] sm:$0xff] %v5279_v21   ;;  %v696_v37 = vadd.f32 %v6917_v57, %v695_v31  ;;  %v5971_v38 = vpop.f32.mrb[49].mxu0  ;;  %v1869_v39 = vld [vmem:[#allocation2 + $0x48] sm:$0xf]  ;;  %2644 = vmatmul.mubr.bf16.gmra.mrb[16].mxu1 %v7038_v26  ;;  %v4920_v26 = vcombine.low %v1333_v48, %v1291_v45 }
 0x150   : > { %1182 = vst [vmem:[#allocation2 + $0x54] sm:$0x1] %v1181_v34  ;;  %1235 = vst [vmem:[#allocation2 + $0x50] sm:$0x1] %v1234_v35  ;;  %v698_v36 = vpop.f32.mrb[50].mxu0  ;;  %v7110_v41 = vcombine.low %v1869_v39, %v7094_v22  ;;  %v6501_v28 = vld [vmem:[%s8117_s3 + $0x80] sm:$0xff]  }
 0x151   : > { %v699_v43 = vadd.f32 %v6917_v57, %v698_v36  ;;  %v5972_v44 = vpop.f32.mrb[51].mxu0  ;;  %v838_v49 = vmax.f32 %v696_v37, 0.0  ;;  %5790 = vmatpush3.bf16.msra.mxu0 %v6487_v40  ;;  %v1761_v1 = vrot.slane %v4920_v26, 1  ;;  %v1913_v27 = vld [vmem:[#allocation2 + $0x54] sm:$0xe]  ;;  %6077 = vmatprep.subr.bf16.mxu1 %v6501_v28 }
 0x152   : > { %v2130_v46 = vshll.u32 %v7110_v41, 16  ;;  %5791 = vmatprep.subr.bf16.mxu0 %v6491_v52  ;;  %v2128_v16 = vshrl.u32 %v7110_v41, 16 }
 0x153   : > { %v839_v50 = vmax.f32 %v699_v43, 0.0  ;;  %v7136_v10 = vsel %vm1745_vm8, %v1761_v1, %v1762_v56 }
 0x154   : > { %v2132_v55 = vrot.slane %v2130_v46, 1 }
 0x155   : > { %v5284_v54 = vpack.c.bf16 %v839_v50, %v838_v49  ;;  %5792 = vmatpush3.bf16.msra.mxu0 %v6492_v53 }
 0x156   : > { %v1236_v58 = vld [vmem:[#allocation2 + $0x5c] sm:$0x1]  ;;  %v703_v61 = vpop.f32.mrb[52].mxu0  ;;  %v1872_v0 = vld [vmem:[#allocation2 + $0x58] sm:$0xf]  ;;  %5793 = vmatprep.subr.bf16.mxu0 %v6495_v8  ;;  %v2133_v21 = vor.u32 %v2132_v55, %v2128_v16 }
 0x157   : > { %v1237_v2 = vsel %vm6935_vm7, 0, %v1236_v58  ;;  %5447 = vst [vmem:[#allocation2 + $0x60] sm:$0xff] %v5284_v54   ;;  %v704_v3 = vadd.f32 %v6917_v57, %v703_v61  ;;  %v5975_v4 = vpop.f32.mrb[53].mxu0  ;;  %v1871_v5 = vld [vmem:[#allocation2 + $0x54] sm:$0xf]  ;;  %v4969_v34 = vcombine.low %v1913_v27, %v1872_v0 }
 0x158   : > { %1238 = vst [vmem:[#allocation2 + $0x5c] sm:$0x1] %v1237_v2  ;;  %v706_v59 = vpop.f32.mrb[54].mxu0  ;;  %v6431_v60 = vld [vmem:[#allocation2 + $0x50] ss:$0 sps:$4 sm:$0x11]   ;;  %v7127_v7 = vcombine.low %v1871_v5, %v1872_v0 }
 0x159   : > { %v707_v11 = vadd.f32 %v6917_v57, %v706_v59  ;;  %v5976_v13 = vpop.f32.mrb[55].mxu0  ;;  %v2339_v15 = vrot.slane %v6431_v60, 1  ;;  %v2135_v17 = vshll.u32 %v6431_v60, 16  ;;  %v840_v18 = vmax.f32 %v704_v3, 0.0  ;;  %5794 = vmatpush3.bf16.msra.mxu0 %v6496_v9 }
 0x15a   : > { %v2142_v23 = vshll.u32 %v7127_v7, 16  ;;  %v2341_v45 = vrot.slane %v4969_v34, 1  ;;  %v2140_v47 = vshrl.u32 %v7127_v7, 16 }
 0x15b   : > { %v841_v19 = vmax.f32 %v707_v11, 0.0  ;;  %v2340_v20 = vsel %vm1745_vm8, %v2338_v14, %v2339_v15  ;;  %v2137_v22 = vrot.slane %v2135_v17, 1 }
 0x15c   : > { %6054 = vmatmul.mubr.bf16.gmra.mrb[116].mxu0 %v2340_v20  ;;  %v2144_v36 = vrot.slane %v2142_v23, 1 }
 0x15d   : > { %v5289_v25 = vpack.c.bf16 %v841_v19, %v840_v18  ;;  %v2138_v33 = vsel %vm1488_vm9, %v2133_v21, %v2137_v22 }
 0x15e   : > { %v1183_v31 = vld [vmem:[#allocation2 + $0x60] sm:$0x1]  ;;  %v711_v32 = vpop.f32.mrb[56].mxu0  ;;  %2651 = vmatprep.mubr.bf16.mxu1 %v2138_v33  ;;  %v2145_v26 = vor.u32 %v2144_v36, %v2140_v47  ;;  %v1874_v54 = vld [vmem:[#allocation2 + $0x64] sm:$0xf] }
 0x15f   : > { %v1184_v35 = vsel %vm6925_vm5, 0, %v1183_v31  ;;  %5448 = vst [vmem:[#allocation2 + $0x68] sm:$0xff] %v5289_v25   ;;  %v712_v37 = vadd.f32 %v6917_v57, %v711_v32  ;;  %v5979_v38 = vpop.f32.mrb[57].mxu0  ;;  %2652 = vmatmul.mubr.bf16.gmra.mrb[20].mxu1 %v7110_v41  ;;  %v6436_v40 = vld [vmem:[#allocation2 + $0x5c] ss:$0 sps:$4 sm:$0x11]  }
 0x160   : > { %1185 = vst [vmem:[#allocation2 + $0x60] sm:$0x1] %v1184_v35  ;;  %v714_v39 = vpop.f32.mrb[58].mxu0  ;;  %v2342_v46 = vrot.slane %v6436_v40, 1  ;;  %v2147_v48 = vshll.u32 %v6436_v40, 16 }
 0x161   : > { %v715_v43 = vadd.f32 %v6917_v57, %v714_v39  ;;  %v5980_v44 = vpop.f32.mrb[59].mxu0  ;;  %v842_v49 = vmax.f32 %v712_v37, 0.0  ;;  %v1914_v11 = vld [vmem:[#allocation2 + $0x60] sm:$0xe] }
 0x162   : > { %v2343_v51 = vsel %vm1745_vm8, %v2341_v45, %v2342_v46  ;;  %v2149_v52 = vrot.slane %v2147_v48, 1  ;;  %v4970_v16 = vcombine.low %v1914_v11, %v1874_v54 }
 0x163   : > { %v843_v50 = vmax.f32 %v715_v43, 0.0  ;;  %6057 = vmatprep.mubr.bf16.mxu0 %v2343_v51 }
 0x164   : > { %v2150_v58 = vsel %vm1488_vm9, %v2145_v26, %v2149_v52  ;;  %v2344_v31 = vrot.slane %v4970_v16, 1 }
 0x165   : > { %v5294_v53 = vpack.c.bf16 %v843_v50, %v842_v49  ;;  %2659 = vmatprep.mubr.bf16.mxu1 %v2150_v58  ;;  %v7172_v49 = vld [vmem:[%s8116_s2] ss:$0 sm:$0xff] }
 0x166   : > { %v1186_v41 = vld [vmem:[#allocation2 + $0x6c] sm:$0x1]  ;;  %v1239_v55 = vld [vmem:[#allocation2 + $0x68] sm:$0x1]  ;;  %v719_v56 = vpop.f32.mrb[60].mxu0 }
 0x167   : > { %v1187_v61 = vsel %vm6925_vm5, 0, %v1186_v41  ;;  %v1240_v63 = vsel %vm6935_vm7, 0, %v1239_v55  ;;  %5449 = vst [vmem:[#allocation2 + $0x70] sm:$0xff] %v5294_v53   ;;  %v720_v0 = vadd.f32 %v6917_v57, %v719_v56  ;;  %v5983_v1 = vpop.f32.mrb[61].mxu0  ;;  %v1873_v2 = vld [vmem:[#allocation2 + $0x60] sm:$0xf]  ;;  %2660 = vmatmul.mubr.bf16.gmra.mrb[24].mxu1 %v7127_v7 }
 0x168   : > { %1188 = vst [vmem:[#allocation2 + $0x6c] sm:$0x1] %v1187_v61  ;;  %1241 = vst [vmem:[#allocation2 + $0x68] sm:$0x1] %v1240_v63  ;;  %v722_v3 = vpop.f32.mrb[62].mxu0  ;;  %v4938_v4 = vcombine.low %v1873_v2, %v1874_v54 }
 0x169   : > { %v723_v5 = vadd.f32 %v6917_v57, %v722_v3  ;;  %v5984_v59 = vpop.f32.mrb[63].mxu0  ;;  %v844_v8 = vmax.f32 %v720_v0, 0.0  ;;  %v1915_v44 = vld [vmem:[#allocation2 + $0x6c] sm:$0xe] }
 0x16a   : > { %v2154_v60 = vshll.u32 %v4938_v4, 16  ;;  %v2152_v33 = vshrl.u32 %v4938_v4, 16 }
 0x16b   : > { %v845_v9 = vmax.f32 %v723_v5, 0.0 }
 0x16c   : > { %v2156_v17 = vrot.slane %v2154_v60, 1  ;;  %v1293_v60 = vld [vmem:[#allocation2 + $0x4c] sm:$0xf] }
 0x16d   : > { %v5299_v13 = vpack.c.bf16 %v845_v9, %v844_v8  ;;  %v1334_v8 = vld [vmem:[#allocation2 + $0x48] sm:$0xe] }
 0x16e   : > { %v1242_v14 = vld [vmem:[#allocation2 + $0x74] sm:$0x1]  ;;  %v727_v15 = vpop.f32.mrb[64].mxu0  ;;  %v1876_v18 = vld [vmem:[#allocation2 + $0x70] sm:$0xf]  ;;  %v2157_v40 = vor.u32 %v2156_v17, %v2152_v33 }
 0x16f   : > { %v1243_v19 = vsel %vm6935_vm7, 0, %v1242_v14  ;;  %5450 = vst [vmem:[#allocation2 + $0x78] sm:$0xff] %v5299_v13   ;;  %v728_v7 = vadd.f32 %v6917_v57, %v727_v15  ;;  %v5987_v20 = vpop.f32.mrb[65].mxu0  ;;  %v1875_v21 = vld [vmem:[#allocation2 + $0x6c] sm:$0xf] }
 0x170   : > { %1244 = vst [vmem:[#allocation2 + $0x74] sm:$0x1] %v1243_v19  ;;  %v730_v22 = vpop.f32.mrb[66].mxu0  ;;  %v6441_v23 = vld [vmem:[#allocation2 + $0x68] ss:$0 sps:$4 sm:$0x11]   ;;  %v4939_v25 = vcombine.low %v1875_v21, %v1876_v18 }
 0x171   : > { %v731_v27 = vadd.f32 %v6917_v57, %v730_v22  ;;  %v5988_v28 = vpop.f32.mrb[67].mxu0  ;;  %v2345_v32 = vrot.slane %v6441_v23, 1  ;;  %v2159_v34 = vshll.u32 %v6441_v23, 16  ;;  %v846_v35 = vmax.f32 %v728_v7, 0.0 }
 0x172   : > { %v2166_v38 = vshll.u32 %v4939_v25, 16  ;;  %v4971_v57 = vcombine.low %v1915_v44, %v1876_v18  ;;  %v2164_v58 = vshrl.u32 %v4939_v25, 16  ;;  %v6525_v22 = vld [vmem:[#allocation2 + $0x50] ss:$0 sps:$4 sm:$0x11]  }
 0x173   : > { %v847_v37 = vmax.f32 %v731_v27, 0.0  ;;  %v2346_v39 = vsel %vm1745_vm8, %v2344_v31, %v2345_v32  ;;  %v2161_v36 = vrot.slane %v2159_v34, 1  ;;  %v4921_v27 = vcombine.low %v1334_v8, %v1293_v60 }
 0x174   : > { %6058 = vmatmul.mubr.bf16.gmra.mrb[120].mxu0 %v2346_v39  ;;  %v2168_v26 = vrot.slane %v2166_v38, 1  ;;  %v2347_v55 = vrot.slane %v4971_v57, 1 }
 0x175   : > { %v5304_v43 = vpack.c.bf16 %v847_v37, %v846_v35  ;;  %v2162_v47 = vsel %vm1488_vm9, %v2157_v40, %v2161_v36  ;;  %v1765_v35 = vrot.slane %v6525_v22, 1  ;;  %v1764_v36 = vrot.slane %v4921_v27, 1 }
 0x176   : > { %v1189_v45 = vld [vmem:[#allocation2 + $0x78] sm:$0x1]  ;;  %v735_v46 = vpop.f32.mrb[68].mxu0  ;;  %2667 = vmatprep.mubr.bf16.mxu1 %v2162_v47  ;;  %v2169_v2 = vor.u32 %v2168_v26, %v2164_v58  ;;  %v1878_v59 = vld [vmem:[#allocation2 + $0x7c] sm:$0xf] }
 0x177   : > { %v1190_v48 = vsel %vm6925_vm5, 0, %v1189_v45  ;;  %5451 = vst [vmem:[#allocation2 + $0x80] sm:$0xff] %v5304_v43   ;;  %v736_v50 = vadd.f32 %v7172_v49, %v735_v46  ;;  %v5991_v51 = vpop.f32.mrb[69].mxu0  ;;  %2668 = vmatmul.mubr.bf16.gmra.mrb[28].mxu1 %v4938_v4  ;;  %v6444_v53 = vld [vmem:[#allocation2 + $0x74] ss:$0 sps:$4 sm:$0x11]  }
 0x178   : > { %1191 = vst [vmem:[#allocation2 + $0x78] sm:$0x1] %v1190_v48  ;;  %v738_v52 = vpop.f32.mrb[70].mxu0  ;;  %v2348_v56 = vrot.slane %v6444_v53, 1  ;;  %v2171_v61 = vshll.u32 %v6444_v53, 16  ;;  %v7188_v48 = vsel %vm1745_vm8, %v1764_v36, %v1765_v35 }
 0x179   : > { %v739_v54 = vadd.f32 %v7172_v49, %v738_v52  ;;  %v5992_v41 = vpop.f32.mrb[71].mxu0  ;;  %v848_v63 = vmax.f32 %v736_v50, 0.0  ;;  %v1916_v32 = vld [vmem:[#allocation2 + $0x78] sm:$0xe] }
 0x17a   : > { %v2349_v1 = vsel %vm1745_vm8, %v2347_v55, %v2348_v56  ;;  %v2173_v3 = vrot.slane %v2171_v61, 1  ;;  %v4972_v39 = vcombine.low %v1916_v32, %v1878_v59  ;;  %v7198_v32 = vld [vmem:[#allocation2 + $0x58] sm:$0xf] }
 0x17b   : > { %v849_v0 = vmax.f32 %v739_v54, 0.0  ;;  %6061 = vmatprep.mubr.bf16.mxu0 %v2349_v1 }
 0x17c   : > { %v2174_v13 = vsel %vm1488_vm9, %v2169_v2, %v2173_v3  ;;  %v2350_v26 = vrot.slane %v4972_v39, 1 }
 0x17d   : > { %v5309_v5 = vpack.c.bf16 %v849_v0, %v848_v63  ;;  %2675 = vmatprep.mubr.bf16.mxu1 %v2174_v13 }
 0x17e   : > { %v1192_v4 = vld [vmem:[#allocation2 + $0x84] sm:$0x1]  ;;  %v1245_v9 = vld [vmem:[#allocation2 + $0x80] sm:$0x1]  ;;  %v743_v11 = vpop.f32.mrb[72].mxu0 }
 0x17f   : > { %v1193_v14 = vsel %vm6925_vm5, 0, %v1192_v4  ;;  %v1246_v15 = vsel %vm6935_vm7, 0, %v1245_v9  ;;  %5452 = vst [vmem:[#allocation2 + $0x88] sm:$0xff] %v5309_v5   ;;  %v744_v16 = vadd.f32 %v7172_v49, %v743_v11  ;;  %v5995_v17 = vpop.f32.mrb[73].mxu0  ;;  %v1877_v18 = vld [vmem:[#allocation2 + $0x78] sm:$0xf]  ;;  %2676 = vmatmul.mubr.bf16.gmra.mrb[32].mxu1 %v4939_v25 }
 0x180   : > { %1194 = vst [vmem:[#allocation2 + $0x84] sm:$0x1] %v1193_v14  ;;  %1247 = vst [vmem:[#allocation2 + $0x80] sm:$0x1] %v1246_v15  ;;  %v746_v19 = vpop.f32.mrb[74].mxu0  ;;  %v4940_v7 = vcombine.low %v1877_v18, %v1878_v59 }
 0x181   : > { %v747_v20 = vadd.f32 %v7172_v49, %v746_v19  ;;  %v5996_v21 = vpop.f32.mrb[75].mxu0  ;;  %v850_v28 = vmax.f32 %v744_v16, 0.0  ;;  %v1917_v1 = vld [vmem:[#allocation2 + $0x84] sm:$0xe] }
 0x182   : > { %v2178_v23 = vshll.u32 %v4940_v7, 16  ;;  %v2176_v53 = vshrl.u32 %v4940_v7, 16 }
 0x183   : > { %v851_v31 = vmax.f32 %v747_v20, 0.0 }
 0x184   : > { %v2180_v34 = vrot.slane %v2178_v23, 1 }
 0x185   : > { %v5314_v33 = vpack.c.bf16 %v851_v31, %v850_v28 }
 0x186   : > { %v1248_v37 = vld [vmem:[#allocation2 + $0x8c] sm:$0x1]  ;;  %v751_v38 = vpop.f32.mrb[76].mxu0  ;;  %v1880_v40 = vld [vmem:[#allocation2 + $0x88] sm:$0xf]  ;;  %v2181_v58 = vor.u32 %v2180_v34, %v2176_v53 }
 0x187   : > { %v1249_v25 = vsel %vm6935_vm7, 0, %v1248_v37  ;;  %5453 = vst [vmem:[#allocation2 + $0x90] sm:$0xff] %v5314_v33   ;;  %v752_v43 = vadd.f32 %v7172_v49, %v751_v38  ;;  %v5999_v44 = vpop.f32.mrb[77].mxu0  ;;  %v1879_v45 = vld [vmem:[#allocation2 + $0x84] sm:$0xf]  ;;  %v4973_v59 = vcombine.low %v1917_v1, %v1880_v40 }
 0x188   : > { %1250 = vst [vmem:[#allocation2 + $0x8c] sm:$0x1] %v1249_v25  ;;  %v754_v46 = vpop.f32.mrb[78].mxu0  ;;  %v6449_v47 = vld [vmem:[#allocation2 + $0x80] ss:$0 sps:$4 sm:$0x11]   ;;  %v4941_v57 = vcombine.low %v1879_v45, %v1880_v40 }
 0x189   : > { %v755_v50 = vadd.f32 %v7172_v49, %v754_v46  ;;  %v6000_v51 = vpop.f32.mrb[79].mxu0  ;;  %v2351_v52 = vrot.slane %v6449_v47, 1  ;;  %v2183_v54 = vshll.u32 %v6449_v47, 16  ;;  %v852_v41 = vmax.f32 %v752_v43, 0.0  ;;  %v1335_v47 = vld [vmem:[#allocation2 + $0x54] sm:$0xe] }
 0x18a   : > { %v2190_v63 = vshll.u32 %v4941_v57, 16  ;;  %v2353_v16 = vrot.slane %v4973_v59, 1  ;;  %v2188_v18 = vshrl.u32 %v4941_v57, 16  ;;  %v6530_v46 = vld [vmem:[#allocation2 + $0x5c] ss:$0 sps:$4 sm:$0x11]   ;;  %v4922_v51 = vcombine.low %v1335_v47, %v7198_v32 }
 0x18b   : > { %v853_v55 = vmax.f32 %v755_v50, 0.0  ;;  %v2352_v56 = vsel %vm1745_vm8, %v2350_v26, %v2351_v52  ;;  %v2185_v61 = vrot.slane %v2183_v54, 1 }
 0x18c   : > { %6062 = vmatmul.mubr.bf16.gmra.mrb[124].mxu0 %v2352_v56  ;;  %v2192_v13 = vrot.slane %v2190_v63, 1 }
 0x18d   : > { %v5319_v0 = vpack.c.bf16 %v853_v55, %v852_v41  ;;  %v2186_v5 = vsel %vm1488_vm9, %v2181_v58, %v2185_v61  ;;  %v1768_v55 = vrot.slane %v6530_v46, 1 }
 0x18e   : > { %v1195_v2 = vld [vmem:[#allocation2 + $0x90] sm:$0x1]  ;;  %v759_v3 = vpop.f32.mrb[80].mxu0  ;;  %2683 = vmatprep.mubr.bf16.mxu1 %v2186_v5  ;;  %v2193_v23 = vor.u32 %v2192_v13, %v2188_v18  ;;  %v1882_v31 = vld [vmem:[#allocation2 + $0x94] sm:$0xf] }
 0x18f   : > { %v1196_v60 = vsel %vm6925_vm5, 0, %v1195_v2  ;;  %5454 = vst [vmem:[#allocation2 + $0x98] sm:$0xff] %v5319_v0   ;;  %v760_v8 = vadd.f32 %v7172_v49, %v759_v3  ;;  %v6003_v4 = vpop.f32.mrb[81].mxu0  ;;  %2684 = vmatmul.mubr.bf16.gmra.mrb[36].mxu1 %v4940_v7  ;;  %v6454_v11 = vld [vmem:[#allocation2 + $0x8c] ss:$0 sps:$4 sm:$0x11]  }
 0x190   : > { %1197 = vst [vmem:[#allocation2 + $0x90] sm:$0x1] %v1196_v60  ;;  %v762_v9 = vpop.f32.mrb[82].mxu0  ;;  %v2354_v17 = vrot.slane %v6454_v11, 1  ;;  %v2195_v19 = vshll.u32 %v6454_v11, 16 }
 0x191   : > { %v763_v14 = vadd.f32 %v7172_v49, %v762_v9  ;;  %v6004_v15 = vpop.f32.mrb[83].mxu0  ;;  %v854_v20 = vmax.f32 %v760_v8, 0.0  ;;  %v1918_v53 = vld [vmem:[#allocation2 + $0x90] sm:$0xe] }
 0x192   : > { %v2355_v22 = vsel %vm1745_vm8, %v2353_v16, %v2354_v17  ;;  %v2197_v27 = vrot.slane %v2195_v19, 1  ;;  %v4974_v61 = vcombine.low %v1918_v53, %v1882_v31 }
 0x193   : > { %v855_v21 = vmax.f32 %v763_v14, 0.0  ;;  %6065 = vmatprep.mubr.bf16.mxu0 %v2355_v22 }
 0x194   : > { %v2198_v35 = vsel %vm1488_vm9, %v2193_v23, %v2197_v27  ;;  %v2356_v11 = vrot.slane %v4974_v61, 1  ;;  %v7219_v27 = vld [vmem:[#allocation2 + $0x64] sm:$0xf] }
 0x195   : > { %v5324_v28 = vpack.c.bf16 %v855_v21, %v854_v20  ;;  %2691 = vmatprep.mubr.bf16.mxu1 %v2198_v35 }
 0x196   : > { %v1198_v7 = vld [vmem:[#allocation2 + $0x9c] sm:$0x1]  ;;  %v1251_v33 = vld [vmem:[#allocation2 + $0x98] sm:$0x1]  ;;  %v767_v34 = vpop.f32.mrb[84].mxu0 }
 0x197   : > { %v1199_v37 = vsel %vm6925_vm5, 0, %v1198_v7  ;;  %v1252_v38 = vsel %vm6935_vm7, 0, %v1251_v33  ;;  %5455 = vst [vmem:[#allocation2 + $0xa0] sm:$0xff] %v5324_v28   ;;  %v768_v39 = vadd.f32 %v7172_v49, %v767_v34  ;;  %v6007_v40 = vpop.f32.mrb[85].mxu0  ;;  %v1881_v36 = vld [vmem:[#allocation2 + $0x90] sm:$0xf]  ;;  %2692 = vmatmul.mubr.bf16.gmra.mrb[40].mxu1 %v4941_v57 }
 0x198   : > { %1200 = vst [vmem:[#allocation2 + $0x9c] sm:$0x1] %v1199_v37  ;;  %1253 = vst [vmem:[#allocation2 + $0x98] sm:$0x1] %v1252_v38  ;;  %v770_v25 = vpop.f32.mrb[86].mxu0  ;;  %v4942_v43 = vcombine.low %v1881_v36, %v1882_v31  ;;  %v1767_v57 = vrot.slane %v4922_v51, 1 }
 0x199   : > { %v771_v44 = vadd.f32 %v7172_v49, %v770_v25  ;;  %v6008_v45 = vpop.f32.mrb[87].mxu0  ;;  %v856_v26 = vmax.f32 %v768_v39, 0.0  ;;  %v1919_v23 = vld [vmem:[#allocation2 + $0x9c] sm:$0xe]  ;;  %v1336_v34 = vld [vmem:[#allocation2 + $0x60] sm:$0xe] }
 0x19a   : > { %v2202_v50 = vshll.u32 %v4942_v43, 16  ;;  %v7214_v8 = vsel %vm1745_vm8, %v1767_v57, %v1768_v55  ;;  %v2200_v14 = vshrl.u32 %v4942_v43, 16  ;;  %v7226_v45 = vld [vmem:[#allocation2 + $0x68] ss:$0 sps:$4 sm:$0x11]   ;;  %v4923_v46 = vcombine.low %v1336_v34, %v7219_v27 }
 0x19b   : > { %v857_v52 = vmax.f32 %v771_v44, 0.0  ;;  %v1771_v61 = vrot.slane %v7226_v45, 1 }
 0x19c   : > { %v2204_v41 = vrot.slane %v2202_v50, 1 }
 0x19d   : > { %v5329_v54 = vpack.c.bf16 %v857_v52, %v856_v26 }
 0x19e   : > { %v1254_v56 = vld [vmem:[#allocation2 + $0xa4] sm:$0x1]  ;;  %v775_v58 = vpop.f32.mrb[88].mxu0  ;;  %v1884_v63 = vld [vmem:[#allocation2 + $0xa0] sm:$0xf]  ;;  %v2205_v19 = vor.u32 %v2204_v41, %v2200_v14 }
 0x19f   : > { %v1255_v0 = vsel %vm6935_vm7, 0, %v1254_v56  ;;  %5456 = vst [vmem:[#allocation2 + $0xa8] sm:$0xff] %v5329_v54   ;;  %v776_v1 = vadd.f32 %v7172_v49, %v775_v58  ;;  %v6011_v2 = vpop.f32.mrb[89].mxu0  ;;  %v1883_v3 = vld [vmem:[#allocation2 + $0x9c] sm:$0xf]  ;;  %v4975_v33 = vcombine.low %v1919_v23, %v1884_v63 }
 0x1a0   : > { %1256 = vst [vmem:[#allocation2 + $0xa4] sm:$0x1] %v1255_v0  ;;  %v778_v5 = vpop.f32.mrb[90].mxu0  ;;  %v6459_v59 = vld [vmem:[#allocation2 + $0x98] ss:$0 sps:$4 sm:$0x11]   ;;  %v7211_v60 = vcombine.low %v1883_v3, %v1884_v63 }
 0x1a1   : > { %v779_v4 = vadd.f32 %v7172_v49, %v778_v5  ;;  %v6012_v9 = vpop.f32.mrb[91].mxu0  ;;  %v2357_v13 = vrot.slane %v6459_v59, 1  ;;  %v2207_v15 = vshll.u32 %v6459_v59, 16  ;;  %v858_v16 = vmax.f32 %v776_v1, 0.0  ;;  %v7231_v58 = vld [vmem:[#allocation2 + $0x70] sm:$0xf] }
 0x1a2   : > { %v2214_v21 = vshll.u32 %v7211_v60, 16  ;;  %v2359_v47 = vrot.slane %v4975_v33, 1  ;;  %v2212_v51 = vshrl.u32 %v7211_v60, 16  ;;  %v1770_v2 = vrot.slane %v4923_v46, 1  ;;  %v7251_v33 = vld [vmem:[#allocation2 + $0x7c] sm:$0xf] }
 0x1a3   : > { %v859_v17 = vmax.f32 %v779_v4, 0.0  ;;  %v2358_v18 = vsel %vm1745_vm8, %v2356_v11, %v2357_v13  ;;  %v2209_v20 = vrot.slane %v2207_v15, 1  ;;  %v1337_v15 = vld [vmem:[#allocation2 + $0x6c] sm:$0xe] }
 0x1a4   : > { %6066 = vmatmul.mubr.bf16.gmra.mrb[128].mxu0 %v2358_v18  ;;  %v2216_v36 = vrot.slane %v2214_v21, 1  ;;  %v7244_v14 = vsel %vm1745_vm8, %v1770_v2, %v1771_v61  ;;  %v7247_v18 = vld [vmem:[#allocation2 + $0x74] ss:$0 sps:$4 sm:$0x11]  }
 0x1a5   : > { %v5334_v22 = vpack.c.bf16 %v859_v17, %v858_v16  ;;  %v2210_v7 = vsel %vm1488_vm9, %v2205_v19, %v2209_v20  ;;  %v4924_v19 = vcombine.low %v1337_v15, %v7231_v58 }
 0x1a6   : > { %v1201_v28 = vld [vmem:[#allocation2 + $0xa8] sm:$0x1]  ;;  %v783_v31 = vpop.f32.mrb[92].mxu0  ;;  %2699 = vmatprep.mubr.bf16.mxu1 %v2210_v7  ;;  %v2217_v41 = vor.u32 %v2216_v36, %v2212_v51  ;;  %v1886_v56 = vld [vmem:[#allocation2 + $0xac] sm:$0xf] }
 0x1a7   : > { %v1202_v35 = vsel %vm6925_vm5, 0, %v1201_v28  ;;  %5457 = vst [vmem:[#allocation2 + $0xb0] sm:$0xff] %v5334_v22   ;;  %v784_v37 = vadd.f32 %v7172_v49, %v783_v31  ;;  %v6015_v38 = vpop.f32.mrb[93].mxu0  ;;  %2700 = vmatmul.mubr.bf16.gmra.mrb[44].mxu1 %v4942_v43  ;;  %v6462_v40 = vld [vmem:[#allocation2 + $0xa4] ss:$0 sps:$4 sm:$0x11]  }
 0x1a8   : > { %1203 = vst [vmem:[#allocation2 + $0xa8] sm:$0x1] %v1202_v35  ;;  %v786_v39 = vpop.f32.mrb[94].mxu0  ;;  %v2360_v50 = vrot.slane %v6462_v40, 1  ;;  %v2219_v26 = vshll.u32 %v6462_v40, 16  ;;  %v1773_v34 = vrot.slane %v4924_v19, 1 }
 0x1a9   : > { %v787_v25 = vadd.f32 %v7172_v49, %v786_v39  ;;  %v6016_v44 = vpop.f32.mrb[95].mxu0  ;;  %v860_v52 = vmax.f32 %v784_v37, 0.0  ;;  %v1920_v20 = vld [vmem:[#allocation2 + $0xa8] sm:$0xe]  ;;  %v3368_v28 = vld [vmem:[#allocation2 + $0x18] sm:$0xf] }
 0x1aa   : > { %v2361_v54 = vsel %vm1745_vm8, %v2359_v47, %v2360_v50  ;;  %v2221_v43 = vrot.slane %v2219_v26, 1  ;;  %v4976_v31 = vcombine.low %v1920_v20, %v1886_v56  ;;  %v3369_v7 = vld [vmem:[#allocation2 + $0x1c] sm:$0xf]  ;;  %v1774_v35 = vrot.slane %v7247_v18, 1  ;;  %v1338_v37 = vld [vmem:[#allocation2 + $0x78] sm:$0xe] }
 0x1ab   : > { %v861_v53 = vmax.f32 %v787_v25, 0.0  ;;  %6069 = vmatprep.mubr.bf16.mxu0 %v2361_v54 }
 0x1ac   : > { %v2222_v1 = vsel %vm1488_vm9, %v2217_v41, %v2221_v43  ;;  %v2362_v43 = vrot.slane %v4976_v31, 1 }
 0x1ad   : > { %v5339_v55 = vpack.c.bf16 %v861_v53, %v860_v52  ;;  %2707 = vmatprep.mubr.bf16.mxu1 %v2222_v1  ;;  %v7259_v52 = vcombine.low %v3368_v28, %v3369_v7  ;;  %v7262_v53 = vsel %vm1745_vm8, %v1773_v34, %v1774_v35  ;;  %v7274_v28 = vld [vmem:[#allocation2 + $0x20] ss:$0 sps:$4 sm:$0x11]  }
 0x1ae   : > { %v1204_v63 = vld [vmem:[#allocation2 + $0xb4] sm:$0x1]  ;;  %v1257_v57 = vld [vmem:[#allocation2 + $0xb0] sm:$0x1]  ;;  %v791_v0 = vpop.f32.mrb[96].mxu0  ;;  %8128 = vst [vmem:[#allocation3_spill] sm:$0xff] %v7262_v53 }
 0x1af   : > { %v1205_v3 = vsel %vm6925_vm5, 0, %v1204_v63  ;;  %v1258_v5 = vsel %vm6935_vm7, 0, %v1257_v57  ;;  %5458 = vst [vmem:[#allocation2 + $0xb8] sm:$0xff] %v5339_v55   ;;  %v792_v59 = vadd.f32 %v7172_v49, %v791_v0  ;;  %v6019_v4 = vpop.f32.mrb[97].mxu0  ;;  %v1885_v9 = vld [vmem:[#allocation2 + $0xa8] sm:$0xf]  ;;  %2708 = vmatmul.mubr.bf16.gmra.mrb[48].mxu1 %v7211_v60 }
 0x1b0   : > { %1206 = vst [vmem:[#allocation2 + $0xb4] sm:$0x1] %v1205_v3  ;;  %1259 = vst [vmem:[#allocation2 + $0xb0] sm:$0x1] %v1258_v5  ;;  %v794_v11 = vpop.f32.mrb[98].mxu0  ;;  %v7241_v13 = vcombine.low %v1885_v9, %v1886_v56  ;;  %v4925_v56 = vcombine.low %v1338_v37, %v7251_v33  ;;  %v3579_v9 = vshll.u32 %v7259_v52, 16 }
 0x1b1   : > { %v795_v16 = vadd.f32 %v7172_v49, %v794_v11  ;;  %v6020_v17 = vpop.f32.mrb[99].mxu0  ;;  %v862_v22 = vmax.f32 %v792_v59, 0.0  ;;  %v7265_v55 = vld [vmem:[#allocation2 + $0x80] ss:$0 sps:$4 sm:$0x11]   ;;  %v3577_v35 = vshrl.u32 %v7259_v52, 16 }
 0x1b2   : > { %v2226_v21 = vshll.u32 %v7241_v13, 16  ;;  %v2224_v63 = vshrl.u32 %v7241_v13, 16  ;;  %v1921_v4 = vld [vmem:[#allocation2 + $0xb4] sm:$0xe]  ;;  %v1281_v17 = vld [vmem:[#allocation2 + $0x4] sm:$0xf] }
 0x1b3   : > { %v863_v23 = vmax.f32 %v795_v16, 0.0  ;;  %v1280_v16 = vld [vmem:[#allocation2] sm:$0xf]  ;;  %v1776_v19 = vrot.slane %v4925_v56, 1  ;;  %v1777_v20 = vrot.slane %v7265_v55, 1  ;;  %v7284_v37 = vrot.slane %v3579_v9, 1 }
 0x1b4   : > { %v2228_v40 = vrot.slane %v2226_v21, 1  ;;  %v3371_v9 = vld [vmem:[#allocation2 + $0x28] sm:$0xf] }
 0x1b5   : > { %v5344_v60 = vpack.c.bf16 %v863_v23, %v862_v22  ;;  %v7279_v7 = vsel %vm1745_vm8, %v1776_v19, %v1777_v20  ;;  %v1341_v19 = vld [vmem:[#allocation2 + $0x9c] sm:$0xe]  ;;  %v1342_v20 = vld [vmem:[#allocation2 + $0xa8] sm:$0xe] }
 0x1b6   : > { %v1260_v38 = vld [vmem:[#allocation2 + $0xbc] sm:$0x1]  ;;  %v799_v39 = vpop.f32.mrb[100].mxu0  ;;  %v1888_v36 = vld [vmem:[#allocation2 + $0xb8] sm:$0xf]  ;;  %v2229_v5 = vor.u32 %v2228_v40, %v2224_v63  ;;  %8129 = vst [vmem:[#allocation4_spill] sm:$0xff] %v7279_v7 }
 0x1b7   : > { %v1261_v25 = vsel %vm6935_vm7, 0, %v1260_v38  ;;  %5459 = vst [vmem:[#allocation2 + $0xc0] sm:$0xff] %v5344_v60   ;;  %v800_v44 = vadd.f32 %v7172_v49, %v799_v39  ;;  %v6023_v46 = vpop.f32.mrb[101].mxu0  ;;  %v1887_v47 = vld [vmem:[#allocation2 + $0xb4] sm:$0xf]  ;;  %v4977_v15 = vcombine.low %v1921_v4, %v1888_v36  ;;  %v7286_v38 = vcombine.low %v1280_v16, %v1281_v17 }
 0x1b8   : > { %1262 = vst [vmem:[#allocation2 + $0xbc] sm:$0x1] %v1261_v25  ;;  %v802_v50 = vpop.f32.mrb[102].mxu0  ;;  %v6467_v51 = vld [vmem:[#allocation2 + $0xb0] ss:$0 sps:$4 sm:$0x11]   ;;  %v7257_v26 = vcombine.low %v1887_v47, %v1888_v36 }
 0x1b9   : > { %v803_v54 = vadd.f32 %v7172_v49, %v802_v50  ;;  %v6024_v41 = vpop.f32.mrb[103].mxu0  ;;  %v2363_v61 = vrot.slane %v6467_v51, 1  ;;  %v2231_v57 = vshll.u32 %v6467_v51, 16  ;;  %v864_v1 = vmax.f32 %v800_v44, 0.0  ;;  %v3370_v4 = vld [vmem:[#allocation2 + $0x24] sm:$0xf] }
 0x1ba   : > { %v2238_v0 = vshll.u32 %v7257_v26, 16  ;;  %v2236_v34 = vshrl.u32 %v7257_v26, 16  ;;  %v2365_v40 = vrot.slane %v4977_v15, 1  ;;  %v3584_v50 = vshll.u32 %v7274_v28, 16 }
 0x1bb   : > { %v865_v2 = vmax.f32 %v803_v54, 0.0  ;;  %v2364_v3 = vsel %vm1745_vm8, %v2362_v43, %v2363_v61  ;;  %v2233_v59 = vrot.slane %v2231_v57, 1  ;;  %v1339_v54 = vld [vmem:[#allocation2 + $0x84] sm:$0xe] }
 0x1bc   : > { %6070 = vmatmul.mubr.bf16.gmra.mrb[132].mxu0 %v2364_v3  ;;  %v2240_v23 = vrot.slane %v2238_v0, 1  ;;  %v7294_v57 = vld [vmem:[#allocation2 + $0x8c] ss:$0 sps:$4 sm:$0x11]   ;;  %v7298_v3 = vld [vmem:[#allocation2 + $0xa0] sm:$0xf] }
 0x1bd   : > { %v5349_v11 = vpack.c.bf16 %v865_v2, %v864_v1  ;;  %v2234_v22 = vsel %vm1488_vm9, %v2229_v5, %v2233_v59  ;;  %v6500_v0 = vld [vmem:[#allocation2 + $0x8] ss:$0 sps:$4 sm:$0x11]   ;;  %v1282_v1 = vld [vmem:[#allocation2 + $0xc] sm:$0xf]  ;;  %v4928_v12 = vcombine.low %v1341_v19, %v7298_v3 }
 0x1be   : > { %v1207_v21 = vld [vmem:[#allocation2 + $0xc0] sm:$0x1]  ;;  %2715 = vmatprep.mubr.bf16.mxu1 %v2234_v22  ;;  %v807_v39 = vpop.f32.mrb[104].mxu0  ;;  %v2241_v47 = vor.u32 %v2240_v23, %v2236_v34  ;;  %v7296_v2 = vld [vmem:[#allocation2 + $0x94] sm:$0xf] }
 0x1bf   : > { %v1208_v60 = vsel %vm6925_vm5, 0, %v1207_v21  ;;  %5460 = vst [vmem:[#allocation2 + $0xc8] sm:$0xff] %v5349_v11   ;;  %v6476_v31 = vld [vmem:[#allocation2 + $0xbc] ss:$0 sps:$4 sm:$0x11]   ;;  %2716 = vmatmul.mubr.bf16.gmra.mrb[52].mxu1 %v7241_v13  ;;  %v808_v44 = vadd.f32 %v7172_v49, %v807_v39  ;;  %v6027_v46 = vpop.f32.mrb[105].mxu0 }
 0x1c0   : > { %1209 = vst [vmem:[#allocation2 + $0xc0] sm:$0x1] %v1208_v60  ;;  %v2366_v36 = vrot.slane %v6476_v31, 1  ;;  %v2243_v25 = vshll.u32 %v6476_v31, 16  ;;  %v810_v51 = vpop.f32.mrb[106].mxu0  ;;  %v1492_v11 = vshll.u32 %v7286_v38, 16 }
 0x1c1   : > { %v7290_v13 = vld [vmem:[#allocation2 + $0x88] sm:$0xf]  ;;  %v866_v56 = vmax.f32 %v808_v44, 0.0  ;;  %v811_v61 = vadd.f32 %v7172_v49, %v810_v51  ;;  %v6028_v63 = vpop.f32.mrb[107].mxu0  ;;  %v1340_v5 = vld [vmem:[#allocation2 + $0x90] sm:$0xe] }
 0x1c2   : > { %v2367_v41 = vsel %vm1745_vm8, %v2365_v40, %v2366_v36  ;;  %v2245_v43 = vrot.slane %v2243_v25, 1  ;;  %v7302_v16 = vld [vmem:[#allocation2 + $0x98] ss:$0 sps:$4 sm:$0x11]   ;;  %v7304_v49 = vld [vmem:[#allocation2 + $0xac] sm:$0xf]  ;;  %v4926_v17 = vcombine.low %v1339_v54, %v7290_v13  ;;  %v4927_v36 = vcombine.low %v1340_v5, %v7296_v2 }
 0x1c3   : > { %6073 = vmatprep.mubr.bf16.mxu0 %v2367_v41  ;;  %v867_v15 = vmax.f32 %v811_v61, 0.0  ;;  %v1311_v23 = vld [vmem:[#allocation2 + $0xb8] sm:$0xf]  ;;  %v1890_v39 = vld [vmem:[#allocation2 + $0xc4] sm:$0xf]  ;;  %v7326_v63 = vcombine.low %v3370_v4, %v3371_v9  ;;  %v1497_v5 = vshll.u32 %v6500_v0, 16 }
 0x1c4   : > { %v2246_v59 = vsel %vm1488_vm9, %v2241_v47, %v2245_v43  ;;  %v7315_v44 = vld [vmem:[#allocation2 + $0xa4] ss:$0 sps:$4 sm:$0x11]   ;;  %v7317_v46 = vld [vmem:[#allocation2 + $0xb0] ss:$0 sps:$4 sm:$0x11]  }
 0x1c5   : > { %2723 = vmatprep.mubr.bf16.mxu1 %v2246_v59  ;;  %v5354_v40 = vpack.c.bf16 %v867_v15, %v866_v56  ;;  %v1922_v47 = vld [vmem:[#allocation2 + $0xc0] sm:$0xe]  ;;  %v6608_v51 = vld [vmem:[#allocation2 + $0x10] sm:$0xf]  ;;  %v1779_v41 = vrot.slane %v4926_v17, 1  ;;  %v1780_v43 = vrot.slane %v7294_v57, 1 }
 0x1c6   : > { %v1210_v21 = vld [vmem:[#allocation2 + $0xcc] sm:$0x1]  ;;  %v1263_v22 = vld [vmem:[#allocation2 + $0xc8] sm:$0x1]  ;;  %v7321_v54 = vcombine.low %v1282_v1, %v6608_v51  ;;  %v1343_v56 = vld [vmem:[#allocation2 + $0xb4] sm:$0xe] }
 0x1c7   : > { %v1211_v60 = vsel %vm6925_vm5, 0, %v1210_v21  ;;  %v1264_v31 = vsel %vm6935_vm7, 0, %v1263_v22  ;;  %v1889_v34 = vld [vmem:[#allocation2 + $0xc0] sm:$0xf]  ;;  %2724 = vmatmul.mubr.bf16.gmra.mrb[56].mxu1 %v7257_v26  ;;  %5461 = vst [vmem:[#allocation2 + $0xd0] sm:$0xff] %v5354_v40   ;;  %v4929_v26 = vcombine.low %v1342_v20, %v7304_v49  ;;  %v4930_v59 = vcombine.low %v1343_v56, %v1311_v23 }
 0x1c8   : > { %1212 = vst [vmem:[#allocation2 + $0xcc] sm:$0x1] %v1211_v60  ;;  %1265 = vst [vmem:[#allocation2 + $0xc8] sm:$0x1] %v1264_v31  ;;  %v7313_v25 = vcombine.low %v1889_v34, %v1890_v39  ;;  %v1490_v15 = vshrl.u32 %v7286_v38, 16  ;;  %v7333_v1 = vsel %vm1745_vm8, %v1779_v41, %v1780_v43  ;;  %v1782_v17 = vrot.slane %v4927_v36, 1 }
 0x1c9   : > { %1277 = vst [vmem:[#allocation2 + $0xcc] sm:$0xf] %v6662_v6  ;;  %1278 = vst [vmem:[#allocation2 + $0xd0] sm:$0xf] %v6662_v6  ;;  %v1783_v21 = vrot.slane %v7302_v16, 1  ;;  %v4978_v20 = vcombine.low %v1922_v47, %v1890_v39  ;;  %v1494_v22 = vrot.slane %v1492_v11, 1 }
 0x1ca   : > { %v2250_v61 = vshll.u32 %v7313_v25, 16  ;;  %v7330_v19 = vld [vmem:[#allocation2 + $0xbc] ss:$0 sps:$4 sm:$0x11]   ;;  %8130 = vst [vmem:[#allocation5_spill] sm:$0xff] %v7333_v1  ;;  %v1785_v60 = vrot.slane %v4928_v12, 1 }
 0x1cb   : > { %v1786_v4 = vrot.slane %v7315_v44, 1  ;;  %v3586_v0 = vrot.slane %v3584_v50, 1  ;;  %v7340_v9 = vsel %vm1745_vm8, %v1782_v17, %v1783_v21  ;;  %v1788_v23 = vrot.slane %v4929_v26, 1  ;;  %v6498_v40 = vld [vmem:[#allocation2 + $0x2c] ss:$0 sps:$4 sm:$0x11]  }
 0x1cc   : > { %8131 = vst [vmem:[#allocation6_spill] sm:$0xff] %v7340_v9  ;;  %v1789_v31 = vrot.slane %v7317_v46, 1  ;;  %v2252_v34 = vrot.slane %v2250_v61, 1  ;;  %v1499_v51 = vrot.slane %v1497_v5, 1  ;;  %v1791_v39 = vrot.slane %v4930_v59, 1 }
 0x1cd   : > { %v7344_v36 = vsel %vm1745_vm8, %v1785_v60, %v1786_v4  ;;  %v1792_v28 = vrot.slane %v7330_v19, 1  ;;  %v2368_v50 = vrot.slane %v4978_v20, 1  ;;  %v2248_v47 = vshrl.u32 %v7313_v25, 16  ;;  %v3372_v4 = vld [vmem:[#allocation2 + $0x30] sm:$0xf] }
 0x1ce   : > { %8132 = vst [vmem:[#allocation7_spill] sm:$0xff] %v7344_v36  ;;  %v7347_v12 = vsel %vm1745_vm8, %v1788_v23, %v1789_v31  ;;  %v1495_v41 = vor.u32 %v1494_v22, %v1490_v15  ;;  %v1266_v43 = vld [vmem:[#allocation2 + $0xd4] sm:$0x1]  ;;  %v3582_v59 = vor.u32 %v7284_v37, %v3577_v35  ;;  %v3591_v17 = vshll.u32 %v7326_v63, 16  ;;  %v1284_v31 = vld [vmem:[#allocation2 + $0x18] sm:$0xf] }
 0x1cf   : > { %v6489_v11 = vld [vmem:[#allocation2 + $0xc8] ss:$0 sps:$4 sm:$0x11]   ;;  %8133 = vst [vmem:[#allocation8_spill] sm:$0xff] %v7347_v12  ;;  %v1267_v61 = vsel %vm6935_vm7, 0, %v1266_v43  ;;  %v7354_v5 = vsel %vm1745_vm8, %v1791_v39, %v1792_v28  ;;  %v1504_v21 = vshll.u32 %v7321_v54, 16  ;;  %v2253_v20 = vor.u32 %v2252_v34, %v2248_v47 }
 0x1d0   : > { %v2369_v26 = vrot.slane %v6489_v11, 1  ;;  %v2255_v56 = vshll.u32 %v6489_v11, 16  ;;  %8134 = vst [vmem:[#allocation9_spill] sm:$0xff] %v7354_v5  ;;  %1268 = vst [vmem:[#allocation2 + $0xd4] sm:$0x1] %v1267_v61  ;;  %v3596_v60 = vshll.u32 %v6498_v40, 16  ;;  %v3587_v24 = vsel %vm1488_vm9, %v3582_v59, %v3586_v0 }
 0x1d1   : > { %1279 = vst [vmem:[#allocation2 + $0xd4] sm:$0xf] %v6662_v6  ;;  %v1500_v35 = vsel %vm1488_vm9, %v1495_v41, %v1499_v51  ;;  %v3373_v37 = vld [vmem:[#allocation2 + $0x34] sm:$0xf]  ;;  %v3593_v39 = vrot.slane %v3591_v17, 1  ;;  %v3589_v6 = vshrl.u32 %v7326_v63, 16 }
 0x1d2   : > { %v2370_v15 = vsel %vm1745_vm8, %v2368_v50, %v2369_v26  ;;  %v2257_v22 = vrot.slane %v2255_v56, 1  ;;  %v7366_v11 = vcombine.low %v3372_v4, %v3373_v37  ;;  %v7368_v34 = vld [vmem:[#allocation2 + $0x94] sm:$0xf]  ;;  %v3426_v40 = vld [vmem:[#allocation2 + $0x90] sm:$0xe]  ;;  %v3598_v28 = vrot.slane %v3596_v60, 1 }
 0x1d3   : > { %6074 = vmatmul.mubr.bf16.gmra.mrb[136].mxu0 %v2370_v15  ;;  %v1506_v0 = vrot.slane %v1504_v21, 1  ;;  %v6609_v50 = vld [vmem:[#allocation2 + $0x14] ss:$0 sps:$4 sm:$0x11]   ;;  %v7372_v43 = vld [vmem:[#allocation2 + $0xa0] sm:$0xf]  ;;  %v5069_v59 = vcombine.low %v3426_v40, %v7368_v34  ;;  %v3594_v15 = vor.u32 %v3593_v39, %v3589_v6 }
 0x1d4   : > { %4120 = vmatprep.mubr.bf16.mxu0 %v3587_v24  ;;  %v2258_v23 = vsel %vm1488_vm9, %v2253_v20, %v2257_v22  ;;  %v1509_v47 = vshll.u32 %v6609_v50, 16  ;;  %v6505_v51 = vld [vmem:[#allocation2 + $0x38] ss:$0 sps:$4 sm:$0x11]   ;;  %v6610_v26 = vld [vmem:[#allocation2 + $0x1c] sm:$0xf] }
 0x1d5   : > { %2731 = vmatprep.mubr.bf16.mxu1 %v2258_v23  ;;  %v7374_v41 = vld [vmem:[#allocation2 + $0x98] ss:$0 sps:$4 sm:$0x11]   ;;  %v7376_v56 = vcombine.low %v1284_v31, %v6610_v26  ;;  %v7378_v61 = vld [vmem:[#allocation2 + $0xac] sm:$0xf]  ;;  %v3603_v21 = vshll.u32 %v7366_v11, 16 }
 0x1d6   : > { %2732 = vmatmul.mubr.bf16.gmra.mrb[60].mxu1 %v7313_v25  ;;  %v3427_v25 = vld [vmem:[#allocation2 + $0x9c] sm:$0xe]  ;;  %v3428_v17 = vld [vmem:[#allocation2 + $0xa8] sm:$0xe]  ;;  %v1502_v60 = vshrl.u32 %v7321_v54, 16  ;;  %v1511_v4 = vrot.slane %v1509_v47, 1 }
 0x1d7   : > { %3077 = vmatprep.mubr.bf16.mxu1 %v1500_v35  ;;  %v7382_v20 = vld [vmem:[#allocation2 + $0xa4] ss:$0 sps:$4 sm:$0x11]   ;;  %v5070_v22 = vcombine.low %v3427_v25, %v7372_v43  ;;  %v3374_v24 = vld [vmem:[#allocation2 + $0x3c] sm:$0xf]  ;;  %v3599_v35 = vsel %vm1488_vm9, %v3594_v15, %v3598_v28  ;;  %v3608_v37 = vshll.u32 %v6505_v51, 16  ;;  %v5071_v39 = vcombine.low %v3428_v17, %v7378_v61 }
 0x1d8   : > { %v3375_v23 = vld [vmem:[#allocation2 + $0x40] sm:$0xf]  ;;  %v7388_v31 = vld [vmem:[#allocation2 + $0xb0] ss:$0 sps:$4 sm:$0x11]   ;;  %v1507_v40 = vor.u32 %v1506_v0, %v1502_v60  ;;  %v1516_v6 = vshll.u32 %v7376_v56, 16 }
 0x1d9   : > { %v6510_v50 = vld [vmem:[%s8117_s3 + $0x88] sm:$0xff]   ;;  %v3862_v47 = vrot.slane %v5069_v59, 1  ;;  %v3863_v26 = vrot.slane %v7374_v41, 1  ;;  %v3605_v25 = vrot.slane %v3603_v21, 1  ;;  %v1286_v28 = vld [vmem:[#allocation2 + $0x24] sm:$0xf] }
 0x1da   : > { %v3865_v51 = vrot.slane %v5070_v22, 1  ;;  %v3866_v15 = vrot.slane %v7382_v20, 1  ;;  %v1512_v0 = vsel %vm1488_vm9, %v1507_v40, %v1511_v4  ;;  %v3601_v17 = vshrl.u32 %v7366_v11, 16  ;;  %v6611_v60 = vld [vmem:[#allocation2 + $0x20] ss:$0 sps:$4 sm:$0x11]  }
 0x1db   : > { %4121 = vmatmul.mubr.bf16.vlgmr.msra.gmra.mrb[140].mxu0 %v7259_v52  ;;  %v7396_v52 = vcombine.low %v3374_v24, %v3375_v23  ;;  %v7403_v5 = vsel %vm1745_vm8, %v3862_v47, %v3863_v26  ;;  %v6612_v59 = vld [vmem:[%s8117_s3 + $0x80] sm:$0xff]   ;;  %v3610_v21 = vrot.slane %v3608_v37, 1  ;;  %v3869_v4 = vrot.slane %v7388_v31, 1  ;;  %v6613_v40 = vld [vmem:[#allocation2 + $0x28] sm:$0xf]  ;;  %v6519_v47 = vld [vmem:[%s8117_s3 + $0x90] sm:$0xff]  }
 0x1dc   : > { %4128 = vmatprep.mubr.bf16.mxu0 %v3599_v35  ;;  %v1521_v35 = vshll.u32 %v6611_v60, 16  ;;  %8135 = vst [vmem:[#allocation10_spill] sm:$0xff] %v7403_v5  ;;  %v6509_v22 = vld [vmem:[#allocation2 + $0x44] ss:$0 sps:$4 sm:$0x11]   ;;  %v7409_v24 = vsel %vm1745_vm8, %v3865_v51, %v3866_v15  ;;  %v1518_v23 = vrot.slane %v1516_v6, 1  ;;  %v7412_v60 = vcombine.low %v1286_v28, %v6613_v40 }
 0x1dd   : > { %8136 = vst [vmem:[#allocation11_spill] sm:$0xff] %v7409_v24  ;;  %v7417_v26 = vld [vmem:[#allocation2 + $0xb8] sm:$0xf]  ;;  %v3615_v37 = vshll.u32 %v7396_v52, 16  ;;  %v3376_v6 = vld [vmem:[#allocation2 + $0x48] sm:$0xf] }
 0x1de   : > { %3078 = vmatmul.mubr.bf16.vlgmr.msra.gmra.mrb[64].mxu1 %v7286_v38  ;;  %v3868_v38 = vrot.slane %v5071_v39, 1  ;;  %v1514_v39 = vshrl.u32 %v7376_v56, 16  ;;  %v1523_v15 = vrot.slane %v1521_v35, 1  ;;  %v3620_v40 = vshll.u32 %v6509_v22, 16  ;;  %v6528_v35 = vld [vmem:[%s8117_s3 + $0x98] sm:$0xff]  }
 0x1df   : > { %6078 = vmatpush3.bf16.msra.mxu1 %v6612_v59  ;;  %3085 = vmatprep.mubr.bf16.mxu1 %v1512_v0  ;;  %v3606_v0 = vor.u32 %v3605_v25, %v3601_v17  ;;  %v3429_v59 = vld [vmem:[#allocation2 + $0xb4] sm:$0xe]  ;;  %v7426_v24 = vld [vmem:[#allocation2 + $0xbc] ss:$0 sps:$4 sm:$0x11]   ;;  %v3613_v22 = vshrl.u32 %v7396_v52, 16 }
 0x1e0   : > { %6079 = vmatprep.subr.bf16.mxu1 %v6510_v50  ;;  %v7421_v51 = vsel %vm1745_vm8, %v3868_v38, %v3869_v4  ;;  %v5072_v25 = vcombine.low %v3429_v59, %v7417_v26  ;;  %v1519_v17 = vor.u32 %v1518_v23, %v1514_v39  ;;  %v1528_v38 = vshll.u32 %v7412_v60, 16  ;;  %v3377_v4 = vld [vmem:[#allocation2 + $0x4c] sm:$0xf]  ;;  %v6514_v59 = vld [vmem:[#allocation2 + $0x50] ss:$0 sps:$4 sm:$0x11]  }
 0x1e1   : > { %8137 = vst [vmem:[#allocation12_spill] sm:$0xff] %v7421_v51  ;;  %v3611_v28 = vsel %vm1488_vm9, %v3606_v0, %v3610_v21  ;;  %v3617_v51 = vrot.slane %v3615_v37, 1  ;;  %v1288_v21 = vld [vmem:[#allocation2 + $0x30] sm:$0xf]  ;;  %v3622_v39 = vrot.slane %v3620_v40, 1  ;;  %v3872_v5 = vrot.slane %v7426_v24, 1 }
 0x1e2   : > { %v6614_v0 = vld [vmem:[#allocation2 + $0x2c] ss:$0 sps:$4 sm:$0x11]   ;;  %v1530_v12 = vrot.slane %v1528_v38, 1  ;;  %v6615_v37 = vld [vmem:[#allocation2 + $0x34] sm:$0xf] }
 0x1e3   : > { %4129 = vmatmul.mubr.bf16.gmra.mrb[144].mxu0 %v7326_v63  ;;  %6080 = vmatpush3.bf16.msra.mxu1 %v6510_v50  ;;  %v7433_v63 = vcombine.low %v3376_v6, %v3377_v4  ;;  %v1524_v50 = vsel %vm1488_vm9, %v1519_v17, %v1523_v15  ;;  %v1533_v23 = vshll.u32 %v6614_v0, 16  ;;  %v7439_v6 = vcombine.low %v1288_v21, %v6615_v37  ;;  %v7460_v37 = vld [vmem:[#allocation2 + $0x5c] ss:$0 sps:$4 sm:$0x11]  }
 0x1e4   : > { %4136 = vmatprep.mubr.bf16.mxu0 %v3611_v28  ;;  %6081 = vmatprep.subr.bf16.mxu1 %v6519_v47  ;;  %v3871_v28 = vrot.slane %v5072_v25, 1  ;;  %v3618_v15 = vor.u32 %v3617_v51, %v3613_v22  ;;  %v3378_v25 = vld [vmem:[#allocation2 + $0x54] sm:$0xf]  ;;  %v3632_v21 = vshll.u32 %v6514_v59, 16  ;;  %8139 = vst [vmem:[#allocation14_spill] sm:$0xff] %v7460_v37 }
 0x1e5   : > { %v3627_v17 = vshll.u32 %v7433_v63, 16  ;;  %v1535_v40 = vrot.slane %v1533_v23, 1  ;;  %v1540_v51 = vshll.u32 %v7439_v6, 16  ;;  %v1290_v23 = vld [vmem:[#allocation2 + $0x3c] sm:$0xf] }
 0x1e6   : > { %3086 = vmatmul.mubr.bf16.gmra.mrb[68].mxu1 %v7321_v54  ;;  %v6537_v54 = vld [vmem:[%s8117_s3 + $0xa0] sm:$0xff]   ;;  %v7446_v4 = vsel %vm1745_vm8, %v3871_v28, %v3872_v5  ;;  %v3623_v38 = vsel %vm1488_vm9, %v3618_v15, %v3622_v39  ;;  %v6546_v5 = vld [vmem:[%s8117_s3 + $0xa8] sm:$0xff]   ;;  %v6616_v39 = vld [vmem:[#allocation2 + $0x38] ss:$0 sps:$4 sm:$0x11]  }
 0x1e7   : > { %3093 = vmatprep.mubr.bf16.mxu1 %v1524_v50  ;;  %6082 = vmatpush3.bf16.msra.mxu1 %v6519_v47  ;;  %8138 = vst [vmem:[#allocation13_spill] sm:$0xff] %v7446_v4  ;;  %v1526_v47 = vshrl.u32 %v7412_v60, 16  ;;  %v3379_v50 = vld [vmem:[#allocation2 + $0x58] sm:$0xf]  ;;  %v3629_v22 = vrot.slane %v3627_v17, 1  ;;  %v1545_v59 = vshll.u32 %v6616_v39, 16 }
 0x1e8   : > { %6083 = vmatprep.subr.bf16.mxu1 %v6528_v35  ;;  %v7455_v28 = vcombine.low %v3378_v25, %v3379_v50  ;;  %v1542_v15 = vrot.slane %v1540_v51, 1  ;;  %v7467_v17 = vld [vmem:[#allocation2 + $0xc4] sm:$0xf]  ;;  %v3644_v39 = vshll.u32 %v7460_v37, 16  ;;  %v1292_v37 = vld [vmem:[#allocation2 + $0x48] sm:$0xf] }
 0x1e9   : > { %v1531_v0 = vor.u32 %v1530_v12, %v1526_v47  ;;  %v3625_v12 = vshrl.u32 %v7433_v63, 16  ;;  %v6617_v47 = vld [vmem:[#allocation2 + $0x40] sm:$0xf]  ;;  %v7489_v1 = vld [vmem:[#allocation2 + $0x68] ss:$0 sps:$4 sm:$0x11]  }
 0x1ea   : > { %v3639_v50 = vshll.u32 %v7455_v28, 16  ;;  %8141 = vst [vmem:[#allocation16_spill] sm:$0xff] %v7489_v1 }
 0x1eb   : > { %4137 = vmatmul.mubr.bf16.gmra.mrb[148].mxu0 %v7366_v11  ;;  %6084 = vmatpush3.bf16.msra.mxu1 %v6528_v35  ;;  %v1536_v11 = vsel %vm1488_vm9, %v1531_v0, %v1535_v40  ;;  %v3634_v35 = vrot.slane %v3632_v21, 1  ;;  %v3430_v40 = vld [vmem:[#allocation2 + $0xc0] sm:$0xe]  ;;  %v3630_v25 = vor.u32 %v3629_v22, %v3625_v12  ;;  %v1538_v21 = vshrl.u32 %v7439_v6, 16 }
 0x1ec   : > { %4144 = vmatprep.mubr.bf16.mxu0 %v3623_v38  ;;  %6085 = vmatprep.subr.bf16.mxu1 %v6537_v54  ;;  %v7462_v38 = vcombine.low %v1290_v23, %v6617_v47  ;;  %v7474_v47 = vld [vmem:[#allocation2 + $0xc8] ss:$0 sps:$4 sm:$0x11]   ;;  %v5073_v4 = vcombine.low %v3430_v40, %v7467_v17 }
 0x1ed   : > { %v3635_v23 = vsel %vm1488_vm9, %v3630_v25, %v3634_v35  ;;  %v1543_v36 = vor.u32 %v1542_v15, %v1538_v21  ;;  %v3641_v25 = vrot.slane %v3639_v50, 1  ;;  %v6618_v21 = vld [vmem:[#allocation2 + $0x44] ss:$0 sps:$4 sm:$0x11]   ;;  %v3875_v50 = vrot.slane %v7474_v47, 1 }
 0x1ee   : > { %3094 = vmatmul.mubr.bf16.gmra.mrb[72].mxu1 %v7376_v56  ;;  %v6555_v56 = vld [vmem:[%s8117_s3 + $0xb0] sm:$0xff]   ;;  %v1552_v9 = vshll.u32 %v7462_v38, 16  ;;  %v3874_v7 = vrot.slane %v5073_v4, 1  ;;  %v1550_v4 = vshrl.u32 %v7462_v38, 16 }
 0x1ef   : > { %3101 = vmatprep.mubr.bf16.mxu1 %v1536_v11  ;;  %6086 = vmatpush3.bf16.msra.mxu1 %v6537_v54  ;;  %v1547_v11 = vrot.slane %v1545_v59, 1  ;;  %v3380_v54 = vld [vmem:[#allocation2 + $0x60] sm:$0xf]  ;;  %v7478_v59 = vld [vmem:[#allocation2 + $0x64] sm:$0xf] }
 0x1f0   : > { %6087 = vmatprep.subr.bf16.mxu1 %v6546_v5  ;;  %8140 = vst [vmem:[#allocation15_spill] sm:$0xff] %v7478_v59 }
 0x1f1   : > { %v5523_v0 = vpop.f32.mrb[0].mxu1  ;;  %v1548_v15 = vsel %vm1488_vm9, %v1543_v36, %v1547_v11  ;;  %v7497_v36 = vld [vmem:[%s8117_s3 + $0x200] sm:$0xff]  }
 0x1f2   : > { %v5524_v51 = vpop.f32.mrb[1].mxu1 }
 0x1f3   : > { %4145 = vmatmul.mubr.bf16.gmra.mrb[152].mxu0 %v7396_v52  ;;  %6088 = vmatpush3.bf16.msra.mxu1 %v6546_v5  ;;  %v5525_v22 = vadd.f32 %v5524_v51, %v5523_v0  ;;  %v5526_v12 = vpop.f32.mrb[2].mxu1  ;;  %v6562_v52 = vld [vmem:[%s8117_s3 + $0xb8] sm:$0xff]   ;;  %v7484_v5 = vcombine.low %v3380_v54, %v7478_v59  ;;  %v3637_v0 = vshrl.u32 %v7455_v28, 16  ;;  %v1557_v51 = vshll.u32 %v6618_v21, 16  ;;  %v6619_v59 = vld [vmem:[#allocation2 + $0x4c] sm:$0xf] }
 0x1f4   : > { %4152 = vmatprep.mubr.bf16.mxu0 %v3635_v23  ;;  %6089 = vmatprep.subr.bf16.mxu1 %v6555_v56  ;;  %v5527_v35 = vpop.f32.mrb[3].mxu1  ;;  %v3646_v23 = vrot.slane %v3644_v39, 1  ;;  %v1554_v54 = vrot.slane %v1552_v9, 1  ;;  %v7492_v53 = vcombine.low %v1292_v37, %v6619_v59  ;;  %v7501_v39 = vsel %vm1745_vm8, %v3874_v7, %v3875_v50  ;;  %v7504_v9 = vld [vmem:[#allocation2 + $0x70] sm:$0xf] }
 0x1f5   : > { %v5528_v40 = vadd.f32 %v5527_v35, %v5526_v12  ;;  %v3651_v11 = vshll.u32 %v7484_v5, 16  ;;  %8142 = vst [vmem:[#allocation17_spill] sm:$0xff] %v7501_v39  ;;  %v3382_v12 = vld [vmem:[#allocation2 + $0x6c] sm:$0xf]  ;;  %8143 = vst [vmem:[#allocation18_spill] sm:$0xff] %v7504_v9  ;;  %v3656_v59 = vshll.u32 %v7489_v1, 16 }
 0x1f6   : > { %3102 = vmatmul.mubr.bf16.gmra.mrb[76].mxu1 %v7412_v60  ;;  %v3642_v60 = vor.u32 %v3641_v25, %v3637_v0  ;;  %v1555_v35 = vor.u32 %v1554_v54, %v1550_v4  ;;  %v1564_v25 = vshll.u32 %v7492_v53, 16  ;;  %v1294_v0 = vld [vmem:[#allocation2 + $0x54] sm:$0xf]  ;;  %v6620_v21 = vld [vmem:[#allocation2 + $0x50] ss:$0 sps:$4 sm:$0x11]  }
 0x1f7   : > { %3109 = vmatprep.mubr.bf16.mxu1 %v1548_v15  ;;  %6090 = vmatpush3.bf16.msra.mxu1 %v6555_v56  ;;  %v1559_v56 = vrot.slane %v1557_v51, 1  ;;  %v3653_v7 = vrot.slane %v3651_v11, 1  ;;  %v7512_v15 = vcombine.low %v3382_v12, %v7504_v9  ;;  %v1569_v51 = vshll.u32 %v6620_v21, 16  ;;  %v7517_v54 = vld [vmem:[#allocation2 + $0x74] ss:$0 sps:$4 sm:$0x11]  }
 0x1f8   : > { %6091 = vmatprep.subr.bf16.mxu1 %v6562_v52  ;;  %v3647_v37 = vsel %vm1488_vm9, %v3642_v60, %v3646_v23  ;;  %v3658_v50 = vrot.slane %v3656_v59, 1  ;;  %v1566_v4 = vrot.slane %v1564_v25, 1  ;;  %v7520_v11 = vcombine.low %v1294_v0, %v7198_v32  ;;  %v3384_v9 = vld [vmem:[#allocation2 + $0x78] sm:$0xf] }
 0x1f9   : > { %v1571_v39 = vrot.slane %v1569_v51, 1 }
 0x1fb   : > { %4153 = vmatmul.mubr.bf16.gmra.mrb[156].mxu0 %v7433_v63  ;;  %6092 = vmatpush3.bf16.msra.mxu1 %v6562_v52  ;;  %v1560_v63 = vsel %vm1488_vm9, %v1555_v35, %v1559_v56  ;;  %v3649_v52 = vshrl.u32 %v7484_v5, 16  ;;  %v3663_v56 = vshll.u32 %v7512_v15, 16 }
 0x1fc   : > { %4160 = vmatprep.mubr.bf16.mxu0 %v3647_v37  ;;  %6125 = vmatprep.subr.bf16.mxu1 %v7497_v36 }
 0x1fd   : > { %v3665_v51 = vrot.slane %v3663_v56, 1 }
 0x1fe   : > { %3110 = vmatmul.mubr.bf16.gmra.mrb[80].mxu1 %v7439_v6  ;;  %v3654_v6 = vor.u32 %v3653_v7, %v3649_v52  ;;  %v1576_v52 = vshll.u32 %v7520_v11, 16 }
 0x1ff   : > { %v6047_v23 = vpop.f32.mrb[108].mxu0  ;;  %3117 = vmatprep.mubr.bf16.mxu1 %v1560_v63  ;;  %v1562_v63 = vshrl.u32 %v7492_v53, 16 }
 0x200   : > { %v2774_v60 = vpop.f32.mrb[109].mxu0  ;;  %v3659_v32 = vsel %vm1488_vm9, %v3654_v6, %v3658_v50  ;;  %v6621_v50 = vld [vmem:[#allocation2 + $0x5c] ss:$0 sps:$4 sm:$0x11]  }
 0x201   : > { %v7522_v12 = vadd.f32 %v5525_v22, %v2774_v60  ;;  %v6048_v37 = vpop.f32.mrb[110].mxu0  ;;  %v3668_v22 = vshll.u32 %v7517_v54, 16  ;;  %v1567_v7 = vor.u32 %v1566_v4, %v1562_v63  ;;  %v7532_v60 = vld [vmem:[#allocation2 + $0x7c] sm:$0xf]  ;;  %v1581_v6 = vshll.u32 %v6621_v50, 16 }
 0x202   : > { %v5529_v35 = vpop.f32.mrb[4].mxu1  ;;  %v2777_v21 = vpop.f32.mrb[111].mxu0  ;;  %v3661_v4 = vshrl.u32 %v7512_v15, 16  ;;  %v7542_v63 = vld [vmem:[#allocation2 + $0x80] ss:$0 sps:$4 sm:$0x11]  }
 0x203   : > { %8144 = vst [vmem:[#allocation19_spill] sm:$0xff] %v7522_v12  ;;  %v7526_v59 = vadd.f32 %v5528_v40, %v2777_v21  ;;  %v5530_v1 = vpop.f32.mrb[5].mxu1  ;;  %4161 = vmatmul.mubr.bf16.gmra.mrb[160].mxu0 %v7455_v28  ;;  %v7535_v40 = vcombine.low %v3384_v9, %v7532_v60  ;;  %v1296_v21 = vld [vmem:[#allocation2 + $0x60] sm:$0xf]  ;;  %v1578_v9 = vrot.slane %v1576_v52, 1 }
 0x204   : > { %v5531_v25 = vadd.f32 %v5530_v1, %v5529_v35  ;;  %v5532_v0 = vpop.f32.mrb[6].mxu1  ;;  %4168 = vmatprep.mubr.bf16.mxu0 %v3659_v32  ;;  %v1572_v1 = vsel %vm1488_vm9, %v1567_v7, %v1571_v39  ;;  %v3670_v35 = vrot.slane %v3668_v22, 1  ;;  %v7547_v32 = vcombine.low %v1296_v21, %v7219_v27  ;;  %v7551_v7 = vld [vmem:[#allocation2 + $0x88] sm:$0xf] }
 0x205   : > { %8145 = vst [vmem:[#allocation20_spill] sm:$0xff] %v7526_v59  ;;  %v5533_v12 = vpop.f32.mrb[7].mxu1  ;;  %v3680_v22 = vshll.u32 %v7542_v63, 16 }
 0x206   : > { %v7537_v59 = vadd.f32 %v6047_v23, %v5531_v25  ;;  %v5534_v28 = vadd.f32 %v5533_v12, %v5532_v0  ;;  %3118 = vmatmul.mubr.bf16.gmra.mrb[84].mxu1 %v7462_v38  ;;  %v3666_v23 = vor.u32 %v3665_v51, %v3661_v4  ;;  %v1574_v12 = vshrl.u32 %v7520_v11, 16  ;;  %v3386_v0 = vld [vmem:[#allocation2 + $0x84] sm:$0xf]  ;;  %v1298_v4 = vld [vmem:[#allocation2 + $0x6c] sm:$0xf] }
 0x207   : > { %3125 = vmatprep.mubr.bf16.mxu1 %v1572_v1  ;;  %v3675_v38 = vshll.u32 %v7535_v40, 16  ;;  %v1583_v25 = vrot.slane %v1581_v6, 1  ;;  %v1588_v21 = vshll.u32 %v7547_v32, 16  ;;  %v7558_v6 = vcombine.low %v3386_v0, %v7551_v7 }
 0x208   : > { %v7544_v56 = vadd.f32 %v6048_v37, %v5534_v28  ;;  %v3671_v37 = vsel %vm1488_vm9, %v3666_v23, %v3670_v35  ;;  %v1579_v51 = vor.u32 %v1578_v9, %v1574_v12  ;;  %v1593_v35 = vshll.u32 %v7226_v45, 16  ;;  %v7564_v9 = vld [vmem:[#allocation2 + $0x8c] ss:$0 sps:$4 sm:$0x11]  }
 0x209   : > { %v3677_v50 = vrot.slane %v3675_v38, 1  ;;  %v3673_v23 = vshrl.u32 %v7535_v40, 16  ;;  %v1590_v12 = vrot.slane %v1588_v21, 1  ;;  %v7567_v38 = vcombine.low %v1298_v4, %v7231_v58 }
 0x20a   : > { %8146 = vst [vmem:[#allocation21_spill] sm:$0xff] %v7544_v56  ;;  %v5535_v39 = vpop.f32.mrb[8].mxu1  ;;  %v1605_v4 = vshll.u32 %v7247_v18, 16 }
 0x20b   : > { %v5536_v1 = vpop.f32.mrb[9].mxu1  ;;  %4169 = vmatmul.mubr.bf16.gmra.mrb[164].mxu0 %v7484_v5  ;;  %v1584_v5 = vsel %vm1488_vm9, %v1579_v51, %v1583_v25  ;;  %v3678_v0 = vor.u32 %v3677_v50, %v3673_v23  ;;  %v3692_v25 = vshll.u32 %v7564_v9, 16  ;;  %v1600_v51 = vshll.u32 %v7567_v38, 16 }
 0x20c   : > { %v5537_v52 = vadd.f32 %v5536_v1, %v5535_v39  ;;  %v5538_v27 = vpop.f32.mrb[10].mxu1  ;;  %4176 = vmatprep.mubr.bf16.mxu0 %v3671_v37  ;;  %v3682_v39 = vrot.slane %v3680_v22, 1  ;;  %v3687_v1 = vshll.u32 %v7558_v6, 16  ;;  %v1586_v37 = vshrl.u32 %v7547_v32, 16 }
 0x20d   : > { %v5539_v28 = vpop.f32.mrb[11].mxu1  ;;  %v1598_v18 = vshrl.u32 %v7567_v38, 16 }
 0x20e   : > { %v5540_v56 = vadd.f32 %v5539_v28, %v5538_v27  ;;  %3126 = vmatmul.mubr.bf16.gmra.mrb[88].mxu1 %v7492_v53  ;;  %v1595_v53 = vrot.slane %v1593_v35, 1  ;;  %v3388_v27 = vld [vmem:[#allocation2 + $0x90] sm:$0xf]  ;;  %v3683_v45 = vsel %vm1488_vm9, %v3678_v0, %v3682_v39  ;;  %v1591_v22 = vor.u32 %v1590_v12, %v1586_v37  ;;  %v1300_v28 = vld [vmem:[#allocation2 + $0x78] sm:$0xf] }
 0x20f   : > { %3133 = vmatprep.mubr.bf16.mxu1 %v1584_v5  ;;  %v3689_v21 = vrot.slane %v3687_v1, 1  ;;  %v7576_v58 = vcombine.low %v3388_v27, %v7368_v34  ;;  %v3685_v5 = vshrl.u32 %v7558_v6, 16  ;;  %v3694_v35 = vrot.slane %v3692_v25, 1 }
 0x210   : > { %v1596_v50 = vsel %vm1488_vm9, %v1591_v22, %v1595_v53  ;;  %v1602_v39 = vrot.slane %v1600_v51, 1  ;;  %v7583_v12 = vcombine.low %v1300_v28, %v7251_v33  ;;  %v1607_v27 = vrot.slane %v1605_v4, 1 }
 0x211   : > { %v3690_v1 = vor.u32 %v3689_v21, %v3685_v5 }
 0x212   : > { %v1603_v21 = vor.u32 %v1602_v39, %v1598_v18 }
 0x213   : > { %4177 = vmatmul.mubr.bf16.gmra.mrb[168].mxu0 %v7512_v15  ;;  %v3695_v33 = vsel %vm1488_vm9, %v3690_v1, %v3694_v35  ;;  %v3697_v35 = vshrl.u32 %v7576_v58, 16 }
 0x214   : > { %4184 = vmatprep.mubr.bf16.mxu0 %v3683_v45  ;;  %v3390_v45 = vld [vmem:[#allocation2 + $0x9c] sm:$0xf] }
 0x215   : > { %v7596_v4 = vcombine.low %v3390_v45, %v7372_v43 }
 0x216   : > { %3134 = vmatmul.mubr.bf16.gmra.mrb[92].mxu1 %v7520_v11  ;;  %v3699_v11 = vshll.u32 %v7576_v58, 16 }
 0x217   : > { %v6051_v15 = vpop.f32.mrb[112].mxu0  ;;  %3141 = vmatprep.mubr.bf16.mxu1 %v1596_v50  ;;  %v1612_v50 = vshll.u32 %v7583_v12, 16 }
 0x218   : > { %v2790_v23 = vpop.f32.mrb[113].mxu0 }
 0x219   : > { %v7585_v0 = vadd.f32 %v5537_v52, %v2790_v23  ;;  %v6052_v34 = vpop.f32.mrb[114].mxu0  ;;  %v3704_v52 = vshll.u32 %v7374_v41, 16  ;;  %v3701_v23 = vrot.slane %v3699_v11, 1  ;;  %v1617_v41 = vshll.u32 %v7265_v55, 16 }
 0x21a   : > { %v5541_v37 = vpop.f32.mrb[12].mxu1  ;;  %v2793_v53 = vpop.f32.mrb[115].mxu0  ;;  %v1614_v11 = vrot.slane %v1612_v50, 1  ;;  %v1304_v50 = vld [vmem:[#allocation2 + $0x90] sm:$0xf] }
 0x21b   : > { %v7589_v22 = vadd.f32 %v5540_v56, %v2793_v53  ;;  %v5542_v25 = vpop.f32.mrb[13].mxu1  ;;  %4185 = vmatmul.mubr.bf16.gmra.mrb[172].mxu0 %v7535_v40  ;;  %v1302_v56 = vld [vmem:[#allocation2 + $0x84] sm:$0xf]  ;;  %v1608_v40 = vsel %vm1488_vm9, %v1603_v21, %v1607_v27  ;;  %v3706_v39 = vrot.slane %v3704_v52, 1  ;;  %v1619_v45 = vrot.slane %v1617_v41, 1 }
 0x21c   : > { %v5543_v51 = vadd.f32 %v5542_v25, %v5541_v37  ;;  %v5544_v28 = vpop.f32.mrb[14].mxu1  ;;  %4192 = vmatprep.mubr.bf16.mxu0 %v3695_v33  ;;  %v7607_v43 = vcombine.low %v1302_v56, %v7290_v13  ;;  %v3702_v37 = vor.u32 %v3701_v23, %v3697_v35  ;;  %v3392_v27 = vld [vmem:[#allocation2 + $0xa8] sm:$0xf]  ;;  %v1629_v23 = vshll.u32 %v7294_v57, 16 }
 0x21d   : > { %8147 = vst [vmem:[#allocation22_spill] sm:$0xff] %v7589_v22  ;;  %v5545_v5 = vpop.f32.mrb[15].mxu1  ;;  %v7616_v21 = vcombine.low %v3392_v27, %v7378_v61  ;;  %v7623_v41 = vcombine.low %v1304_v50, %v7296_v2  ;;  %v3728_v57 = vshll.u32 %v7388_v31, 16 }
 0x21e   : > { %v7598_v53 = vadd.f32 %v6051_v15, %v5543_v51  ;;  %v5546_v22 = vadd.f32 %v5545_v5, %v5544_v28  ;;  %3142 = vmatmul.mubr.bf16.gmra.mrb[96].mxu1 %v7547_v32  ;;  %v3711_v15 = vshll.u32 %v7596_v4, 16  ;;  %v1610_v32 = vshrl.u32 %v7583_v12, 16 }
 0x21f   : > { %3149 = vmatprep.mubr.bf16.mxu1 %v1608_v40  ;;  %v3707_v55 = vsel %vm1488_vm9, %v3702_v37, %v3706_v39  ;;  %v1624_v52 = vshll.u32 %v7607_v43, 16  ;;  %v3723_v61 = vshll.u32 %v7616_v21, 16  ;;  %v1622_v39 = vshrl.u32 %v7607_v43, 16  ;;  %v3394_v37 = vld [vmem:[#allocation2 + $0xb4] sm:$0xf] }
 0x220   : > { %v7604_v1 = vadd.f32 %v6052_v34, %v5546_v22  ;;  %v3716_v34 = vshll.u32 %v7382_v20, 16  ;;  %v1615_v13 = vor.u32 %v1614_v11, %v1610_v32  ;;  %v3713_v28 = vrot.slane %v3711_v15, 1 }
 0x221   : > { %v3709_v20 = vshrl.u32 %v7596_v4, 16  ;;  %v1626_v40 = vrot.slane %v1624_v52, 1  ;;  %v1631_v11 = vrot.slane %v1629_v23, 1  ;;  %v3725_v32 = vrot.slane %v3723_v61, 1  ;;  %v3396_v23 = vld [vmem:[#allocation2 + $0xc0] sm:$0xf] }
 0x222   : > { %v5547_v18 = vpop.f32.mrb[16].mxu1  ;;  %v3718_v56 = vrot.slane %v3716_v34, 1  ;;  %v7632_v2 = vcombine.low %v3394_v37, %v7417_v26  ;;  %v3730_v31 = vrot.slane %v3728_v57, 1 }
 0x223   : > { %v5548_v25 = vpop.f32.mrb[17].mxu1  ;;  %4193 = vmatmul.mubr.bf16.gmra.mrb[176].mxu0 %v7558_v6  ;;  %v1620_v6 = vsel %vm1488_vm9, %v1615_v13, %v1619_v45  ;;  %v3714_v35 = vor.u32 %v3713_v28, %v3709_v20  ;;  %v1627_v15 = vor.u32 %v1626_v40, %v1622_v39  ;;  %v1306_v45 = vld [vmem:[#allocation2 + $0x9c] sm:$0xf] }
 0x224   : > { %v5549_v22 = vadd.f32 %v5548_v25, %v5547_v18  ;;  %v5550_v33 = vpop.f32.mrb[18].mxu1  ;;  %4200 = vmatprep.mubr.bf16.mxu0 %v3707_v55  ;;  %v1636_v18 = vshll.u32 %v7623_v41, 16  ;;  %v1641_v25 = vshll.u32 %v7302_v16, 16  ;;  %v3721_v55 = vshrl.u32 %v7616_v21, 16 }
 0x225   : > { %v5551_v51 = vpop.f32.mrb[19].mxu1  ;;  %v1632_v27 = vsel %vm1488_vm9, %v1627_v15, %v1631_v11  ;;  %v7639_v13 = vcombine.low %v1306_v45, %v7298_v3  ;;  %v1634_v16 = vshrl.u32 %v7623_v41, 16  ;;  %v3733_v45 = vshrl.u32 %v7632_v2, 16 }
 0x226   : > { %v5552_v5 = vadd.f32 %v5551_v51, %v5550_v33  ;;  %3150 = vmatmul.mubr.bf16.gmra.mrb[100].mxu1 %v7567_v38  ;;  %v3719_v38 = vsel %vm1488_vm9, %v3714_v35, %v3718_v56  ;;  %v1638_v33 = vrot.slane %v1636_v18, 1  ;;  %v3726_v51 = vor.u32 %v3725_v32, %v3721_v55  ;;  %v3398_v18 = vld [vmem:[#allocation2 + $0xcc] sm:$0xf]  ;;  %v7659_v32 = vld [vmem:[#allocation2 + $0xd0] sm:$0xf] }
 0x227   : > { %3157 = vmatprep.mubr.bf16.mxu1 %v1620_v6  ;;  %v1643_v6 = vrot.slane %v1641_v25, 1  ;;  %v1648_v39 = vshll.u32 %v7639_v13, 16 }
 0x228   : > { %v3731_v3 = vsel %vm1488_vm9, %v3726_v51, %v3730_v31  ;;  %v1639_v61 = vor.u32 %v1638_v33, %v1634_v16  ;;  %v7669_v31 = vcombine.low %v3398_v18, %v7659_v32 }
 0x22b   : > { %4201 = vmatmul.mubr.bf16.gmra.mrb[180].mxu0 %v7576_v58 }
 0x22c   : > { %4208 = vmatprep.mubr.bf16.mxu0 %v3719_v38  ;;  %v7652_v38 = vcombine.low %v3396_v23, %v7467_v17  ;;  %v1650_v17 = vrot.slane %v1648_v39, 1 }
 0x22e   : > { %3158 = vmatmul.mubr.bf16.gmra.mrb[104].mxu1 %v7583_v12  ;;  %v3735_v12 = vshll.u32 %v7632_v2, 16 }
 0x22f   : > { %v6055_v58 = vpop.f32.mrb[116].mxu0  ;;  %3165 = vmatprep.mubr.bf16.mxu1 %v1632_v27 }
 0x230   : > { %v2806_v34 = vpop.f32.mrb[117].mxu0  ;;  %v3737_v37 = vrot.slane %v3735_v12, 1  ;;  %v3752_v12 = vshll.u32 %v7474_v47, 16  ;;  %v1665_v47 = vshll.u32 %v7317_v46, 16 }
 0x231   : > { %v7641_v52 = vadd.f32 %v5549_v22, %v2806_v34  ;;  %v6056_v26 = vpop.f32.mrb[118].mxu0  ;;  %v3740_v22 = vshll.u32 %v7426_v24, 16  ;;  %v1653_v24 = vshll.u32 %v7315_v44, 16  ;;  %v1646_v34 = vshrl.u32 %v7639_v13, 16 }
 0x232   : > { %v5553_v28 = vpop.f32.mrb[20].mxu1  ;;  %v2809_v50 = vpop.f32.mrb[119].mxu0  ;;  %v3738_v55 = vor.u32 %v3737_v37, %v3733_v45 }
 0x233   : > { %v7645_v20 = vadd.f32 %v5552_v5, %v2809_v50  ;;  %v5554_v56 = vpop.f32.mrb[21].mxu1  ;;  %4209 = vmatmul.mubr.bf16.gmra.mrb[184].mxu0 %v7596_v4  ;;  %v1308_v5 = vld [vmem:[#allocation2 + $0xa8] sm:$0xf]  ;;  %v1644_v4 = vsel %vm1488_vm9, %v1639_v61, %v1643_v6  ;;  %v3742_v27 = vrot.slane %v3740_v22, 1  ;;  %v1655_v33 = vrot.slane %v1653_v24, 1 }
 0x234   : > { %v5555_v40 = vadd.f32 %v5554_v56, %v5553_v28  ;;  %v5556_v35 = vpop.f32.mrb[22].mxu1  ;;  %4216 = vmatprep.mubr.bf16.mxu0 %v3731_v3  ;;  %v1651_v50 = vor.u32 %v1650_v17, %v1646_v34  ;;  %v1310_v6 = vld [vmem:[#allocation2 + $0xb4] sm:$0xf]  ;;  %v3759_v22 = vshll.u32 %v7669_v31, 16  ;;  %v3754_v61 = vrot.slane %v3752_v12, 1 }
 0x235   : > { %v5557_v11 = vpop.f32.mrb[23].mxu1  ;;  %v7676_v3 = vld [vmem:[#allocation2 + $0xd4] ss:$0 sps:$4 sm:$0x11]  }
 0x236   : > { %v7654_v57 = vadd.f32 %v6055_v58, %v5555_v40  ;;  %v5558_v15 = vadd.f32 %v5557_v11, %v5556_v35  ;;  %3166 = vmatmul.mubr.bf16.gmra.mrb[108].mxu1 %v7607_v43  ;;  %v7665_v58 = vcombine.low %v1308_v5, %v7304_v49  ;;  %v3747_v43 = vshll.u32 %v7652_v38, 16  ;;  %v6622_v11 = vld [vmem:[#allocation2 + $0xb8] sm:$0xf] }
 0x237   : > { %3173 = vmatprep.mubr.bf16.mxu1 %v1644_v4  ;;  %v3745_v35 = vshrl.u32 %v7652_v38, 16  ;;  %v4898_v37 = vcombine.low %v1310_v6, %v6622_v11  ;;  %v3761_v4 = vrot.slane %v3759_v22, 1  ;;  %v3764_v24 = vshll.u32 %v7676_v3, 16 }
 0x238   : > { %v7662_v25 = vadd.f32 %v6056_v26, %v5558_v15  ;;  %v3743_v26 = vsel %vm1488_vm9, %v3738_v55, %v3742_v27  ;;  %v1660_v16 = vshll.u32 %v7665_v58, 16  ;;  %v3749_v56 = vrot.slane %v3747_v43, 1 }
 0x239   : > { %v3757_v15 = vshrl.u32 %v7669_v31, 16  ;;  %v1658_v18 = vshrl.u32 %v7665_v58, 16  ;;  %v1672_v27 = vshll.u32 %v4898_v37, 16  ;;  %v3766_v55 = vrot.slane %v3764_v24, 1 }
 0x23a   : > { %v5559_v44 = vpop.f32.mrb[24].mxu1  ;;  %v1662_v39 = vrot.slane %v1660_v16, 1  ;;  %v3750_v5 = vor.u32 %v3749_v56, %v3745_v35  ;;  %v1670_v6 = vshrl.u32 %v4898_v37, 16 }
 0x23b   : > { %v5560_v51 = vpop.f32.mrb[25].mxu1  ;;  %4217 = vmatmul.mubr.bf16.gmra.mrb[188].mxu0 %v7616_v21  ;;  %v1656_v21 = vsel %vm1488_vm9, %v1651_v50, %v1655_v33  ;;  %v3762_v17 = vor.u32 %v3761_v4, %v3757_v15  ;;  %v6624_v15 = vld [vmem:[#allocation2 + $0x8] ss:$0 sps:$4 sm:$0x11]  }
 0x23c   : > { %v5561_v28 = vadd.f32 %v5560_v51, %v5559_v44  ;;  %v5562_v49 = vpop.f32.mrb[26].mxu1  ;;  %4224 = vmatprep.mubr.bf16.mxu0 %v3743_v26  ;;  %v3755_v46 = vsel %vm1488_vm9, %v3750_v5, %v3754_v61  ;;  %v1663_v45 = vor.u32 %v1662_v39, %v1658_v18  ;;  %v1677_v44 = vshll.u32 %v7330_v19, 16 }
 0x23d   : > { %v5563_v23 = vpop.f32.mrb[27].mxu1  ;;  %v1674_v51 = vrot.slane %v1672_v27, 1  ;;  %v3767_v12 = vsel %vm1488_vm9, %v3762_v17, %v3766_v55  ;;  %v6574_v55 = vld [vmem:[%s8117_s3 + $0x210] sm:$0xff]  }
 0x23e   : > { %v5564_v40 = vadd.f32 %v5563_v23, %v5562_v49  ;;  %3174 = vmatmul.mubr.bf16.gmra.mrb[112].mxu1 %v7623_v41  ;;  %v1667_v41 = vrot.slane %v1665_v47, 1  ;;  %v1328_v49 = vld [vmem:[#allocation2] sm:$0xe]  ;;  %v1679_v23 = vrot.slane %v1677_v44, 1  ;;  %v6623_v47 = vld [vmem:[#allocation2 + $0x4] sm:$0xf] }
 0x23f   : > { %3181 = vmatprep.mubr.bf16.mxu1 %v1656_v21  ;;  %v1675_v21 = vor.u32 %v1674_v51, %v1670_v6 }
 0x240   : > { %v1668_v43 = vsel %vm1488_vm9, %v1663_v45, %v1667_v41 }
 0x241   : > { %v1680_v11 = vsel %vm1488_vm9, %v1675_v21, %v1679_v23  ;;  %v6586_v21 = vld [vmem:[%s8117_s3 + $0x230] sm:$0xff]  }
 0x243   : > { %4225 = vmatmul.mubr.bf16.gmra.mrb[192].mxu0 %v7632_v2 }
 0x244   : > { %4232 = vmatprep.mubr.bf16.mxu0 %v3755_v46 }
 0x246   : > { %3182 = vmatmul.mubr.bf16.gmra.mrb[116].mxu1 %v7639_v13 }
 0x247   : > { %v6059_v34 = vpop.f32.mrb[120].mxu0  ;;  %3189 = vmatprep.mubr.bf16.mxu1 %v1668_v43 }
 0x248   : > { %v2822_v33 = vpop.f32.mrb[121].mxu0 }
 0x249   : > { %v7691_v26 = vadd.f32 %v5561_v28, %v2822_v33  ;;  %v6060_v2 = vpop.f32.mrb[122].mxu0  ;;  %v4915_v28 = vcombine.low %v1328_v49, %v6623_v47  ;;  %v6589_v47 = vld [vmem:[%s8117_s3 + $0x238] sm:$0xff]  }
 0x24a   : > { %v5565_v50 = vpop.f32.mrb[28].mxu1  ;;  %v2825_v16 = vpop.f32.mrb[123].mxu0 }
 0x24b   : > { %v7694_v56 = vadd.f32 %v5564_v40, %v2825_v16  ;;  %v5566_v13 = vpop.f32.mrb[29].mxu1  ;;  %4233 = vmatmul.mubr.bf16.gmra.mrb[196].mxu0 %v7652_v38  ;;  %v1746_v5 = vrot.slane %v4915_v28, 1  ;;  %v1747_v38 = vrot.slane %v6624_v15, 1  ;;  %v6580_v16 = vld [vmem:[%s8117_s3 + $0x220] sm:$0xff]  }
 0x24c   : > { %v5567_v19 = vadd.f32 %v5566_v13, %v5565_v50  ;;  %v5568_v22 = vpop.f32.mrb[30].mxu1  ;;  %4240 = vmatprep.mubr.bf16.mxu0 %v3767_v12 }
 0x24d   : > { %v5569_v35 = vpop.f32.mrb[31].mxu1  ;;  %v1748_v46 = vsel %vm1745_vm8, %v1746_v5, %v1747_v38 }
 0x24e   : > { %v7697_v61 = vadd.f32 %v6059_v34, %v5567_v19  ;;  %v5570_v39 = vadd.f32 %v5569_v35, %v5568_v22  ;;  %3190 = vmatmul.mubr.bf16.gmra.mrb[120].mxu1 %v7665_v58  ;;  %v6571_v58 = vld [vmem:[%s8117_s3 + $0x208] sm:$0xff]  }
 0x24f   : > { %3197 = vmatprep.mubr.bf16.mxu1 %v1680_v11 }
 0x250   : > { %v7701_v40 = vadd.f32 %v6060_v2, %v5570_v39 }
 0x252   : > { %v5571_v4 = vpop.f32.mrb[32].mxu1 }
 0x253   : > { %v5572_v24 = vpop.f32.mrb[33].mxu1  ;;  %4241 = vmatmul.mubr.bf16.gmra.mrb[200].mxu0 %v7669_v31 }
 0x254   : > { %v5573_v18 = vadd.f32 %v5572_v24, %v5571_v4  ;;  %v5574_v41 = vpop.f32.mrb[34].mxu1 }
 0x255   : > { %v5575_v45 = vpop.f32.mrb[35].mxu1 }
 0x256   : > { %v5576_v27 = vadd.f32 %v5575_v45, %v5574_v41  ;;  %3198 = vmatmul.mubr.bf16.gmra.mrb[124].mxu1 %v4898_v37  ;;  %v8148_v41 = vld [vmem:[#allocation3_spill] sm:$0xff] }
 0x257   : > { %6093 = vmatprep.mubr.bf16.mxu1 %v1748_v46 }
 0x25e   : > { %6094 = vmatmul.mubr.bf16.vlgmr.msra.gmra.mrb[128].mxu1 %v6963_v29 }
 0x25f   : > { %v6063_v17 = vpop.f32.mrb[124].mxu0  ;;  %6126 = vmatpush3.bf16.msra.mxu1 %v7497_v36  ;;  %6097 = vmatprep.mubr.bf16.mxu1 %v7025_v62  ;;  %v6577_v62 = vld [vmem:[%s8117_s3 + $0x218] sm:$0xff]  }
 0x260   : > { %v2838_v31 = vpop.f32.mrb[125].mxu0  ;;  %6127 = vmatprep.subr.bf16.mxu1 %v6571_v58 }
 0x261   : > { %v7714_v43 = vadd.f32 %v5573_v18, %v2838_v31  ;;  %v6064_v37 = vpop.f32.mrb[126].mxu0 }
 0x262   : > { %v5577_v44 = vpop.f32.mrb[36].mxu1  ;;  %v2841_v34 = vpop.f32.mrb[127].mxu0 }
 0x263   : > { %v7716_v33 = vadd.f32 %v5576_v27, %v2841_v34  ;;  %v5578_v51 = vpop.f32.mrb[37].mxu1  ;;  %6128 = vmatpush3.bf16.msra.mxu1 %v6571_v58  ;;  %v3416_v34 = vld [vmem:[#allocation2 + $0x18] sm:$0xe] }
 0x264   : > { %v5579_v29 = vadd.f32 %v5578_v51, %v5577_v44  ;;  %v5580_v2 = vpop.f32.mrb[38].mxu1  ;;  %6129 = vmatprep.subr.bf16.mxu1 %v6574_v55  ;;  %v8151_v44 = vld [vmem:[#allocation6_spill] sm:$0xff]  ;;  %v8152_v51 = vld [vmem:[#allocation7_spill] sm:$0xff] }
 0x265   : > { %v5581_v36 = vpop.f32.mrb[39].mxu1 }
 0x266   : > { %v7721_v12 = vadd.f32 %v6063_v17, %v5579_v29  ;;  %v5582_v49 = vadd.f32 %v5581_v36, %v5580_v2  ;;  %6098 = vmatmul.mubr.bf16.gmra.mrb[132].mxu1 %v7047_v30  ;;  %v6583_v30 = vld [vmem:[%s8117_s3 + $0x228] sm:$0xff]   ;;  %v8153_v2 = vld [vmem:[#allocation8_spill] sm:$0xff]  ;;  %v6625_v36 = vld [vmem:[#allocation2 + $0x1c] sm:$0xf] }
 0x267   : > { %6101 = vmatprep.mubr.bf16.mxu1 %v7113_v42  ;;  %6130 = vmatpush3.bf16.msra.mxu1 %v6574_v55 }
 0x268   : > { %v7725_v50 = vadd.f32 %v6064_v37, %v5582_v49  ;;  %6131 = vmatprep.subr.bf16.mxu1 %v6577_v62  ;;  %v8150_v37 = vld [vmem:[#allocation5_spill] sm:$0xff]  ;;  %v5059_v49 = vcombine.low %v3416_v34, %v6625_v36 }
 0x269   : > { %v3420_v36 = vld [vmem:[#allocation2 + $0x48] sm:$0xe] }
 0x26a   : > { %v5583_v6 = vpop.f32.mrb[40].mxu1 }
 0x26b   : > { %v5584_v23 = vpop.f32.mrb[41].mxu1  ;;  %6132 = vmatpush3.bf16.msra.mxu1 %v6577_v62 }
 0x26c   : > { %v5585_v13 = vadd.f32 %v5584_v23, %v5583_v6  ;;  %v5586_v19 = vpop.f32.mrb[42].mxu1  ;;  %6133 = vmatprep.subr.bf16.mxu1 %v6580_v16 }
 0x26d   : > { %v5587_v22 = vpop.f32.mrb[43].mxu1 }
 0x26e   : > { %v5588_v42 = vadd.f32 %v5587_v22, %v5586_v19  ;;  %6102 = vmatmul.mubr.bf16.gmra.mrb[136].mxu1 %v7136_v10  ;;  %v6626_v19 = vld [vmem:[#allocation2 + $0x20] ss:$0 sps:$4 sm:$0x11]  }
 0x26f   : > { %6105 = vmatprep.mubr.bf16.mxu1 %v7188_v48  ;;  %6134 = vmatpush3.bf16.msra.mxu1 %v6580_v16 }
 0x270   : > { %6135 = vmatprep.subr.bf16.mxu1 %v6583_v30 }
 0x273   : > { %6136 = vmatpush3.bf16.msra.mxu1 %v6583_v30  ;;  %v3833_v30 = vrot.slane %v6626_v19, 1 }
 0x274   : > { %6137 = vmatprep.subr.bf16.mxu1 %v6586_v21 }
 0x276   : > { %6106 = vmatmul.mubr.bf16.gmra.mrb[140].mxu1 %v7214_v8 }
 0x277   : > { %v6067_v28 = vpop.f32.mrb[128].mxu0  ;;  %6109 = vmatprep.mubr.bf16.mxu1 %v7244_v14  ;;  %6138 = vmatpush3.bf16.msra.mxu1 %v6586_v21  ;;  %v8149_v14 = vld [vmem:[#allocation4_spill] sm:$0xff] }
 0x278   : > { %v2854_v10 = vpop.f32.mrb[129].mxu0  ;;  %6139 = vmatprep.subr.bf16.mxu1 %v6589_v47 }
 0x279   : > { %v7743_v48 = vadd.f32 %v5585_v13, %v2854_v10  ;;  %v6068_v35 = vpop.f32.mrb[130].mxu0 }
 0x27a   : > { %v5589_v39 = vpop.f32.mrb[44].mxu1  ;;  %v2857_v11 = vpop.f32.mrb[131].mxu0 }
 0x27b   : > { %v7745_v5 = vadd.f32 %v5588_v42, %v2857_v11  ;;  %v5590_v15 = vpop.f32.mrb[45].mxu1  ;;  %6140 = vmatpush3.bf16.msra.mxu1 %v6589_v47 }
 0x27c   : > { %v5591_v38 = vadd.f32 %v5590_v15, %v5589_v39  ;;  %v5592_v4 = vpop.f32.mrb[46].mxu1  ;;  %v8154_v15 = vld [vmem:[#allocation9_spill] sm:$0xff] }
 0x27d   : > { %v5593_v24 = vpop.f32.mrb[47].mxu1 }
 0x27e   : > { %v7747_v18 = vadd.f32 %v6067_v28, %v5591_v38  ;;  %v5594_v8 = vadd.f32 %v5593_v24, %v5592_v4  ;;  %6110 = vmatmul.mubr.bf16.gmra.mrb[144].mxu1 %v8148_v41  ;;  %v3832_v28 = vrot.slane %v5059_v49, 1  ;;  %v3417_v4 = vld [vmem:[#allocation2 + $0x24] sm:$0xe]  ;;  %v6627_v24 = vld [vmem:[#allocation2 + $0x28] sm:$0xf] }
 0x27f   : > { %6113 = vmatprep.mubr.bf16.mxu1 %v8149_v14  ;;  %v6628_v14 = vld [vmem:[#allocation2 + $0x34] sm:$0xf] }
 0x280   : > { %v7751_v46 = vadd.f32 %v6068_v35, %v5594_v8  ;;  %v3418_v35 = vld [vmem:[#allocation2 + $0x30] sm:$0xe]  ;;  %v3834_v38 = vsel %vm1745_vm8, %v3832_v28, %v3833_v30  ;;  %v5060_v8 = vcombine.low %v3417_v4, %v6627_v24  ;;  %v6632_v30 = vld [vmem:[#allocation2 + $0x4c] sm:$0xf] }
 0x281   : > { %v6634_v28 = vld [vmem:[#allocation2 + $0x50] ss:$0 sps:$4 sm:$0x11]  }
 0x282   : > { %v5595_v45 = vpop.f32.mrb[48].mxu1 }
 0x283   : > { %v5596_v27 = vpop.f32.mrb[49].mxu1 }
 0x284   : > { %v5597_v58 = vadd.f32 %v5596_v27, %v5595_v45  ;;  %v5598_v17 = vpop.f32.mrb[50].mxu1  ;;  %v5061_v45 = vcombine.low %v3418_v35, %v6628_v14  ;;  %v6629_v27 = vld [vmem:[#allocation2 + $0x2c] ss:$0 sps:$4 sm:$0x11]  }
 0x285   : > { %v5599_v31 = vpop.f32.mrb[51].mxu1 }
 0x286   : > { %v5600_v55 = vadd.f32 %v5599_v31, %v5598_v17  ;;  %6114 = vmatmul.mubr.bf16.gmra.mrb[148].mxu1 %v8150_v37  ;;  %v6630_v31 = vld [vmem:[#allocation2 + $0x38] ss:$0 sps:$4 sm:$0x11]  }
 0x287   : > { %6117 = vmatprep.mubr.bf16.mxu1 %v8151_v44  ;;  %v3835_v44 = vrot.slane %v5060_v8, 1  ;;  %v3421_v8 = vld [vmem:[#allocation2 + $0x54] sm:$0xe] }
 0x28e   : > { %6118 = vmatmul.mubr.bf16.gmra.mrb[152].mxu1 %v8152_v51 }
 0x28f   : > { %v6071_v29 = vpop.f32.mrb[132].mxu0  ;;  %6121 = vmatprep.mubr.bf16.mxu1 %v8153_v2 }
 0x290   : > { %v2870_v62 = vpop.f32.mrb[133].mxu0 }
 0x291   : > { %v7757_v16 = vadd.f32 %v5597_v58, %v2870_v62  ;;  %v6072_v6 = vpop.f32.mrb[134].mxu0  ;;  %v3836_v58 = vrot.slane %v6629_v27, 1 }
 0x292   : > { %v5601_v23 = vpop.f32.mrb[52].mxu1  ;;  %v2873_v13 = vpop.f32.mrb[135].mxu0 }
 0x293   : > { %v7759_v22 = vadd.f32 %v5600_v55, %v2873_v13  ;;  %v5602_v42 = vpop.f32.mrb[53].mxu1  ;;  %v3839_v55 = vrot.slane %v6630_v31, 1  ;;  %v3837_v62 = vsel %vm1745_vm8, %v3835_v44, %v3836_v58  ;;  %v6631_v13 = vld [vmem:[#allocation2 + $0x40] sm:$0xf]  ;;  %v8155_v31 = vld [vmem:[#allocation15_spill] sm:$0xff] }
 0x294   : > { %v5603_v21 = vadd.f32 %v5602_v42, %v5601_v23  ;;  %v5604_v47 = vpop.f32.mrb[54].mxu1  ;;  %v3419_v23 = vld [vmem:[#allocation2 + $0x3c] sm:$0xe]  ;;  %v5063_v42 = vcombine.low %v3420_v36, %v6632_v30  ;;  %v8157_v36 = vld [vmem:[#allocation16_spill] sm:$0xff] }
 0x295   : > { %v5605_v10 = vpop.f32.mrb[55].mxu1  ;;  %v5062_v19 = vcombine.low %v3419_v23, %v6631_v13 }
 0x296   : > { %v7761_v39 = vadd.f32 %v6071_v29, %v5603_v21  ;;  %v5606_v11 = vadd.f32 %v5605_v10, %v5604_v47  ;;  %6122 = vmatmul.mubr.bf16.gmra.mrb[156].mxu1 %v8154_v15  ;;  %v3838_v29 = vrot.slane %v5061_v45, 1  ;;  %v6633_v21 = vld [vmem:[#allocation2 + $0x44] ss:$0 sps:$4 sm:$0x11]   ;;  %v3845_v10 = vrot.slane %v6634_v28, 1 }
 0x297   : > { %6141 = vmatprep.mubr.bf16.mxu1 %v3834_v38  ;;  %v3842_v47 = vrot.slane %v6633_v21, 1  ;;  %v3841_v35 = vrot.slane %v5062_v19, 1  ;;  %v3422_v38 = vld [vmem:[#allocation2 + $0x60] sm:$0xe]  ;;  %v6635_v45 = vld [vmem:[#allocation2 + $0x58] sm:$0xf] }
 0x298   : > { %v7765_v41 = vadd.f32 %v6072_v6, %v5606_v11  ;;  %v3840_v6 = vsel %vm1745_vm8, %v3838_v29, %v3839_v55  ;;  %v3844_v11 = vrot.slane %v5063_v42, 1  ;;  %v5064_v27 = vcombine.low %v3421_v8, %v6635_v45  ;;  %v3424_v28 = vld [vmem:[#allocation2 + $0x78] sm:$0xe] }
 0x299   : > { %v3843_v15 = vsel %vm1745_vm8, %v3841_v35, %v3842_v47  ;;  %v5065_v55 = vcombine.low %v3422_v38, %v8155_v31  ;;  %v8158_v38 = vld [vmem:[#allocation18_spill] sm:$0xff]  ;;  %v3854_v31 = vrot.slane %v7517_v54, 1 }
 0x29a   : > { %v5607_v17 = vpop.f32.mrb[56].mxu1  ;;  %v3846_v24 = vsel %vm1745_vm8, %v3844_v11, %v3845_v10  ;;  %v3847_v19 = vrot.slane %v5064_v27, 1 }
 0x29b   : > { %v5608_v37 = vpop.f32.mrb[57].mxu1  ;;  %v3850_v42 = vrot.slane %v5065_v55, 1 }
 0x29c   : > { %v5609_v34 = vadd.f32 %v5608_v37, %v5607_v17  ;;  %v5610_v51 = vpop.f32.mrb[58].mxu1 }
 0x29d   : > { %v5611_v2 = vpop.f32.mrb[59].mxu1 }
 0x29e   : > { %v5612_v49 = vadd.f32 %v5611_v2, %v5610_v51  ;;  %6142 = vmatmul.mubr.bf16.vlgmr.msra.gmra.mrb[128].mxu1 %v3837_v62  ;;  %v8156_v51 = vld [vmem:[#allocation14_spill] sm:$0xff] }
 0x29f   : > { %6145 = vmatprep.mubr.bf16.mxu1 %v3840_v6  ;;  %v3848_v29 = vrot.slane %v8156_v51, 1  ;;  %v3851_v6 = vrot.slane %v8157_v36, 1 }
 0x2a1   : > { %v3849_v47 = vsel %vm1745_vm8, %v3847_v19, %v3848_v29  ;;  %v3852_v35 = vsel %vm1745_vm8, %v3850_v42, %v3851_v6  ;;  %v8159_v6 = vld [vmem:[#allocation19_spill] sm:$0xff]  ;;  %v8160_v42 = vld [vmem:[#allocation20_spill] sm:$0xff] }
 0x2a6   : > { %v6075_v4 = vpop.f32.mrb[136].mxu0  ;;  %6146 = vmatmul.mubr.bf16.gmra.mrb[132].mxu1 %v3843_v15 }
 0x2a7   : > { %v2886_v14 = vpop.f32.mrb[137].mxu0  ;;  %6149 = vmatprep.mubr.bf16.mxu1 %v3846_v24 }
 0x2a8   : > { %v7771_v58 = vadd.f32 %v5609_v34, %v2886_v14  ;;  %v6076_v17 = vpop.f32.mrb[138].mxu0 }
 0x2a9   : > { %v5613_v37 = vpop.f32.mrb[60].mxu1  ;;  %v2889_v44 = vpop.f32.mrb[139].mxu0 }
 0x2aa   : > { %v7775_v2 = vadd.f32 %v5612_v49, %v2889_v44  ;;  %v5614_v62 = vpop.f32.mrb[61].mxu1  ;;  %v3423_v49 = vld [vmem:[#allocation2 + $0x6c] sm:$0xe]  ;;  %v3857_v44 = vrot.slane %v7542_v63, 1 }
 0x2ab   : > { %v5615_v23 = vadd.f32 %v5614_v62, %v5613_v37  ;;  %v5616_v13 = vpop.f32.mrb[62].mxu1  ;;  %v5066_v24 = vcombine.low %v3423_v49, %v8158_v38 }
 0x2ac   : > { %v5617_v30 = vpop.f32.mrb[63].mxu1 }
 0x2ad   : > { %v7778_v21 = vadd.f32 %v6075_v4, %v5615_v23  ;;  %v5618_v34 = vadd.f32 %v5617_v30, %v5616_v13  ;;  %v5067_v4 = vcombine.low %v3424_v28, %v7532_v60  ;;  %v3853_v29 = vrot.slane %v5066_v24, 1  ;;  %v3425_v30 = vld [vmem:[#allocation2 + $0x84] sm:$0xe] }
 0x2ae   : > { %v5795_v10 = vpop.f32.mrb[140].mxu0  ;;  %6150 = vmatmul.mubr.bf16.gmra.mrb[136].mxu1 %v3849_v47  ;;  %v5068_v47 = vcombine.low %v3425_v30, %v7551_v7 }
 0x2af   : > { %v7782_v11 = vadd.f32 %v6076_v17, %v5618_v34  ;;  %v5796_v15 = vpop.f32.mrb[141].mxu0  ;;  %6153 = vmatprep.mubr.bf16.mxu1 %v3852_v35  ;;  %v3856_v36 = vrot.slane %v5067_v4, 1  ;;  %v3855_v60 = vsel %vm1745_vm8, %v3853_v29, %v3854_v31 }
 0x2b0   : > { %v7785_v8 = vadd.f32 %v5796_v15, %v5795_v10  ;;  %v5798_v14 = vpop.f32.mrb[142].mxu0  ;;  %v3860_v15 = vrot.slane %v7564_v9, 1  ;;  %v8162_v9 = vld [vmem:[#allocation10_spill] sm:$0xff] }
 0x2b1   : > { %v5659_v45 = vpop.f32.mrb[64].mxu1  ;;  %v5799_v27 = vpop.f32.mrb[143].mxu0  ;;  %v3858_v54 = vsel %vm1745_vm8, %v3856_v36, %v3857_v44 }
 0x2b2   : > { %v7789_v55 = vadd.f32 %v5799_v27, %v5798_v14  ;;  %v5660_v37 = vpop.f32.mrb[65].mxu1 }
 0x2b3   : > { %v5661_v17 = vadd.f32 %v5660_v37, %v5659_v45  ;;  %v5662_v51 = vpop.f32.mrb[66].mxu1  ;;  %v3859_v45 = vrot.slane %v5068_v47, 1 }
 0x2b4   : > { %v5663_v62 = vpop.f32.mrb[67].mxu1 }
 0x2b5   : > { %v7793_v23 = vadd.f32 %v5661_v17, %v8159_v6  ;;  %v5664_v13 = vadd.f32 %v5663_v62, %v5662_v51  ;;  %v3861_v7 = vsel %vm1745_vm8, %v3859_v45, %v3860_v15  ;;  %v8161_v17 = vld [vmem:[#allocation21_spill] sm:$0xff] }
 0x2b6   : > { %v5801_v19 = vpop.f32.mrb[144].mxu0  ;;  %6154 = vmatmul.mubr.bf16.gmra.mrb[140].mxu1 %v3855_v60  ;;  %v3431_v45 = vld [vmem:[#allocation2 + $0xcc] sm:$0xe] }
 0x2b7   : > { %v7798_v34 = vadd.f32 %v5664_v13, %v8160_v42  ;;  %v5802_v63 = vpop.f32.mrb[145].mxu0  ;;  %6157 = vmatprep.mubr.bf16.mxu1 %v3858_v54 }
 0x2b8   : > { %v7801_v28 = vadd.f32 %v5802_v63, %v5801_v19  ;;  %v5804_v10 = vpop.f32.mrb[146].mxu0 }
 0x2b9   : > { %v5665_v35 = vpop.f32.mrb[68].mxu1  ;;  %v5805_v49 = vpop.f32.mrb[147].mxu0 }
 0x2ba   : > { %v7804_v38 = vadd.f32 %v5805_v49, %v5804_v10  ;;  %v5666_v24 = vpop.f32.mrb[69].mxu1  ;;  %v8163_v10 = vld [vmem:[#allocation11_spill] sm:$0xff] }
 0x2bb   : > { %v5667_v14 = vadd.f32 %v5666_v24, %v5665_v35  ;;  %v5668_v4 = vpop.f32.mrb[70].mxu1  ;;  %v8164_v35 = vld [vmem:[#allocation22_spill] sm:$0xff]  ;;  %v8165_v24 = vld [vmem:[#allocation12_spill] sm:$0xff] }
 0x2bc   : > { %v5669_v27 = vpop.f32.mrb[71].mxu1 }
 0x2bd   : > { %v7807_v31 = vadd.f32 %v5667_v14, %v7537_v59  ;;  %v5670_v37 = vadd.f32 %v5669_v27, %v5668_v4 }
 0x2be   : > { %v5807_v44 = vpop.f32.mrb[148].mxu0  ;;  %6158 = vmatmul.mubr.bf16.gmra.mrb[144].mxu1 %v3861_v7 }
 0x2bf   : > { %v7811_v51 = vadd.f32 %v5670_v37, %v8161_v17  ;;  %v5808_v29 = vpop.f32.mrb[149].mxu0  ;;  %6161 = vmatprep.mubr.bf16.mxu1 %v8162_v9 }
 0x2c0   : > { %v7814_v62 = vadd.f32 %v5808_v29, %v5807_v44  ;;  %v5810_v36 = vpop.f32.mrb[150].mxu0  ;;  %v5074_v29 = vcombine.low %v3431_v45, %v7659_v32 }
 0x2c1   : > { %v5671_v6 = vpop.f32.mrb[72].mxu1  ;;  %v5811_v13 = vpop.f32.mrb[151].mxu0 }
 0x2c2   : > { %v7816_v60 = vadd.f32 %v5811_v13, %v5810_v36  ;;  %v5672_v59 = vpop.f32.mrb[73].mxu1 }
 0x2c3   : > { %v5673_v19 = vadd.f32 %v5672_v59, %v5671_v6  ;;  %v5674_v54 = vpop.f32.mrb[74].mxu1  ;;  %v8166_v59 = vld [vmem:[#allocation13_spill] sm:$0xff] }
 0x2c4   : > { %v5675_v30 = vpop.f32.mrb[75].mxu1 }
 0x2c5   : > { %v7819_v42 = vadd.f32 %v5673_v19, %v7585_v0  ;;  %v5676_v63 = vadd.f32 %v5675_v30, %v5674_v54  ;;  %v8167_v30 = vld [vmem:[#allocation17_spill] sm:$0xff] }
 0x2c6   : > { %v5813_v47 = vpop.f32.mrb[152].mxu0  ;;  %6162 = vmatmul.mubr.bf16.gmra.mrb[148].mxu1 %v8163_v10 }
 0x2c7   : > { %v7823_v49 = vadd.f32 %v5676_v63, %v8164_v35  ;;  %v5814_v15 = vpop.f32.mrb[153].mxu0  ;;  %6165 = vmatprep.mubr.bf16.mxu1 %v8165_v24  ;;  %v3877_v63 = vrot.slane %v5074_v29, 1 }
 0x2c8   : > { %v7826_v14 = vadd.f32 %v5814_v15, %v5813_v47  ;;  %v5816_v4 = vpop.f32.mrb[154].mxu0  ;;  %v3878_v47 = vrot.slane %v7676_v3, 1 }
 0x2c9   : > { %v5677_v27 = vpop.f32.mrb[76].mxu1  ;;  %v5817_v37 = vpop.f32.mrb[155].mxu0 }
 0x2ca   : > { %v7828_v7 = vadd.f32 %v5817_v37, %v5816_v4  ;;  %v5678_v0 = vpop.f32.mrb[77].mxu1 }
 0x2cb   : > { %v5679_v44 = vadd.f32 %v5678_v0, %v5677_v27  ;;  %v5680_v17 = vpop.f32.mrb[78].mxu1  ;;  %v3879_v27 = vsel %vm1745_vm8, %v3877_v63, %v3878_v47 }
 0x2cc   : > { %v5681_v9 = vpop.f32.mrb[79].mxu1 }
 0x2cd   : > { %v7832_v36 = vadd.f32 %v5679_v44, %v7598_v53  ;;  %v5682_v6 = vadd.f32 %v5681_v9, %v5680_v17 }
 0x2ce   : > { %v5819_v13 = vpop.f32.mrb[156].mxu0  ;;  %6166 = vmatmul.mubr.bf16.gmra.mrb[152].mxu1 %v8166_v59 }
 0x2cf   : > { %v7836_v19 = vadd.f32 %v5682_v6, %v7604_v1  ;;  %v5820_v54 = vpop.f32.mrb[157].mxu0  ;;  %6169 = vmatprep.mubr.bf16.mxu1 %v8167_v30 }
 0x2d0   : > { %v7840_v10 = vadd.f32 %v5820_v54, %v5819_v13  ;;  %v5822_v32 = vpop.f32.mrb[158].mxu0 }
 0x2d1   : > { %v5683_v35 = vpop.f32.mrb[80].mxu1  ;;  %v5823_v15 = vpop.f32.mrb[159].mxu0 }
 0x2d2   : > { %v7842_v53 = vadd.f32 %v5823_v15, %v5822_v32  ;;  %v5684_v24 = vpop.f32.mrb[81].mxu1 }
 0x2d3   : > { %v5685_v4 = vadd.f32 %v5684_v24, %v5683_v35  ;;  %v5686_v45 = vpop.f32.mrb[82].mxu1 }
 0x2d4   : > { %v5687_v1 = vpop.f32.mrb[83].mxu1 }
 0x2d5   : > { %v7846_v37 = vadd.f32 %v5685_v4, %v7641_v52  ;;  %v5688_v0 = vadd.f32 %v5687_v1, %v5686_v45 }
 0x2d6   : > { %v5825_v44 = vpop.f32.mrb[160].mxu0  ;;  %6170 = vmatmul.mubr.bf16.gmra.mrb[156].mxu1 %v3879_v27  ;;  %v7869_v27 = vadd.f32 %v7789_v55, %v7798_v34 }
 0x2d7   : > { %v7849_v3 = vadd.f32 %v5688_v0, %v7645_v20  ;;  %v5826_v17 = vpop.f32.mrb[161].mxu0  ;;  %v7860_v20 = vadd.f32 %v7785_v8, %v7793_v23 }
 0x2d8   : > { %v7851_v29 = vadd.f32 %v5826_v17, %v5825_v44  ;;  %v5828_v9 = vpop.f32.mrb[162].mxu0 }
 0x2d9   : > { %v5689_v6 = vpop.f32.mrb[84].mxu1  ;;  %v5829_v13 = vpop.f32.mrb[163].mxu0 }
 0x2da   : > { %v7853_v59 = vadd.f32 %v5829_v13, %v5828_v9  ;;  %v5690_v54 = vpop.f32.mrb[85].mxu1  ;;  %v7878_v13 = vadd.f32 %v7801_v28, %v7807_v31 }
 0x2db   : > { %v5691_v30 = vadd.f32 %v5690_v54, %v5689_v6  ;;  %v5692_v63 = vpop.f32.mrb[86].mxu1 }
 0x2dc   : > { %v5693_v47 = vpop.f32.mrb[87].mxu1 }
 0x2dd   : > { %v7856_v52 = vadd.f32 %v5691_v30, %v7654_v57  ;;  %v5694_v32 = vadd.f32 %v5693_v47, %v5692_v63  ;;  %v7887_v63 = vadd.f32 %v7804_v38, %v7811_v51 }
 0x2de   : > { %v5831_v35 = vpop.f32.mrb[164].mxu0 }
 0x2df   : > { %v7863_v15 = vadd.f32 %v5694_v32, %v7662_v25  ;;  %v5832_v24 = vpop.f32.mrb[165].mxu0 }
 0x2e0   : > { %v7865_v4 = vadd.f32 %v5832_v24, %v5831_v35  ;;  %v5834_v45 = vpop.f32.mrb[166].mxu0 }
 0x2e1   : > { %v5695_v1 = vpop.f32.mrb[88].mxu1  ;;  %v5835_v57 = vpop.f32.mrb[167].mxu0 }
 0x2e2   : > { %v7871_v0 = vadd.f32 %v5835_v57, %v5834_v45  ;;  %v5696_v44 = vpop.f32.mrb[89].mxu1  ;;  %v7896_v57 = vadd.f32 %v7814_v62, %v7819_v42 }
 0x2e3   : > { %v5697_v17 = vadd.f32 %v5696_v44, %v5695_v1  ;;  %v5698_v9 = vpop.f32.mrb[90].mxu1 }
 0x2e4   : > { %v5699_v8 = vpop.f32.mrb[91].mxu1 }
 0x2e5   : > { %v7874_v23 = vadd.f32 %v5697_v17, %v7691_v26  ;;  %v5700_v25 = vadd.f32 %v5699_v8, %v5698_v9  ;;  %v7905_v9 = vadd.f32 %v7816_v60, %v7823_v49 }
 0x2e6   : > { %v5837_v6 = vpop.f32.mrb[168].mxu0 }
 0x2e7   : > { %v7881_v55 = vadd.f32 %v5700_v25, %v7694_v56  ;;  %v5838_v34 = vpop.f32.mrb[169].mxu0 }
 0x2e8   : > { %v7883_v54 = vadd.f32 %v5838_v34, %v5837_v6  ;;  %v5840_v30 = vpop.f32.mrb[170].mxu0 }
 0x2e9   : > { %v5701_v47 = vpop.f32.mrb[92].mxu1  ;;  %v5841_v26 = vpop.f32.mrb[171].mxu0 }
 0x2ea   : > { %v7889_v32 = vadd.f32 %v5841_v26, %v5840_v30  ;;  %v5702_v35 = vpop.f32.mrb[93].mxu1  ;;  %v7914_v26 = vadd.f32 %v7826_v14, %v7832_v36 }
 0x2eb   : > { %v5703_v24 = vadd.f32 %v5702_v35, %v5701_v47  ;;  %v5704_v45 = vpop.f32.mrb[94].mxu1 }
 0x2ec   : > { %v5705_v28 = vpop.f32.mrb[95].mxu1 }
 0x2ed   : > { %v7892_v31 = vadd.f32 %v5703_v24, %v7697_v61  ;;  %v5706_v56 = vadd.f32 %v5705_v28, %v5704_v45  ;;  %v7921_v45 = vadd.f32 %v7828_v7, %v7836_v19 }
 0x2ee   : > { %v5843_v1 = vpop.f32.mrb[172].mxu0 }
 0x2ef   : > { %v7899_v38 = vadd.f32 %v5706_v56, %v7701_v40  ;;  %v5844_v51 = vpop.f32.mrb[173].mxu0 }
 0x2f0   : > { %v7901_v44 = vadd.f32 %v5844_v51, %v5843_v1  ;;  %v5846_v17 = vpop.f32.mrb[174].mxu0 }
 0x2f1   : > { %v5707_v8 = vpop.f32.mrb[96].mxu1  ;;  %v5847_v61 = vpop.f32.mrb[175].mxu0 }
 0x2f2   : > { %v7907_v25 = vadd.f32 %v5847_v61, %v5846_v17  ;;  %v5708_v6 = vpop.f32.mrb[97].mxu1 }
 0x2f3   : > { %v5709_v34 = vadd.f32 %v5708_v6, %v5707_v8  ;;  %v5710_v30 = vpop.f32.mrb[98].mxu1 }
 0x2f4   : > { %v5711_v62 = vpop.f32.mrb[99].mxu1 }
 0x2f5   : > { %v7910_v42 = vadd.f32 %v5709_v34, %v7714_v43  ;;  %v5712_v40 = vadd.f32 %v5711_v62, %v5710_v30  ;;  %v7933_v30 = vadd.f32 %v7842_v53, %v7849_v3  ;;  %v7947_v3 = vadd.f32 %v7853_v59, %v7863_v15 }
 0x2f6   : > { %v5849_v47 = vpop.f32.mrb[176].mxu0  ;;  %v7956_v59 = vadd.f32 %v7865_v4, %v7874_v23 }
 0x2f7   : > { %v7917_v60 = vadd.f32 %v5712_v40, %v7716_v33  ;;  %v5850_v49 = vpop.f32.mrb[177].mxu0  ;;  %v7926_v33 = vadd.f32 %v7840_v10, %v7846_v37 }
 0x2f8   : > { %v5851_v35 = vadd.f32 %v5850_v49, %v5849_v47  ;;  %v5852_v24 = vpop.f32.mrb[178].mxu0 }
 0x2f9   : > { %v5713_v28 = vpop.f32.mrb[100].mxu1  ;;  %v5853_v56 = vpop.f32.mrb[179].mxu0 }
 0x2fa   : > { %v5854_v43 = vadd.f32 %v5853_v56, %v5852_v24  ;;  %v5714_v1 = vpop.f32.mrb[101].mxu1 }
 0x2fb   : > { %v5715_v51 = vadd.f32 %v5714_v1, %v5713_v28  ;;  %v5716_v17 = vpop.f32.mrb[102].mxu1 }
 0x2fc   : > { %v5717_v8 = vpop.f32.mrb[103].mxu1 }
 0x2fd   : > { %v3152_v14 = vadd.f32 %v5715_v51, %v7721_v12  ;;  %v5718_v36 = vadd.f32 %v5717_v8, %v5716_v17 }
 0x2fe   : > { %v5855_v61 = vpop.f32.mrb[180].mxu0 }
 0x2ff   : > { %v3155_v6 = vadd.f32 %v5718_v36, %v7725_v50  ;;  %v5856_v34 = vpop.f32.mrb[181].mxu0  ;;  %v7940_v50 = vadd.f32 %v7851_v29, %v7856_v52 }
 0x300   : > { %v7929_v7 = vadd.f32 %v5856_v34, %v5855_v61  ;;  %v5858_v19 = vpop.f32.mrb[182].mxu0 }
 0x301   : > { %v5719_v62 = vpop.f32.mrb[104].mxu1  ;;  %v5859_v40 = vpop.f32.mrb[183].mxu0 }
 0x302   : > { %v7935_v47 = vadd.f32 %v5859_v40, %v5858_v19  ;;  %v5720_v12 = vpop.f32.mrb[105].mxu1 }
 0x303   : > { %v5721_v49 = vadd.f32 %v5720_v12, %v5719_v62  ;;  %v5722_v24 = vpop.f32.mrb[106].mxu1 }
 0x304   : > { %v5723_v28 = vpop.f32.mrb[107].mxu1 }
 0x305   : > { %v3160_v10 = vadd.f32 %v5721_v49, %v7743_v48  ;;  %v5724_v37 = vadd.f32 %v5723_v28, %v5722_v24  ;;  %v7961_v49 = vadd.f32 %v7889_v32, %v7899_v38  ;;  %v7972_v38 = vadd.f32 %v7901_v44, %v7910_v42 }
 0x306   : > { %v5861_v56 = vpop.f32.mrb[184].mxu0 }
 0x307   : > { %v7943_v1 = vadd.f32 %v5724_v37, %v7745_v5  ;;  %v5862_v53 = vpop.f32.mrb[185].mxu0  ;;  %v7952_v5 = vadd.f32 %v7883_v54, %v7892_v31 }
 0x308   : > { %v5863_v51 = vadd.f32 %v5862_v53, %v5861_v56  ;;  %v5864_v17 = vpop.f32.mrb[186].mxu0 }
 0x309   : > { %v5725_v8 = vpop.f32.mrb[108].mxu1  ;;  %v5865_v36 = vpop.f32.mrb[187].mxu0 }
 0x30a   : > { %v5866_v61 = vadd.f32 %v5865_v36, %v5864_v17  ;;  %v5726_v48 = vpop.f32.mrb[109].mxu1  ;;  %v7975_v36 = vadd.f32 %v5854_v43, %v3155_v6  ;;  %v7985_v6 = vadd.f32 %v7929_v7, %v3160_v10 }
 0x30b   : > { %v5727_v34 = vadd.f32 %v5726_v48, %v5725_v8  ;;  %v5728_v19 = vpop.f32.mrb[110].mxu1  ;;  %v7968_v8 = vadd.f32 %v5851_v35, %v3152_v14  ;;  %v7979_v14 = vadd.f32 %v7907_v25, %v7917_v60 }
 0x30c   : > { %v5729_v62 = vpop.f32.mrb[111].mxu1 }
 0x30d   : > { %v3168_v29 = vadd.f32 %v5727_v34, %v7747_v18  ;;  %v5730_v52 = vadd.f32 %v5729_v62, %v5728_v19  ;;  %v7965_v18 = vadd.f32 %v7871_v0, %v7881_v55 }
 0x30e   : > { %v5867_v40 = vpop.f32.mrb[188].mxu0 }
 0x30f   : > { %v3171_v15 = vadd.f32 %v5730_v52, %v7751_v46  ;;  %v5868_v12 = vpop.f32.mrb[189].mxu0 }
 0x310   : > { %v5869_v24 = vadd.f32 %v5868_v12, %v5867_v40  ;;  %v5870_v28 = vpop.f32.mrb[190].mxu0 }
 0x311   : > { %v5731_v54 = vpop.f32.mrb[112].mxu1  ;;  %v5871_v31 = vpop.f32.mrb[191].mxu0 }
 0x312   : > { %v5872_v37 = vadd.f32 %v5871_v31, %v5870_v28  ;;  %v5732_v56 = vpop.f32.mrb[113].mxu1  ;;  %v7988_v31 = vadd.f32 %v5866_v61, %v3171_v15 }
 0x313   : > { %v5733_v53 = vadd.f32 %v5732_v56, %v5731_v54  ;;  %v5734_v4 = vpop.f32.mrb[114].mxu1 }
 0x314   : > { %v5735_v23 = vpop.f32.mrb[115].mxu1 }
 0x315   : > { %v3176_v46 = vadd.f32 %v5733_v53, %v7757_v16  ;;  %v5736_v17 = vadd.f32 %v5735_v23, %v5734_v4 }
 0x316   : > { %v5873_v32 = vpop.f32.mrb[192].mxu0 }
 0x317   : > { %v3179_v0 = vadd.f32 %v5736_v17, %v7759_v22  ;;  %v5874_v55 = vpop.f32.mrb[193].mxu0  ;;  %v7982_v22 = vadd.f32 %v5863_v51, %v3168_v29  ;;  %v7992_v51 = vadd.f32 %v7935_v47, %v7943_v1  ;;  %v7997_v29 = vadd.f32 %v5869_v24, %v3176_v46 }
 0x318   : > { %v5875_v48 = vadd.f32 %v5874_v55, %v5873_v32  ;;  %v5876_v34 = vpop.f32.mrb[194].mxu0 }
 0x319   : > { %v5737_v19 = vpop.f32.mrb[116].mxu1  ;;  %v5877_v62 = vpop.f32.mrb[195].mxu0 }
 0x31a   : > { %v5878_v52 = vadd.f32 %v5877_v62, %v5876_v34  ;;  %v5738_v40 = vpop.f32.mrb[117].mxu1 }
 0x31b   : > { %v5739_v16 = vadd.f32 %v5738_v40, %v5737_v19  ;;  %v5740_v12 = vpop.f32.mrb[118].mxu1 }
 0x31c   : > { %v5741_v35 = vpop.f32.mrb[119].mxu1 }
 0x31d   : > { %v3184_v44 = vadd.f32 %v5739_v16, %v7761_v39  ;;  %v5742_v42 = vadd.f32 %v5741_v35, %v5740_v12 }
 0x31e   : > { %v5879_v43 = vpop.f32.mrb[196].mxu0 }
 0x31f   : > { %v3187_v28 = vadd.f32 %v5742_v42, %v7765_v41  ;;  %v5880_v54 = vpop.f32.mrb[197].mxu0  ;;  %v7995_v41 = vadd.f32 %v5875_v48, %v3184_v44  ;;  %v8002_v42 = vadd.f32 %v5872_v37, %v3179_v0  ;;  %v8017_v37 = vld [vmem:[%s8118_s4] ss:$0 sm:$0xff] }
 0x320   : > { %v5881_v56 = vadd.f32 %v5880_v54, %v5879_v43  ;;  %v5882_v53 = vpop.f32.mrb[198].mxu0 }
 0x321   : > { %v5743_v4 = vpop.f32.mrb[120].mxu1  ;;  %v5883_v23 = vpop.f32.mrb[199].mxu0  ;;  %v8000_v34 = vadd.f32 %v5878_v52, %v3187_v28 }
 0x322   : > { %v5884_v25 = vadd.f32 %v5883_v23, %v5882_v53  ;;  %v5744_v60 = vpop.f32.mrb[121].mxu1 }
 0x323   : > { %v5745_v17 = vadd.f32 %v5744_v60, %v5743_v4  ;;  %v5746_v39 = vpop.f32.mrb[122].mxu1 }
 0x324   : > { %v5747_v32 = vpop.f32.mrb[123].mxu1 }
 0x325   : > { %v3192_v7 = vadd.f32 %v5745_v17, %v7771_v58  ;;  %v5748_v10 = vadd.f32 %v5747_v32, %v5746_v39 }
 0x326   : > { %v5885_v61 = vpop.f32.mrb[200].mxu0 }
 0x327   : > { %v3195_v15 = vadd.f32 %v5748_v10, %v7775_v2  ;;  %v5886_v55 = vpop.f32.mrb[201].mxu0  ;;  %v8005_v46 = vadd.f32 %v5881_v56, %v3192_v7 }
 0x328   : > { %v5887_v19 = vadd.f32 %v5886_v55, %v5885_v61  ;;  %v5888_v62 = vpop.f32.mrb[202].mxu0 }
 0x329   : > { %v5749_v40 = vpop.f32.mrb[124].mxu1  ;;  %v5889_v16 = vpop.f32.mrb[203].mxu0  ;;  %v8012_v43 = vadd.f32 %v5884_v25, %v3195_v15 }
 0x32a   : > { %v5750_v12 = vpop.f32.mrb[125].mxu1  ;;  %v5890_v47 = vadd.f32 %v5889_v16, %v5888_v62 }
 0x32b   : > { %v5751_v1 = vadd.f32 %v5750_v12, %v5749_v40  ;;  %v5752_v35 = vpop.f32.mrb[126].mxu1 }
 0x32c   : > { %v5753_v58 = vpop.f32.mrb[127].mxu1 }
 0x32d   : > { %v3200_v48 = vadd.f32 %v5751_v1, %v7778_v21  ;;  %v5754_v24 = vadd.f32 %v5753_v58, %v5752_v35 }
 0x32f   : > { %v3203_v2 = vadd.f32 %v5754_v24, %v7782_v11  ;;  %v8008_v52 = vadd.f32 %v5887_v19, %v3200_v48 }
 0x331   : > { %v8010_v44 = vadd.f32 %v5890_v47, %v3203_v2 }
 0x371   : > { %v6143_v28 = vpop.f32.mrb[128].mxu1 }
 0x372   : > { %v6176_v21 = vadd.f32 %v7878_v13, %v6143_v28  ;;  %v4283_v0 = vpop.f32.mrb[129].mxu1 }
 0x373   : > { %v6180_v54 = vadd.f32 %v7860_v20, %v4283_v0  ;;  %v6144_v56 = vpop.f32.mrb[130].mxu1 }
 0x374   : > { %v4451_v11 = vadd.f32 %v6176_v21, %v8017_v37  ;;  %v6184_v53 = vadd.f32 %v7887_v63, %v6144_v56  ;;  %v4286_v4 = vpop.f32.mrb[131].mxu1 }
 0x375   : > { %v4449_v23 = vadd.f32 %v6180_v54, %v8017_v37  ;;  %v6188_v25 = vadd.f32 %v7869_v27, %v4286_v4 }
 0x376   : > { %v4452_v60 = vadd.f32 %v6184_v53, %v8017_v37  ;;  %v4483_v39 = vmax.f32 %v4451_v11, 0.0 }
 0x377   : > { %v4450_v17 = vadd.f32 %v6188_v25, %v8017_v37  ;;  %v4481_v32 = vmax.f32 %v4449_v23, 0.0 }
 0x378   : > { %v4484_v13 = vmax.f32 %v4452_v60, 0.0 }
 0x379   : > { %v4482_v20 = vmax.f32 %v4450_v17, 0.0  ;;  %v6147_v63 = vpop.f32.mrb[132].mxu1 }
 0x37a   : > { %v5364_v7 = vpack.c.bf16 %v4484_v13, %v4483_v39  ;;  %v6192_v27 = vadd.f32 %v7914_v26, %v6147_v63  ;;  %v4299_v10 = vpop.f32.mrb[133].mxu1 }
 0x37b   : > { %v5359_v61 = vpack.c.bf16 %v4482_v20, %v4481_v32  ;;  %v6196_v15 = vadd.f32 %v7896_v57, %v4299_v10  ;;  %v6148_v55 = vpop.f32.mrb[134].mxu1 }
 0x37c   : > { %5462 = vst [vmem:[%s8031_s17 + $0x8] sm:$0xff] %v5364_v7   ;;  %v4455_v19 = vadd.f32 %v6192_v27, %v8017_v37  ;;  %v6200_v62 = vadd.f32 %v7921_v45, %v6148_v55  ;;  %v4302_v40 = vpop.f32.mrb[135].mxu1 }
 0x37d   : > { %5360 = vst [vmem:[%s8031_s17] sm:$0xff] %v5359_v61   ;;  %v4453_v16 = vadd.f32 %v6196_v15, %v8017_v37  ;;  %v6204_v12 = vadd.f32 %v7905_v9, %v4302_v40 }
 0x37e   : > { %v4456_v47 = vadd.f32 %v6200_v62, %v8017_v37  ;;  %v4487_v1 = vmax.f32 %v4455_v19, 0.0 }
 0x37f   : > { %v4454_v26 = vadd.f32 %v6204_v12, %v8017_v37  ;;  %v4485_v35 = vmax.f32 %v4453_v16, 0.0 }
 0x380   : > { %v4488_v57 = vmax.f32 %v4456_v47, 0.0 }
 0x381   : > { %v4486_v58 = vmax.f32 %v4454_v26, 0.0  ;;  %v6151_v48 = vpop.f32.mrb[136].mxu1 }
 0x382   : > { %v5374_v24 = vpack.c.bf16 %v4488_v57, %v4487_v1  ;;  %v6208_v45 = vadd.f32 %v7940_v50, %v6151_v48  ;;  %v4315_v2 = vpop.f32.mrb[137].mxu1 }
 0x383   : > { %v5369_v28 = vpack.c.bf16 %v4486_v58, %v4485_v35  ;;  %v6212_v21 = vadd.f32 %v7926_v33, %v4315_v2  ;;  %v6152_v0 = vpop.f32.mrb[138].mxu1 }
 0x384   : > { %5464 = vst [vmem:[%s8031_s17 + $0x18] sm:$0xff] %v5374_v24   ;;  %v4459_v9 = vadd.f32 %v6208_v45, %v8017_v37  ;;  %v6216_v54 = vadd.f32 %v7947_v3, %v6152_v0  ;;  %v4318_v56 = vpop.f32.mrb[139].mxu1 }
 0x385   : > { %5463 = vst [vmem:[%s8031_s17 + $0x10] sm:$0xff] %v5369_v28   ;;  %v4457_v11 = vadd.f32 %v6212_v21, %v8017_v37  ;;  %v6220_v53 = vadd.f32 %v7933_v30, %v4318_v56 }
 0x386   : > { %v4460_v4 = vadd.f32 %v6216_v54, %v8017_v37  ;;  %v4491_v23 = vmax.f32 %v4459_v9, 0.0 }
 0x387   : > { %v4458_v50 = vadd.f32 %v6220_v53, %v8017_v37  ;;  %v4489_v25 = vmax.f32 %v4457_v11, 0.0 }
 0x388   : > { %v4492_v33 = vmax.f32 %v4460_v4, 0.0 }
 0x389   : > { %v4490_v60 = vmax.f32 %v4458_v50, 0.0  ;;  %v6155_v17 = vpop.f32.mrb[140].mxu1 }
 0x38a   : > { %v5384_v39 = vpack.c.bf16 %v4492_v33, %v4491_v23  ;;  %v6224_v3 = vadd.f32 %v7952_v5, %v6155_v17  ;;  %v4331_v13 = vpop.f32.mrb[141].mxu1 }
 0x38b   : > { %v5379_v32 = vpack.c.bf16 %v4490_v60, %v4489_v25  ;;  %v6228_v20 = vadd.f32 %v7956_v59, %v4331_v13  ;;  %v6156_v63 = vpop.f32.mrb[142].mxu1 }
 0x38c   : > { %5466 = vst [vmem:[%s8031_s17 + $0x28] sm:$0xff] %v5384_v39   ;;  %v4463_v30 = vadd.f32 %v6224_v3, %v8017_v37  ;;  %v6232_v7 = vadd.f32 %v7961_v49, %v6156_v63  ;;  %v4334_v27 = vpop.f32.mrb[143].mxu1 }
 0x38d   : > { %5465 = vst [vmem:[%s8031_s17 + $0x20] sm:$0xff] %v5379_v32   ;;  %v4461_v10 = vadd.f32 %v6228_v20, %v8017_v37  ;;  %v6236_v61 = vadd.f32 %v7965_v18, %v4334_v27 }
 0x38e   : > { %v4464_v15 = vadd.f32 %v6232_v7, %v8017_v37  ;;  %v4495_v55 = vmax.f32 %v4463_v30, 0.0 }
 0x38f   : > { %v4462_v5 = vadd.f32 %v6236_v61, %v8017_v37  ;;  %v4493_v19 = vmax.f32 %v4461_v10, 0.0 }
 0x390   : > { %v4496_v59 = vmax.f32 %v4464_v15, 0.0 }
 0x391   : > { %v4494_v62 = vmax.f32 %v4462_v5, 0.0  ;;  %v6159_v40 = vpop.f32.mrb[144].mxu1 }
 0x392   : > { %v5394_v16 = vpack.c.bf16 %v4496_v59, %v4495_v55  ;;  %v6240_v49 = vadd.f32 %v7968_v8, %v6159_v40  ;;  %v4347_v12 = vpop.f32.mrb[145].mxu1 }
 0x393   : > { %v5389_v47 = vpack.c.bf16 %v4494_v62, %v4493_v19  ;;  %v6244_v26 = vadd.f32 %v7972_v38, %v4347_v12  ;;  %v6160_v1 = vpop.f32.mrb[146].mxu1 }
 0x394   : > { %5468 = vst [vmem:[%s8031_s17 + $0x38] sm:$0xff] %v5394_v16   ;;  %v4467_v18 = vadd.f32 %v6240_v49, %v8017_v37  ;;  %v6248_v57 = vadd.f32 %v7975_v36, %v6160_v1  ;;  %v4350_v35 = vpop.f32.mrb[147].mxu1 }
 0x395   : > { %5467 = vst [vmem:[%s8031_s17 + $0x30] sm:$0xff] %v5389_v47   ;;  %v4465_v58 = vadd.f32 %v6244_v26, %v8017_v37  ;;  %v6252_v48 = vadd.f32 %v7979_v14, %v4350_v35 }
 0x396   : > { %v4468_v24 = vadd.f32 %v6248_v57, %v8017_v37  ;;  %v4499_v45 = vmax.f32 %v4467_v18, 0.0 }
 0x397   : > { %v4466_v8 = vadd.f32 %v6252_v48, %v8017_v37  ;;  %v4497_v2 = vmax.f32 %v4465_v58, 0.0 }
 0x398   : > { %v4500_v38 = vmax.f32 %v4468_v24, 0.0 }
 0x399   : > { %v4498_v28 = vmax.f32 %v4466_v8, 0.0  ;;  %v6163_v21 = vpop.f32.mrb[148].mxu1 }
 0x39a   : > { %v5404_v0 = vpack.c.bf16 %v4500_v38, %v4499_v45  ;;  %v6256_v36 = vadd.f32 %v7982_v22, %v6163_v21  ;;  %v4363_v9 = vpop.f32.mrb[149].mxu1 }
 0x39b   : > { %v5399_v54 = vpack.c.bf16 %v4498_v28, %v4497_v2  ;;  %v6260_v56 = vadd.f32 %v7985_v6, %v4363_v9  ;;  %v6164_v11 = vpop.f32.mrb[150].mxu1 }
 0x39c   : > { %5470 = vst [vmem:[%s8031_s17 + $0x48] sm:$0xff] %v5404_v0   ;;  %v4471_v14 = vadd.f32 %v6256_v36, %v8017_v37  ;;  %v6264_v53 = vadd.f32 %v7988_v31, %v6164_v11  ;;  %v4366_v4 = vpop.f32.mrb[151].mxu1 }
 0x39d   : > { %5469 = vst [vmem:[%s8031_s17 + $0x40] sm:$0xff] %v5399_v54   ;;  %v4469_v50 = vadd.f32 %v6260_v56, %v8017_v37  ;;  %v6268_v23 = vadd.f32 %v7992_v51, %v4366_v4 }
 0x39e   : > { %v4472_v33 = vadd.f32 %v6264_v53, %v8017_v37  ;;  %v4503_v25 = vmax.f32 %v4471_v14, 0.0 }
 0x39f   : > { %v4470_v22 = vadd.f32 %v6268_v23, %v8017_v37  ;;  %v4501_v60 = vmax.f32 %v4469_v50, 0.0 }
 0x3a0   : > { %v4504_v6 = vmax.f32 %v4472_v33, 0.0 }
 0x3a1   : > { %v4502_v17 = vmax.f32 %v4470_v22, 0.0  ;;  %v6167_v39 = vpop.f32.mrb[152].mxu1 }
 0x3a2   : > { %v5414_v3 = vpack.c.bf16 %v4504_v6, %v4503_v25  ;;  %v6272_v31 = vadd.f32 %v7995_v41, %v6167_v39  ;;  %v4379_v13 = vpop.f32.mrb[153].mxu1 }
 0x3a3   : > { %v5409_v32 = vpack.c.bf16 %v4502_v17, %v4501_v60  ;;  %v6276_v20 = vadd.f32 %v7997_v29, %v4379_v13  ;;  %v6168_v63 = vpop.f32.mrb[154].mxu1 }
 0x3a4   : > { %5472 = vst [vmem:[%s8031_s17 + $0x58] sm:$0xff] %v5414_v3   ;;  %v4475_v51 = vadd.f32 %v6272_v31, %v8017_v37  ;;  %v6280_v30 = vadd.f32 %v8000_v34, %v6168_v63  ;;  %v4382_v7 = vpop.f32.mrb[155].mxu1 }
 0x3a5   : > { %5471 = vst [vmem:[%s8031_s17 + $0x50] sm:$0xff] %v5409_v32   ;;  %v4473_v27 = vadd.f32 %v6276_v20, %v8017_v37  ;;  %v6284_v10 = vadd.f32 %v8002_v42, %v4382_v7 }
 0x3a6   : > { %v4476_v61 = vadd.f32 %v6280_v30, %v8017_v37  ;;  %v4507_v15 = vmax.f32 %v4475_v51, 0.0 }
 0x3a7   : > { %v4474_v41 = vadd.f32 %v6284_v10, %v8017_v37  ;;  %v4505_v5 = vmax.f32 %v4473_v27, 0.0 }
 0x3a8   : > { %v4508_v29 = vmax.f32 %v4476_v61, 0.0 }
 0x3a9   : > { %v4506_v55 = vmax.f32 %v4474_v41, 0.0  ;;  %v6171_v59 = vpop.f32.mrb[156].mxu1 }
 0x3aa   : > { %v5424_v19 = vpack.c.bf16 %v4508_v29, %v4507_v15  ;;  %v6288_v34 = vadd.f32 %v8008_v52, %v6171_v59  ;;  %v4395_v62 = vpop.f32.mrb[157].mxu1 }
 0x3ab   : > { %v5419_v40 = vpack.c.bf16 %v4506_v55, %v4505_v5  ;;  %v6292_v16 = vadd.f32 %v8005_v46, %v4395_v62  ;;  %v6172_v49 = vpop.f32.mrb[158].mxu1 }
 0x3ac   : > { %5474 = vst [vmem:[%s8031_s17 + $0x68] sm:$0xff] %v5424_v19   ;;  %v4479_v42 = vadd.f32 %v6288_v34, %v8017_v37  ;;  %v6296_v12 = vadd.f32 %v8010_v44, %v6172_v49  ;;  %v4398_v47 = vpop.f32.mrb[159].mxu1 }
 0x3ad   : > { %5473 = vst [vmem:[%s8031_s17 + $0x60] sm:$0xff] %v5419_v40   ;;  %v4477_v26 = vadd.f32 %v6292_v16, %v8017_v37  ;;  %v6300_v1 = vadd.f32 %v8012_v43, %v4398_v47 }
 0x3ae   : > { %v4480_v52 = vadd.f32 %v6296_v12, %v8017_v37  ;;  %v4511_v57 = vmax.f32 %v4479_v42, 0.0 }
 0x3af   : > { %v4478_v18 = vadd.f32 %v6300_v1, %v8017_v37  ;;  %v4509_v35 = vmax.f32 %v4477_v26, 0.0 }
 0x3b0   : > { %v4512_v46 = vmax.f32 %v4480_v52, 0.0 }
 0x3b1   : > { %v4510_v58 = vmax.f32 %v4478_v18, 0.0 }
 0x3b2   : > { %v5434_v48 = vpack.c.bf16 %v4512_v46, %v4511_v57 }
 0x3b3   : > { %v5429_v24 = vpack.c.bf16 %v4510_v58, %v4509_v35 }
 0x3b4   : > { %5476 = vst [vmem:[%s8031_s17 + $0x78] sm:$0xff] %v5434_v48  }
 0x3b5   : > { %5475 = vst [vmem:[%s8031_s17 + $0x70] sm:$0xff] %v5429_v24  }
 0x3b6 PF: > { %s15_s20 = sadd.s32 1, %s6658_s20   ;;  %s8168_s18 = smov %s6654_s19 }
 0x3b7   : > { %p12_p5 = scmp.ge.s32.totalorder %s15_s20, 4   ;;  %s8169_s19 = smov %s8171_s21 }
 0x3b9   :  { %14 = sbr.rel (!%p12_p5) target bundleno = 2 (0x2), region = 77 }

</bundles_post_ra>
